<compile_context>
chip_gen: v5e
topology: v5e:2x2
jax: 0.10.0
libtpu: 0.0.40
codegen_flags: <defaults>
</compile_context>

<pallas_src>
import functools

import jax
import jax.numpy as jnp
from jax.experimental import pallas as pl
from jax.experimental.pallas import tpu as pltpu

MAX_HIST = 8          # fixed capacity for hidden_rnn_hist (static shapes across frames)
VMEM_LIMIT = 64 * 1024 * 1024   # explicit scoped-VMEM limit (<= v7x physical)


def _ln(x, g, b):
    """LayerNorm over the last dim (eps=1e-5, elementwise affine), f32 stats."""
    mu = jnp.mean(x, axis=-1, keepdims=True)
    var = jnp.mean(jnp.square(x - mu), axis=-1, keepdims=True)
    return (x - mu) * jax.lax.rsqrt(var + 1e-5) * g + b


# ----------------------------------------------------------------------------
# Kernel 1: LocalRNN block
#   spatially-tiled 1x1 conv + ReLU + mean pool (accumulated in VMEM scratch),
#   then on the last tile: stacked LSTM + residual + LayerNorm, emitting only
#   the last-timestep context (B, Hd).
# ----------------------------------------------------------------------------
def _lrnn_kernel(xs_ref, wc_ref, bc_ref, wih_ref, whh_ref, lb_ref, g_ref,
                 beta_ref, o_ref, acc_ref, *, T, B, S_total):
    s_idx = pl.program_id(0)

    @pl.when(s_idx == 0)
    def _():
        acc_ref[...] = jnp.zeros_like(acc_ref)

    # 1x1 conv over channels == lane-axis matmul, + ReLU, partial spatial sum.
    x = xs_ref[...].astype(jnp.bfloat16)                      # (T*B, St, C)
    y = jax.lax.dot_general(x, wc_ref[...], (((2,), (0,)), ((), ())),
                            preferred_element_type=jnp.float32)
    y = jnp.maximum(y + bc_ref[...], 0.0)                     # (T*B, St, Hd)
    acc_ref[...] += jnp.sum(y, axis=1)                        # (T*B, Hd)

    @pl.when(s_idx == pl.num_programs(0) - 1)
    def _():
        Hd = wc_ref.shape[1]
        NL = wih_ref.shape[0]
        pooled = acc_ref[...] * (1.0 / S_total)               # (T*B, Hd) mean pool

        x_seq = pooled                                        # time-major rows
        last_h = pooled[(T - 1) * B:T * B, :]
        for l in range(NL):
            w_ih = wih_ref[l]                                 # (Hd, 4Hd) bf16
            w_hh = whh_ref[l]                                 # (Hd, 4Hd) bf16
            bias = lb_ref[l]                                  # (1, 4Hd)  f32
            # input-to-hidden projection hoisted out of the time loop:
            gates_x = jnp.dot(x_seq.astype(jnp.bfloat16), w_ih,
                              preferred_element_type=jnp.float32) + bias
            h = jnp.zeros((B, Hd), jnp.float32)
            c = jnp.zeros((B, Hd), jnp.float32)
            outs = []
            for t in range(T):
                g = gates_x[t * B:(t + 1) * B, :] + jnp.dot(
                    h.astype(jnp.bfloat16), w_hh,
                    preferred_element_type=jnp.float32)        # (B, 4Hd)
                i_g = jax.nn.sigmoid(g[:, 0:Hd])
                f_g = jax.nn.sigmoid(g[:, Hd:2 * Hd])
                g_g = jnp.tanh(g[:, 2 * Hd:3 * Hd])
                o_g = jax.nn.sigmoid(g[:, 3 * Hd:4 * Hd])
                c = f_g * c + i_g * g_g
                h = o_g * jnp.tanh(c)
                outs.append(h)
            x_seq = jnp.concatenate(outs, axis=0)             # input to next LSTM layer
            last_h = outs[T - 1]

        # LN(context + residual) at the last timestep (LayerNorm is per-position).
        residual_last = pooled[(T - 1) * B:T * B, :]
        o_ref[...] = _ln(last_h + residual_last, g_ref[...], beta_ref[...])


def _pick_spatial_tile(S):
    for cand in (512, 256, 128, 64, 32, 16, 8):
        if S > cand and S % cand == 0:
            return cand
    return S


def lrnn_block(p, xs, T, B):
    """xs: (T*B, S, C) time-major channels-last -> (B, Hd) layernormed context."""
    TB, S, C = xs.shape
    Hd = p["wc"].shape[1]
    NL = p["wih"].shape[0]
    St = _pick_spatial_tile(S)
    # TODO(synk): for large B a leading "parallel" batch grid axis would let
    # v7x's second TensorCore help; at small B we keep batch fused into M.
    return pl.pallas_call(
        functools.partial(_lrnn_kernel, T=T, B=B, S_total=S),
        out_shape=jax.ShapeDtypeStruct((B, Hd), jnp.float32),
        grid=(S // St,),
        in_specs=[
            pl.BlockSpec((TB, St, C), lambda s: (0, s, 0)),
            pl.BlockSpec((C, Hd), lambda s: (0, 0)),
            pl.BlockSpec((1, Hd), lambda s: (0, 0)),
            pl.BlockSpec((NL, Hd, 4 * Hd), lambda s: (0, 0, 0)),
            pl.BlockSpec((NL, Hd, 4 * Hd), lambda s: (0, 0, 0)),
            pl.BlockSpec((NL, 1, 4 * Hd), lambda s: (0, 0, 0)),
            pl.BlockSpec((1, Hd), lambda s: (0, 0)),
            pl.BlockSpec((1, Hd), lambda s: (0, 0)),
        ],
        out_specs=pl.BlockSpec((B, Hd), lambda s: (0, 0)),
        scratch_shapes=[pltpu.VMEM((TB, Hd), jnp.float32)],
        compiler_params=pltpu.CompilerParams(
            dimension_semantics=("arbitrary",),
            vmem_limit_bytes=VMEM_LIMIT),
    )(xs, p["wc"], p["bc"], p["wih"], p["whh"], p["lb"],
      p["lrnn_ln_g"], p["lrnn_ln_b"])


# ----------------------------------------------------------------------------
# Kernel 2: Attention + FFN block (batch folded into the matmul M dimension).
# ----------------------------------------------------------------------------
def _att_ffn_kernel(cnt_ref, q_ref, ctx_ref, wq_ref, bq_ref, wkv_ref, bkv_ref,
                    wo_ref, bo_ref, ag_ref, ab_ref, w1_ref, b1_ref, w2_ref,
                    b2_ref, fg_ref, fb_ref, o_ref, *, num_heads, scale):
    Bt, R, Qd = q_ref.shape
    Tm, Hd = ctx_ref.shape[1], ctx_ref.shape[2]
    D = wq_ref.shape[1]
    dh = D // num_heads

    # single query projection: residual AND per-head Q (no duplicate Wq matmul)
    q2 = q_ref[...].reshape(Bt * R, Qd).astype(jnp.bfloat16)
    qp = jnp.dot(q2, wq_ref[...], preferred_element_type=jnp.float32) + bq_ref[...]

    # fused K,V projection: one (Bt*Tm, Hd) @ (Hd, 2D) matmul
    c2 = ctx_ref[...].reshape(Bt * Tm, Hd).astype(jnp.bfloat16)
    kv = jnp.dot(c2, wkv_ref[...], preferred_element_type=jnp.float32) + bkv_ref[...]

    qp3 = qp.reshape(Bt, R, D)
    kv3 = kv.reshape(Bt, Tm, 2 * D)
    k3 = kv3[:, :, :D]
    v3 = kv3[:, :, D:]

    valid = cnt_ref[0]
    heads = []
    for h in range(num_heads):
        qh = qp3[:, :, h * dh:(h + 1) * dh].astype(jnp.bfloat16)
        kh = k3[:, :, h * dh:(h + 1) * dh].astype(jnp.bfloat16)
        vh = v3[:, :, h * dh:(h + 1) * dh].astype(jnp.bfloat16)
        s = jax.lax.dot_general(qh, kh, (((2,), (2,)), ((0,), (0,))),
                                preferred_element_type=jnp.float32) * scale  # (Bt,R,Tm)
        t_idx = jax.lax.broadcasted_iota(jnp.int32, s.shape, 2)
        s = jnp.where(t_idx < valid, s, -1e30)
        s = s - jnp.max(s, axis=-1, keepdims=True)
        p = jnp.exp(s)
        p = p * pl.reciprocal(jnp.sum(p, axis=-1, keepdims=True), approx=True)
        oh = jax.lax.dot_general(p.astype(jnp.bfloat16), vh,
                                 (((2,), (1,)), ((0,), (0,))),
                                 preferred_element_type=jnp.float32)          # (Bt,R,dh)
        heads.append(oh)

    att = jnp.concatenate(heads, axis=-1).reshape(Bt * R, D)
    att = jnp.dot(att.astype(jnp.bfloat16), wo_ref[...],
                  preferred_element_type=jnp.float32) + bo_ref[...]

    x = _ln(att + qp, ag_ref[...], ab_ref[...])

    hmid = jnp.maximum(
        jnp.dot(x.astype(jnp.bfloat16), w1_ref[...],
                preferred_element_type=jnp.float32) + b1_ref[...], 0.0)
    y = jnp.dot(hmid.astype(jnp.bfloat16), w2_ref[...],
                preferred_element_type=jnp.float32) + b2_ref[...]
    o_ref[...] = _ln(y + x, fg_ref[...], fb_ref[...])


def _pick_bt(B, R):
    """Batch-block size: fill the matmul M dim toward ~128 rows, keep blocks legal."""
    bt = min(B, max(1, 128 // max(R, 1)))
    while bt > 1 and (B % bt != 0 or (bt != B and (bt * R) % 8 != 0)):
        bt -= 1
    return bt


def att_ffn_block(lp, query, ctx_buf, ctx_len, num_heads):
    """query: (B, R, Qd), ctx_buf: (B, MAXT, Hd), ctx_len: valid context length."""
    B, R, Qd = query.shape
    MAXT, Hd = ctx_buf.shape[1], ctx_buf.shape[2]
    D = lp["wq"].shape[1]
    F = lp["ff_w1"].shape[1]
    dh = D // num_heads
    Bt = _pick_bt(B, R)
    nb = B // Bt

    cnt = jnp.asarray(ctx_len, jnp.int32).reshape((1,))

    grid_spec = pltpu.PrefetchScalarGridSpec(
        num_scalar_prefetch=1,
        grid=(nb,),
        in_specs=[
            pl.BlockSpec((Bt, R, Qd), lambda b, c: (b, 0, 0)),     # query block
            pl.BlockSpec((Bt, MAXT, Hd), lambda b, c: (b, 0, 0)),  # context block
            pl.BlockSpec((Qd, D), lambda b, c: (0, 0)),            # wq
            pl.BlockSpec((1, D), lambda b, c: (0, 0)),             # bq
            pl.BlockSpec((Hd, 2 * D), lambda b, c: (0, 0)),        # wkv (K|V fused)
            pl.BlockSpec((1, 2 * D), lambda b, c: (0, 0)),         # bkv
            pl.BlockSpec((D, D), lambda b, c: (0, 0)),             # wo
            pl.BlockSpec((1, D), lambda b, c: (0, 0)),             # bo
            pl.BlockSpec((1, D), lambda b, c: (0, 0)),             # att ln g
            pl.BlockSpec((1, D), lambda b, c: (0, 0)),             # att ln b
            pl.BlockSpec((D, F), lambda b, c: (0, 0)),             # ff w1
            pl.BlockSpec((1, F), lambda b, c: (0, 0)),             # ff b1
            pl.BlockSpec((F, D), lambda b, c: (0, 0)),             # ff w2
            pl.BlockSpec((1, D), lambda b, c: (0, 0)),             # ff b2
            pl.BlockSpec((1, D), lambda b, c: (0, 0)),             # ff ln g
            pl.BlockSpec((1, D), lambda b, c: (0, 0)),             # ff ln b
        ],
        out_specs=pl.BlockSpec((Bt * R, D), lambda b, c: (b, 0)),
    )
    out = pl.pallas_call(
        functools.partial(_att_ffn_kernel, num_heads=num_heads,
                          scale=1.0 / float(dh) ** 0.5),
        out_shape=jax.ShapeDtypeStruct((B * R, D), jnp.float32),
        grid_spec=grid_spec,
        compiler_params=pltpu.CompilerParams(
            dimension_semantics=("parallel",),
            vmem_limit_bytes=VMEM_LIMIT),
    )(cnt, query, ctx_buf,
      lp["wq"], lp["bq"], lp["wkv"], lp["bkv"], lp["wo"], lp["bo"],
      lp["att_ln_g"], lp["att_ln_b"],
      lp["ff_w1"], lp["ff_b1"], lp["ff_w2"], lp["ff_b2"],
      lp["ff_ln_g"], lp["ff_ln_b"])
    return out.reshape(B, R, D)


# ----------------------------------------------------------------------------
# Jitted per-layer step: LocalRNN kernel + hr_buf update + attention/FFN kernel.
# hr_len is a traced scalar -> no retrace per frame.
# ----------------------------------------------------------------------------
@functools.partial(jax.jit, static_argnames=("T", "num_heads"))
def _layer_step(lp, xs, query, hr_buf, hr_len, *, T, num_heads):
    TB = xs.shape[0]
    B = TB // T
    context = lrnn_block(lp, xs, T, B)                               # (B, Hd)
    hr_buf = jax.lax.dynamic_update_slice(hr_buf, context[:, None, :],
                                          (0, hr_len, 0))
    enc_out = att_ffn_block(lp, query, hr_buf, hr_len + 1, num_heads)
    return enc_out, hr_buf


# ----------------------------------------------------------------------------
# MedPoseEncoder forward (mirrors the PyTorch control flow & state)
# ----------------------------------------------------------------------------
def medpose_encoder_forward(params, state, feature_maps, cf_region_features,
                            initial_frame, *, num_enc_layers, lrnn_window_size,
                            num_att_heads, max_hist=MAX_HIST):
    B = feature_maps.shape[0]
    if initial_frame or state is None:
        state = {
            "hist": {l: [] for l in range(num_enc_layers)},
            "hr_buf": {l: jnp.zeros((B, max_hist, params[l]["wih"].shape[1]),
                                    jnp.float32) for l in range(num_enc_layers)},
            "hr_len": {l: 0 for l in range(num_enc_layers)},
        }
    hist = state["hist"]

    enc_in = feature_maps[:, -lrnn_window_size:]
    _, T0, C0, Hh, Ww = enc_in.shape
    enc_out = None
    for layer in range(num_enc_layers):
        lp = params[layer]
        if layer == 0:
            # (B,T,C,H,W) -> time-major channels-last (T*B, H*W, C)
            xs = jnp.transpose(enc_in, (1, 0, 3, 4, 2)).reshape(T0 * B, Hh * Ww, C0)
            T = T0
        else:
            stacked = jnp.stack(hist[layer], axis=1)              # (B, T', R, D)
            T = stacked.shape[1]
            # permute(0,1,3,2) for the 1d conv; channels-last == stacked itself
            xs = jnp.transpose(stacked, (1, 0, 2, 3)).reshape(
                T * B, stacked.shape[2], stacked.shape[3])

        pos = state["hr_len"][layer]
        # TODO(synk): reference hidden_rnn_hist grows unboundedly; here it is a
        # fixed-capacity masked buffer (exact match while frames <= MAX_HIST).
        assert pos < max_hist, "hidden_rnn_hist capacity exceeded"
        enc_out, state["hr_buf"][layer] = _layer_step(
            lp, xs, cf_region_features, state["hr_buf"][layer], pos,
            T=T, num_heads=num_att_heads)
        state["hr_len"][layer] = pos + 1

        if layer < num_enc_layers - 1:
            if len(hist[layer + 1]) == lrnn_window_size:
                hist[layer + 1] = hist[layer + 1][1:]
            hist[layer + 1].append(enc_out)
    return enc_out, state


# ----------------------------------------------------------------------------
# Deterministic parameter init (kernel-ready layouts produced once; weights
# are stored bf16, biases / LN params f32).
# ----------------------------------------------------------------------------
def init_params(key, *, num_enc_layers, num_lrnn_layers, model_dim,
                lrnn_hidden_dim, ff_hidden_dim, roi_map_dim):
    query_dim = roi_map_dim ** 2 * model_dim
    Hd, D, F = lrnn_hidden_dim, model_dim, ff_hidden_dim

    n_keys = num_enc_layers * (3 * num_lrnn_layers + 12) + 4
    keys = iter(jax.random.split(key, n_keys))

    def dense(shape, dtype=jnp.bfloat16):
        return (jax.random.normal(next(keys), shape, jnp.float32) * 0.02).astype(dtype)

    params = []
    for _ in range(num_enc_layers):
        # NOTE: single bias == b_ih + b_hh of nn.LSTM; conv output dim assumed
        # equal to lrnn_hidden_dim (see header reconstruction note).
        wih = jnp.stack([dense((Hd, 4 * Hd)) for _ in range(num_lrnn_layers)])
        whh = jnp.stack([dense((Hd, 4 * Hd)) for _ in range(num_lrnn_layers)])
        lb = jnp.stack([dense((1, 4 * Hd), jnp.float32)
                        for _ in range(num_lrnn_layers)])
        params.append({
            "wc": dense((D, Hd)),
            "bc": dense((1, Hd), jnp.float32),
            "wih": wih, "whh": whh, "lb": lb,
            "lrnn_ln_g": jnp.ones((1, Hd), jnp.float32),
            "lrnn_ln_b": jnp.zeros((1, Hd), jnp.float32),
            "wq": dense((query_dim, D)), "bq": dense((1, D), jnp.float32),
            "wkv": dense((Hd, 2 * D)), "bkv": dense((1, 2 * D), jnp.float32),
            "wo": dense((D, D)), "bo": dense((1, D), jnp.float32),
            "att_ln_g": jnp.ones((1, D), jnp.float32),
            "att_ln_b": jnp.zeros((1, D), jnp.float32),
            "ff_w1": dense((D, F)), "ff_b1": dense((1, F), jnp.float32),
            "ff_w2": dense((F, D)), "ff_b2": dense((1, D), jnp.float32),
            "ff_ln_g": jnp.ones((1, D), jnp.float32),
            "ff_ln_b": jnp.zeros((1, D), jnp.float32),
        })
    return params


# ----------------------------------------------------------------------------
if __name__ == "__main__":
    # small config consistent with the module
    num_enc_layers = 2
    num_att_heads = 4
    num_lrnn_layers = 2
    model_dim = 32
    lrnn_hidden_dim = 32
    ff_hidden_dim = 64
    roi_map_dim = 2
    lrnn_window_size = 3

    B, F, H, W = 2, 4, 8, 8
    R = 4  # number of region proposals
    query_dim = roi_map_dim ** 2 * model_dim

    key = jax.random.PRNGKey(0)
    k_p, k_fm, k_rf = jax.random.split(key, 3)

    params = init_params(
        k_p, num_enc_layers=num_enc_layers, num_lrnn_layers=num_lrnn_layers,
        model_dim=model_dim, lrnn_hidden_dim=lrnn_hidden_dim,
        ff_hidden_dim=ff_hidden_dim, roi_map_dim=roi_map_dim)

    feature_maps = jax.random.normal(k_fm, (B, F, model_dim, H, W), jnp.float32)
    cf_region_features = jax.random.normal(k_rf, (B, R, query_dim), jnp.float32)

    # initial frame
    enc_out, state = medpose_encoder_forward(
        params, None, feature_maps, cf_region_features, initial_frame=True,
        num_enc_layers=num_enc_layers, lrnn_window_size=lrnn_window_size,
        num_att_heads=num_att_heads)
    # subsequent frame (exercises history buffers / masked attention context)
    enc_out, state = medpose_encoder_forward(
        params, state, feature_maps, cf_region_features, initial_frame=False,
        num_enc_layers=num_enc_layers, lrnn_window_size=lrnn_window_size,
        num_att_heads=num_att_heads)

    enc_out = jax.block_until_ready(enc_out)
    assert enc_out.shape == (B, R, model_dim)
    assert bool(jnp.all(jnp.isfinite(enc_out)))
    # TODO(synk): MedPoseConvLSTM / MedPoseAttention sources were not provided;
    # their internals are reconstructed from call-site semantics (see header).
    print("KERNEL_OK")
</pallas_src>

<mosaic_0001>
module attributes {stable_mosaic.version = 11 : i64} {
  func.func @_lrnn_kernel(%arg0: i32, %arg1: memref<6x32x32xf32, #tpu.memory_space<vmem>>, %arg2: memref<32x32xbf16, #tpu.memory_space<vmem>>, %arg3: memref<1x32xf32, #tpu.memory_space<vmem>>, %arg4: memref<2x32x128xbf16, #tpu.memory_space<vmem>>, %arg5: memref<2x32x128xbf16, #tpu.memory_space<vmem>>, %arg6: memref<2x1x128xf32, #tpu.memory_space<vmem>>, %arg7: memref<1x32xf32, #tpu.memory_space<vmem>>, %arg8: memref<1x32xf32, #tpu.memory_space<vmem>>, %arg9: memref<2x32xf32, #tpu.memory_space<vmem>>, %arg10: memref<6x32xf32, #tpu.memory_space<vmem>>) attributes {dimension_semantics = [#tpu.dimension_semantics<arbitrary>], iteration_bounds = array<i64: 2>, scalar_prefetch = 0 : i64, scratch_operands = 1 : i64, tpu.core_type = #tpu.core_type<tc>, window_params = [{transform_indices = @transform_0, window_bounds = array<i64: 6, 32, 32>}, {pipeline_mode = #tpu.pipeline_mode<synchronous>, transform_indices = @transform_1, window_bounds = array<i64: 32, 32>}, {pipeline_mode = #tpu.pipeline_mode<synchronous>, transform_indices = @transform_2, window_bounds = array<i64: 1, 32>}, {pipeline_mode = #tpu.pipeline_mode<synchronous>, transform_indices = @transform_3, window_bounds = array<i64: 2, 32, 128>}, {pipeline_mode = #tpu.pipeline_mode<synchronous>, transform_indices = @transform_4, window_bounds = array<i64: 2, 32, 128>}, {pipeline_mode = #tpu.pipeline_mode<synchronous>, transform_indices = @transform_5, window_bounds = array<i64: 2, 1, 128>}, {pipeline_mode = #tpu.pipeline_mode<synchronous>, transform_indices = @transform_6, window_bounds = array<i64: 1, 32>}, {pipeline_mode = #tpu.pipeline_mode<synchronous>, transform_indices = @transform_7, window_bounds = array<i64: 1, 32>}, {pipeline_mode = #tpu.pipeline_mode<synchronous>, transform_indices = @transform_8, window_bounds = array<i64: 2, 32>}]} {
    %c0_i32 = arith.constant 0 : i32
    %0 = arith.cmpi eq, %arg0, %c0_i32 : i32
    %1 = arith.extui %0 : i1 to i32
    %c0_i32_0 = arith.constant 0 : i32
    %2 = arith.cmpi ne, %1, %c0_i32_0 : i32
    scf.if %2 {
      %cst_14 = arith.constant 0.000000e+00 : f32
      %20 = vector.broadcast %cst_14 : f32 to vector<6x32xf32>
      %c0_15 = arith.constant 0 : index
      %c0_16 = arith.constant 0 : index
      %21 = vector.load %arg10[%c0_15, %c0_16] : memref<6x32xf32, #tpu.memory_space<vmem>>, vector<6x32xf32>
      tpu.vector_store %arg10[%c0_15, %c0_16], %20 {strides = array<i32>} : memref<6x32xf32, #tpu.memory_space<vmem>>, vector<6x32xf32>,
    } else {
    }
    %c0 = arith.constant 0 : index
    %c0_1 = arith.constant 0 : index
    %c0_2 = arith.constant 0 : index
    %3 = vector.load %arg1[%c0, %c0_1, %c0_2] : memref<6x32x32xf32, #tpu.memory_space<vmem>>, vector<6x32x32xf32>
    %4 = arith.truncf %3 : vector<6x32x32xf32> to vector<6x32x32xbf16>
    %c0_3 = arith.constant 0 : index
    %c0_4 = arith.constant 0 : index
    %5 = vector.load %arg2[%c0_3, %c0_4] : memref<32x32xbf16, #tpu.memory_space<vmem>>, vector<32x32xbf16>
    %cst = arith.constant dense<0.000000e+00> : vector<6x32x32xf32>
    %6 = tpu.matmul %4, %5, %cst {dimension_numbers = #tpu.dot_dimension_numbers<[2], [0], [0, 1], [1], [0, 0, 0, 1, 1, 1], [], []>} : vector<6x32x32xbf16>, vector<32x32xbf16>, vector<6x32x32xf32> -> vector<6x32x32xf32>
    %c0_5 = arith.constant 0 : index
    %c0_6 = arith.constant 0 : index
    %7 = vector.load %arg3[%c0_5, %c0_6] : memref<1x32xf32, #tpu.memory_space<vmem>>, vector<1x32xf32>
    %8 = vector.shape_cast %7 : vector<1x32xf32> to vector<1x1x32xf32>
    %9 = vector.broadcast %8 : vector<1x1x32xf32> to vector<6x32x32xf32>
    %10 = arith.addf %6, %9 : vector<6x32x32xf32>
    %cst_7 = arith.constant 0.000000e+00 : f32
    %11 = vector.broadcast %cst_7 : f32 to vector<6x32x32xf32>
    %12 = arith.maximumf %10, %11 : vector<6x32x32xf32>
    %c0_8 = arith.constant 0 : index
    %c0_9 = arith.constant 0 : index
    %13 = vector.load %arg10[%c0_8, %c0_9] : memref<6x32xf32, #tpu.memory_space<vmem>>, vector<6x32xf32>
    %cst_10 = arith.constant dense<0.000000e+00> : vector<6x32xf32>
    %14 = vector.multi_reduction <add>, %12, %cst_10 [1] : vector<6x32x32xf32> to vector<6x32xf32>
    %15 = arith.addf %13, %14 : vector<6x32xf32>
    %c0_11 = arith.constant 0 : index
    %c0_12 = arith.constant 0 : index
    %16 = vector.load %arg10[%c0_11, %c0_12] : memref<6x32xf32, #tpu.memory_space<vmem>>, vector<6x32xf32>
    tpu.vector_store %arg10[%c0_11, %c0_12], %15 {strides = array<i32>} : memref<6x32xf32, #tpu.memory_space<vmem>>, vector<6x32xf32>,
    %c1_i32 = arith.constant 1 : i32
    %17 = arith.cmpi eq, %arg0, %c1_i32 : i32
    %18 = arith.extui %17 : i1 to i32
    %c0_i32_13 = arith.constant 0 : i32
    %19 = arith.cmpi ne, %18, %c0_i32_13 : i32
    scf.if %19 {
      %c0_14 = arith.constant 0 : index
      %c0_15 = arith.constant 0 : index
      %20 = vector.load %arg10[%c0_14, %c0_15] : memref<6x32xf32, #tpu.memory_space<vmem>>, vector<6x32xf32>
      %cst_16 = arith.constant 1.562500e-02 : f32
      %21 = vector.broadcast %cst_16 : f32 to vector<6x32xf32>
      %22 = arith.mulf %20, %21 : vector<6x32xf32>
      %c0_17 = arith.constant 0 : index
      %c0_18 = arith.constant 0 : index
      %c0_19 = arith.constant 0 : index
      %23 = vector.load %arg4[%c0_17, %c0_18, %c0_19] : memref<2x32x128xbf16, #tpu.memory_space<vmem>>, vector<1x32x128xbf16>
      %24 = vector.shape_cast %23 : vector<1x32x128xbf16> to vector<32x128xbf16>
      %c0_20 = arith.constant 0 : index
      %c0_21 = arith.constant 0 : index
      %c0_22 = arith.constant 0 : index
      %25 = vector.load %arg5[%c0_20, %c0_21, %c0_22] : memref<2x32x128xbf16, #tpu.memory_space<vmem>>, vector<1x32x128xbf16>
      %26 = vector.shape_cast %25 : vector<1x32x128xbf16> to vector<32x128xbf16>
      %c0_23 = arith.constant 0 : index
      %c0_24 = arith.constant 0 : index
      %c0_25 = arith.constant 0 : index
      %27 = vector.load %arg6[%c0_23, %c0_24, %c0_25] : memref<2x1x128xf32, #tpu.memory_space<vmem>>, vector<1x1x128xf32>
      %28 = vector.shape_cast %27 : vector<1x1x128xf32> to vector<1x128xf32>
      %29 = arith.truncf %22 : vector<6x32xf32> to vector<6x32xbf16>
      %cst_26 = arith.constant dense<0.000000e+00> : vector<6x128xf32>
      %30 = tpu.matmul %29, %24, %cst_26 {dimension_numbers = #tpu.dot_dimension_numbers<[1], [0], [0], [1], [0, 0, 1, 1], [], []>} : vector<6x32xbf16>, vector<32x128xbf16>, vector<6x128xf32> -> vector<6x128xf32>
      %31 = vector.broadcast %28 : vector<1x128xf32> to vector<6x128xf32>
      %32 = arith.addf %30, %31 : vector<6x128xf32>
      %cst_27 = arith.constant 0.000000e+00 : f32
      %33 = vector.broadcast %cst_27 : f32 to vector<2x32xf32>
      %cst_28 = arith.constant 0.000000e+00 : f32
      %34 = vector.broadcast %cst_28 : f32 to vector<2x32xf32>
      %35 = vector.extract_strided_slice %32 {offsets = [0, 0], sizes = [2, 128], strides = [1, 1]} : vector<6x128xf32> to vector<2x128xf32>
      %36 = arith.truncf %33 : vector<2x32xf32> to vector<2x32xbf16>
      %cst_29 = arith.constant dense<0.000000e+00> : vector<2x128xf32>
      %37 = tpu.matmul %36, %26, %cst_29 {dimension_numbers = #tpu.dot_dimension_numbers<[1], [0], [0], [1], [0, 0, 1, 1], [], []>} : vector<2x32xbf16>, vector<32x128xbf16>, vector<2x128xf32> -> vector<2x128xf32>
      %38 = arith.addf %35, %37 : vector<2x128xf32>
      %39 = vector.extract_strided_slice %38 {offsets = [0, 0], sizes = [2, 32], strides = [1, 1]} : vector<2x128xf32> to vector<2x32xf32>
      %40 = arith.negf %39 : vector<2x32xf32>
      %41 = math.exp %40 : vector<2x32xf32>
      %cst_30 = arith.constant 1.000000e+00 : f32
      %42 = vector.broadcast %cst_30 : f32 to vector<2x32xf32>
      %43 = arith.addf %42, %41 : vector<2x32xf32>
      %44 = arith.divf %42, %43 : vector<2x32xf32>
      %45 = vector.extract_strided_slice %38 {offsets = [0, 32], sizes = [2, 32], strides = [1, 1]} : vector<2x128xf32> to vector<2x32xf32>
      %46 = arith.negf %45 : vector<2x32xf32>
      %47 = math.exp %46 : vector<2x32xf32>
      %cst_31 = arith.constant 1.000000e+00 : f32
      %48 = vector.broadcast %cst_31 : f32 to vector<2x32xf32>
      %49 = arith.addf %48, %47 : vector<2x32xf32>
      %50 = arith.divf %48, %49 : vector<2x32xf32>
      %51 = vector.extract_strided_slice %38 {offsets = [0, 64], sizes = [2, 32], strides = [1, 1]} : vector<2x128xf32> to vector<2x32xf32>
      %52 = math.tanh %51 : vector<2x32xf32>
      %53 = vector.extract_strided_slice %38 {offsets = [0, 96], sizes = [2, 32], strides = [1, 1]} : vector<2x128xf32> to vector<2x32xf32>
      %54 = arith.negf %53 : vector<2x32xf32>
      %55 = math.exp %54 : vector<2x32xf32>
      %cst_32 = arith.constant 1.000000e+00 : f32
      %56 = vector.broadcast %cst_32 : f32 to vector<2x32xf32>
      %57 = arith.addf %56, %55 : vector<2x32xf32>
      %58 = arith.divf %56, %57 : vector<2x32xf32>
      %59 = arith.mulf %50, %34 : vector<2x32xf32>
      %60 = arith.mulf %44, %52 : vector<2x32xf32>
      %61 = arith.addf %59, %60 : vector<2x32xf32>
      %62 = math.tanh %61 : vector<2x32xf32>
      %63 = arith.mulf %58, %62 : vector<2x32xf32>
      %64 = vector.extract_strided_slice %32 {offsets = [2, 0], sizes = [2, 128], strides = [1, 1]} : vector<6x128xf32> to vector<2x128xf32>
      %65 = arith.truncf %63 : vector<2x32xf32> to vector<2x32xbf16>
      %cst_33 = arith.constant dense<0.000000e+00> : vector<2x128xf32>
      %66 = tpu.matmul %65, %26, %cst_33 {dimension_numbers = #tpu.dot_dimension_numbers<[1], [0], [0], [1], [0, 0, 1, 1], [], []>} : vector<2x32xbf16>, vector<32x128xbf16>, vector<2x128xf32> -> vector<2x128xf32>
      %67 = arith.addf %64, %66 : vector<2x128xf32>
      %68 = vector.extract_strided_slice %67 {offsets = [0, 0], sizes = [2, 32], strides = [1, 1]} : vector<2x128xf32> to vector<2x32xf32>
      %69 = arith.negf %68 : vector<2x32xf32>
      %70 = math.exp %69 : vector<2x32xf32>
      %cst_34 = arith.constant 1.000000e+00 : f32
      %71 = vector.broadcast %cst_34 : f32 to vector<2x32xf32>
      %72 = arith.addf %71, %70 : vector<2x32xf32>
      %73 = arith.divf %71, %72 : vector<2x32xf32>
      %74 = vector.extract_strided_slice %67 {offsets = [0, 32], sizes = [2, 32], strides = [1, 1]} : vector<2x128xf32> to vector<2x32xf32>
      %75 = arith.negf %74 : vector<2x32xf32>
      %76 = math.exp %75 : vector<2x32xf32>
      %cst_35 = arith.constant 1.000000e+00 : f32
      %77 = vector.broadcast %cst_35 : f32 to vector<2x32xf32>
      %78 = arith.addf %77, %76 : vector<2x32xf32>
      %79 = arith.divf %77, %78 : vector<2x32xf32>
      %80 = vector.extract_strided_slice %67 {offsets = [0, 64], sizes = [2, 32], strides = [1, 1]} : vector<2x128xf32> to vector<2x32xf32>
      %81 = math.tanh %80 : vector<2x32xf32>
      %82 = vector.extract_strided_slice %67 {offsets = [0, 96], sizes = [2, 32], strides = [1, 1]} : vector<2x128xf32> to vector<2x32xf32>
      %83 = arith.negf %82 : vector<2x32xf32>
      %84 = math.exp %83 : vector<2x32xf32>
      %cst_36 = arith.constant 1.000000e+00 : f32
      %85 = vector.broadcast %cst_36 : f32 to vector<2x32xf32>
      %86 = arith.addf %85, %84 : vector<2x32xf32>
      %87 = arith.divf %85, %86 : vector<2x32xf32>
      %88 = arith.mulf %79, %61 : vector<2x32xf32>
      %89 = arith.mulf %73, %81 : vector<2x32xf32>
      %90 = arith.addf %88, %89 : vector<2x32xf32>
      %91 = math.tanh %90 : vector<2x32xf32>
      %92 = arith.mulf %87, %91 : vector<2x32xf32>
      %93 = vector.extract_strided_slice %32 {offsets = [4, 0], sizes = [2, 128], strides = [1, 1]} : vector<6x128xf32> to vector<2x128xf32>
      %94 = arith.truncf %92 : vector<2x32xf32> to vector<2x32xbf16>
      %cst_37 = arith.constant dense<0.000000e+00> : vector<2x128xf32>
      %95 = tpu.matmul %94, %26, %cst_37 {dimension_numbers = #tpu.dot_dimension_numbers<[1], [0], [0], [1], [0, 0, 1, 1], [], []>} : vector<2x32xbf16>, vector<32x128xbf16>, vector<2x128xf32> -> vector<2x128xf32>
      %96 = arith.addf %93, %95 : vector<2x128xf32>
      %97 = vector.extract_strided_slice %96 {offsets = [0, 0], sizes = [2, 32], strides = [1, 1]} : vector<2x128xf32> to vector<2x32xf32>
      %98 = arith.negf %97 : vector<2x32xf32>
      %99 = math.exp %98 : vector<2x32xf32>
      %cst_38 = arith.constant 1.000000e+00 : f32
      %100 = vector.broadcast %cst_38 : f32 to vector<2x32xf32>
      %101 = arith.addf %100, %99 : vector<2x32xf32>
      %102 = arith.divf %100, %101 : vector<2x32xf32>
      %103 = vector.extract_strided_slice %96 {offsets = [0, 32], sizes = [2, 32], strides = [1, 1]} : vector<2x128xf32> to vector<2x32xf32>
      %104 = arith.negf %103 : vector<2x32xf32>
      %105 = math.exp %104 : vector<2x32xf32>
      %cst_39 = arith.constant 1.000000e+00 : f32
      %106 = vector.broadcast %cst_39 : f32 to vector<2x32xf32>
      %107 = arith.addf %106, %105 : vector<2x32xf32>
      %108 = arith.divf %106, %107 : vector<2x32xf32>
      %109 = vector.extract_strided_slice %96 {offsets = [0, 64], sizes = [2, 32], strides = [1, 1]} : vector<2x128xf32> to vector<2x32xf32>
      %110 = math.tanh %109 : vector<2x32xf32>
      %111 = vector.extract_strided_slice %96 {offsets = [0, 96], sizes = [2, 32], strides = [1, 1]} : vector<2x128xf32> to vector<2x32xf32>
      %112 = arith.negf %111 : vector<2x32xf32>
      %113 = math.exp %112 : vector<2x32xf32>
      %cst_40 = arith.constant 1.000000e+00 : f32
      %114 = vector.broadcast %cst_40 : f32 to vector<2x32xf32>
      %115 = arith.addf %114, %113 : vector<2x32xf32>
      %116 = arith.divf %114, %115 : vector<2x32xf32>
      %117 = arith.mulf %108, %90 : vector<2x32xf32>
      %118 = arith.mulf %102, %110 : vector<2x32xf32>
      %119 = arith.addf %117, %118 : vector<2x32xf32>
      %120 = math.tanh %119 : vector<2x32xf32>
      %121 = arith.mulf %116, %120 : vector<2x32xf32>
      %122 = tpu.concatenate %63, %92, %121 in 0 : vector<2x32xf32>, vector<2x32xf32>, vector<2x32xf32> -> vector<6x32xf32>
      %c1 = arith.constant 1 : index
      %c0_41 = arith.constant 0 : index
      %c0_42 = arith.constant 0 : index
      %123 = vector.load %arg4[%c1, %c0_41, %c0_42] : memref<2x32x128xbf16, #tpu.memory_space<vmem>>, vector<1x32x128xbf16>
      %124 = vector.shape_cast %123 : vector<1x32x128xbf16> to vector<32x128xbf16>
      %c1_43 = arith.constant 1 : index
      %c0_44 = arith.constant 0 : index
      %c0_45 = arith.constant 0 : index
      %125 = vector.load %arg5[%c1_43, %c0_44, %c0_45] : memref<2x32x128xbf16, #tpu.memory_space<vmem>>, vector<1x32x128xbf16>
      %126 = vector.shape_cast %125 : vector<1x32x128xbf16> to vector<32x128xbf16>
      %c1_46 = arith.constant 1 : index
      %c0_47 = arith.constant 0 : index
      %c0_48 = arith.constant 0 : index
      %127 = vector.load %arg6[%c1_46, %c0_47, %c0_48] : memref<2x1x128xf32, #tpu.memory_space<vmem>>, vector<1x1x128xf32>
      %128 = vector.shape_cast %127 : vector<1x1x128xf32> to vector<1x128xf32>
      %129 = arith.truncf %122 : vector<6x32xf32> to vector<6x32xbf16>
      %cst_49 = arith.constant dense<0.000000e+00> : vector<6x128xf32>
      %130 = tpu.matmul %129, %124, %cst_49 {dimension_numbers = #tpu.dot_dimension_numbers<[1], [0], [0], [1], [0, 0, 1, 1], [], []>} : vector<6x32xbf16>, vector<32x128xbf16>, vector<6x128xf32> -> vector<6x128xf32>
      %131 = vector.broadcast %128 : vector<1x128xf32> to vector<6x128xf32>
      %132 = arith.addf %130, %131 : vector<6x128xf32>
      %cst_50 = arith.constant 0.000000e+00 : f32
      %133 = vector.broadcast %cst_50 : f32 to vector<2x32xf32>
      %cst_51 = arith.constant 0.000000e+00 : f32
      %134 = vector.broadcast %cst_51 : f32 to vector<2x32xf32>
      %135 = vector.extract_strided_slice %132 {offsets = [0, 0], sizes = [2, 128], strides = [1, 1]} : vector<6x128xf32> to vector<2x128xf32>
      %136 = arith.truncf %133 : vector<2x32xf32> to vector<2x32xbf16>
      %cst_52 = arith.constant dense<0.000000e+00> : vector<2x128xf32>
      %137 = tpu.matmul %136, %126, %cst_52 {dimension_numbers = #tpu.dot_dimension_numbers<[1], [0], [0], [1], [0, 0, 1, 1], [], []>} : vector<2x32xbf16>, vector<32x128xbf16>, vector<2x128xf32> -> vector<2x128xf32>
      %138 = arith.addf %135, %137 : vector<2x128xf32>
      %139 = vector.extract_strided_slice %138 {offsets = [0, 0], sizes = [2, 32], strides = [1, 1]} : vector<2x128xf32> to vector<2x32xf32>
      %140 = arith.negf %139 : vector<2x32xf32>
      %141 = math.exp %140 : vector<2x32xf32>
      %cst_53 = arith.constant 1.000000e+00 : f32
      %142 = vector.broadcast %cst_53 : f32 to vector<2x32xf32>
      %143 = arith.addf %142, %141 : vector<2x32xf32>
      %144 = arith.divf %142, %143 : vector<2x32xf32>
      %145 = vector.extract_strided_slice %138 {offsets = [0, 32], sizes = [2, 32], strides = [1, 1]} : vector<2x128xf32> to vector<2x32xf32>
      %146 = arith.negf %145 : vector<2x32xf32>
      %147 = math.exp %146 : vector<2x32xf32>
      %cst_54 = arith.constant 1.000000e+00 : f32
      %148 = vector.broadcast %cst_54 : f32 to vector<2x32xf32>
      %149 = arith.addf %148, %147 : vector<2x32xf32>
      %150 = arith.divf %148, %149 : vector<2x32xf32>
      %151 = vector.extract_strided_slice %138 {offsets = [0, 64], sizes = [2, 32], strides = [1, 1]} : vector<2x128xf32> to vector<2x32xf32>
      %152 = math.tanh %151 : vector<2x32xf32>
      %153 = vector.extract_strided_slice %138 {offsets = [0, 96], sizes = [2, 32], strides = [1, 1]} : vector<2x128xf32> to vector<2x32xf32>
      %154 = arith.negf %153 : vector<2x32xf32>
      %155 = math.exp %154 : vector<2x32xf32>
      %cst_55 = arith.constant 1.000000e+00 : f32
      %156 = vector.broadcast %cst_55 : f32 to vector<2x32xf32>
      %157 = arith.addf %156, %155 : vector<2x32xf32>
      %158 = arith.divf %156, %157 : vector<2x32xf32>
      %159 = arith.mulf %150, %134 : vector<2x32xf32>
      %160 = arith.mulf %144, %152 : vector<2x32xf32>
      %161 = arith.addf %159, %160 : vector<2x32xf32>
      %162 = math.tanh %161 : vector<2x32xf32>
      %163 = arith.mulf %158, %162 : vector<2x32xf32>
      %164 = vector.extract_strided_slice %132 {offsets = [2, 0], sizes = [2, 128], strides = [1, 1]} : vector<6x128xf32> to vector<2x128xf32>
      %165 = arith.truncf %163 : vector<2x32xf32> to vector<2x32xbf16>
      %cst_56 = arith.constant dense<0.000000e+00> : vector<2x128xf32>
      %166 = tpu.matmul %165, %126, %cst_56 {dimension_numbers = #tpu.dot_dimension_numbers<[1], [0], [0], [1], [0, 0, 1, 1], [], []>} : vector<2x32xbf16>, vector<32x128xbf16>, vector<2x128xf32> -> vector<2x128xf32>
      %167 = arith.addf %164, %166 : vector<2x128xf32>
      %168 = vector.extract_strided_slice %167 {offsets = [0, 0], sizes = [2, 32], strides = [1, 1]} : vector<2x128xf32> to vector<2x32xf32>
      %169 = arith.negf %168 : vector<2x32xf32>
      %170 = math.exp %169 : vector<2x32xf32>
      %cst_57 = arith.constant 1.000000e+00 : f32
      %171 = vector.broadcast %cst_57 : f32 to vector<2x32xf32>
      %172 = arith.addf %171, %170 : vector<2x32xf32>
      %173 = arith.divf %171, %172 : vector<2x32xf32>
      %174 = vector.extract_strided_slice %167 {offsets = [0, 32], sizes = [2, 32], strides = [1, 1]} : vector<2x128xf32> to vector<2x32xf32>
      %175 = arith.negf %174 : vector<2x32xf32>
      %176 = math.exp %175 : vector<2x32xf32>
      %cst_58 = arith.constant 1.000000e+00 : f32
      %177 = vector.broadcast %cst_58 : f32 to vector<2x32xf32>
      %178 = arith.addf %177, %176 : vector<2x32xf32>
      %179 = arith.divf %177, %178 : vector<2x32xf32>
      %180 = vector.extract_strided_slice %167 {offsets = [0, 64], sizes = [2, 32], strides = [1, 1]} : vector<2x128xf32> to vector<2x32xf32>
      %181 = math.tanh %180 : vector<2x32xf32>
      %182 = vector.extract_strided_slice %167 {offsets = [0, 96], sizes = [2, 32], strides = [1, 1]} : vector<2x128xf32> to vector<2x32xf32>
      %183 = arith.negf %182 : vector<2x32xf32>
      %184 = math.exp %183 : vector<2x32xf32>
      %cst_59 = arith.constant 1.000000e+00 : f32
      %185 = vector.broadcast %cst_59 : f32 to vector<2x32xf32>
      %186 = arith.addf %185, %184 : vector<2x32xf32>
      %187 = arith.divf %185, %186 : vector<2x32xf32>
      %188 = arith.mulf %179, %161 : vector<2x32xf32>
      %189 = arith.mulf %173, %181 : vector<2x32xf32>
      %190 = arith.addf %188, %189 : vector<2x32xf32>
      %191 = math.tanh %190 : vector<2x32xf32>
      %192 = arith.mulf %187, %191 : vector<2x32xf32>
      %193 = vector.extract_strided_slice %132 {offsets = [4, 0], sizes = [2, 128], strides = [1, 1]} : vector<6x128xf32> to vector<2x128xf32>
      %194 = arith.truncf %192 : vector<2x32xf32> to vector<2x32xbf16>
      %cst_60 = arith.constant dense<0.000000e+00> : vector<2x128xf32>
      %195 = tpu.matmul %194, %126, %cst_60 {dimension_numbers = #tpu.dot_dimension_numbers<[1], [0], [0], [1], [0, 0, 1, 1], [], []>} : vector<2x32xbf16>, vector<32x128xbf16>, vector<2x128xf32> -> vector<2x128xf32>
      %196 = arith.addf %193, %195 : vector<2x128xf32>
      %197 = vector.extract_strided_slice %196 {offsets = [0, 0], sizes = [2, 32], strides = [1, 1]} : vector<2x128xf32> to vector<2x32xf32>
      %198 = arith.negf %197 : vector<2x32xf32>
      %199 = math.exp %198 : vector<2x32xf32>
      %cst_61 = arith.constant 1.000000e+00 : f32
      %200 = vector.broadcast %cst_61 : f32 to vector<2x32xf32>
      %201 = arith.addf %200, %199 : vector<2x32xf32>
      %202 = arith.divf %200, %201 : vector<2x32xf32>
      %203 = vector.extract_strided_slice %196 {offsets = [0, 32], sizes = [2, 32], strides = [1, 1]} : vector<2x128xf32> to vector<2x32xf32>
      %204 = arith.negf %203 : vector<2x32xf32>
      %205 = math.exp %204 : vector<2x32xf32>
      %cst_62 = arith.constant 1.000000e+00 : f32
      %206 = vector.broadcast %cst_62 : f32 to vector<2x32xf32>
      %207 = arith.addf %206, %205 : vector<2x32xf32>
      %208 = arith.divf %206, %207 : vector<2x32xf32>
      %209 = vector.extract_strided_slice %196 {offsets = [0, 64], sizes = [2, 32], strides = [1, 1]} : vector<2x128xf32> to vector<2x32xf32>
      %210 = math.tanh %209 : vector<2x32xf32>
      %211 = vector.extract_strided_slice %196 {offsets = [0, 96], sizes = [2, 32], strides = [1, 1]} : vector<2x128xf32> to vector<2x32xf32>
      %212 = arith.negf %211 : vector<2x32xf32>
      %213 = math.exp %212 : vector<2x32xf32>
      %cst_63 = arith.constant 1.000000e+00 : f32
      %214 = vector.broadcast %cst_63 : f32 to vector<2x32xf32>
      %215 = arith.addf %214, %213 : vector<2x32xf32>
      %216 = arith.divf %214, %215 : vector<2x32xf32>
      %217 = arith.mulf %208, %190 : vector<2x32xf32>
      %218 = arith.mulf %202, %210 : vector<2x32xf32>
      %219 = arith.addf %217, %218 : vector<2x32xf32>
      %220 = math.tanh %219 : vector<2x32xf32>
      %221 = arith.mulf %216, %220 : vector<2x32xf32>
      %222 = vector.extract_strided_slice %22 {offsets = [4, 0], sizes = [2, 32], strides = [1, 1]} : vector<6x32xf32> to vector<2x32xf32>
      %223 = arith.addf %221, %222 : vector<2x32xf32>
      %c0_64 = arith.constant 0 : index
      %c0_65 = arith.constant 0 : index
      %224 = vector.load %arg7[%c0_64, %c0_65] : memref<1x32xf32, #tpu.memory_space<vmem>>, vector<1x32xf32>
      %c0_66 = arith.constant 0 : index
      %c0_67 = arith.constant 0 : index
      %225 = vector.load %arg8[%c0_66, %c0_67] : memref<1x32xf32, #tpu.memory_space<vmem>>, vector<1x32xf32>
      %cst_68 = arith.constant dense<0.000000e+00> : vector<2xf32>
      %226 = vector.multi_reduction <add>, %223, %cst_68 [1] : vector<2x32xf32> to vector<2xf32>
      %227 = vector.shape_cast %226 : vector<2xf32> to vector<2x1xf32>
      %cst_69 = arith.constant 3.200000e+01 : f32
      %228 = vector.broadcast %cst_69 : f32 to vector<2x1xf32>
      %229 = arith.divf %227, %228 : vector<2x1xf32>
      %230 = vector.broadcast %229 : vector<2x1xf32> to vector<2x32xf32>
      %231 = arith.subf %223, %230 : vector<2x32xf32>
      %232 = arith.mulf %231, %231 : vector<2x32xf32>
      %cst_70 = arith.constant dense<0.000000e+00> : vector<2xf32>
      %233 = vector.multi_reduction <add>, %232, %cst_70 [1] : vector<2x32xf32> to vector<2xf32>
      %234 = vector.shape_cast %233 : vector<2xf32> to vector<2x1xf32>
      %cst_71 = arith.constant 3.200000e+01 : f32
      %235 = vector.broadcast %cst_71 : f32 to vector<2x1xf32>
      %236 = arith.divf %234, %235 : vector<2x1xf32>
      %237 = vector.broadcast %229 : vector<2x1xf32> to vector<2x32xf32>
      %238 = arith.subf %223, %237 : vector<2x32xf32>
      %cst_72 = arith.constant 9.99999974E-6 : f32
      %239 = vector.broadcast %cst_72 : f32 to vector<2x1xf32>
      %240 = arith.addf %236, %239 : vector<2x1xf32>
      %241 = math.rsqrt %240 : vector<2x1xf32>
      %242 = vector.broadcast %241 : vector<2x1xf32> to vector<2x32xf32>
      %243 = arith.mulf %238, %242 : vector<2x32xf32>
      %244 = vector.broadcast %224 : vector<1x32xf32> to vector<2x32xf32>
      %245 = arith.mulf %243, %244 : vector<2x32xf32>
      %246 = vector.broadcast %225 : vector<1x32xf32> to vector<2x32xf32>
      %247 = arith.addf %245, %246 : vector<2x32xf32>
      %c0_73 = arith.constant 0 : index
      %c0_74 = arith.constant 0 : index
      %248 = vector.load %arg9[%c0_73, %c0_74] : memref<2x32xf32, #tpu.memory_space<vmem>>, vector<2x32xf32>
      tpu.vector_store %arg9[%c0_73, %c0_74], %247 {strides = array<i32>} : memref<2x32xf32, #tpu.memory_space<vmem>>, vector<2x32xf32>,
    } else {
    }
    return
  }
  func.func @transform_0(%arg0: i32) -> (i32, i32, i32) {
    %c0_i32 = arith.constant 0 : i32
    %c0_i32_0 = arith.constant 0 : i32
    %c0_i32_1 = arith.constant 0 : i32
    return %c0_i32, %arg0, %c0_i32_0 : i32, i32, i32
  }
  func.func @transform_1(%arg0: i32) -> (i32, i32) {
    %c0_i32 = arith.constant 0 : i32
    %c0_i32_0 = arith.constant 0 : i32
    %c0_i32_1 = arith.constant 0 : i32
    return %c0_i32, %c0_i32_0 : i32, i32
  }
  func.func @transform_2(%arg0: i32) -> (i32, i32) {
    %c0_i32 = arith.constant 0 : i32
    %c0_i32_0 = arith.constant 0 : i32
    %c0_i32_1 = arith.constant 0 : i32
    return %c0_i32, %c0_i32_0 : i32, i32
  }
  func.func @transform_3(%arg0: i32) -> (i32, i32, i32) {
    %c0_i32 = arith.constant 0 : i32
    %c0_i32_0 = arith.constant 0 : i32
    %c0_i32_1 = arith.constant 0 : i32
    %c0_i32_2 = arith.constant 0 : i32
    return %c0_i32, %c0_i32_0, %c0_i32_1 : i32, i32, i32
  }
  func.func @transform_4(%arg0: i32) -> (i32, i32, i32) {
    %c0_i32 = arith.constant 0 : i32
    %c0_i32_0 = arith.constant 0 : i32
    %c0_i32_1 = arith.constant 0 : i32
    %c0_i32_2 = arith.constant 0 : i32
    return %c0_i32, %c0_i32_0, %c0_i32_1 : i32, i32, i32
  }
  func.func @transform_5(%arg0: i32) -> (i32, i32, i32) {
    %c0_i32 = arith.constant 0 : i32
    %c0_i32_0 = arith.constant 0 : i32
    %c0_i32_1 = arith.constant 0 : i32
    %c0_i32_2 = arith.constant 0 : i32
    return %c0_i32, %c0_i32_0, %c0_i32_1 : i32, i32, i32
  }
  func.func @transform_6(%arg0: i32) -> (i32, i32) {
    %c0_i32 = arith.constant 0 : i32
    %c0_i32_0 = arith.constant 0 : i32
    %c0_i32_1 = arith.constant 0 : i32
    return %c0_i32, %c0_i32_0 : i32, i32
  }
  func.func @transform_7(%arg0: i32) -> (i32, i32) {
    %c0_i32 = arith.constant 0 : i32
    %c0_i32_0 = arith.constant 0 : i32
    %c0_i32_1 = arith.constant 0 : i32
    return %c0_i32, %c0_i32_0 : i32, i32
  }
  func.func @transform_8(%arg0: i32) -> (i32, i32) {
    %c0_i32 = arith.constant 0 : i32
    %c0_i32_0 = arith.constant 0 : i32
    %c0_i32_1 = arith.constant 0 : i32
    return %c0_i32, %c0_i32_0 : i32, i32
  }
}

module attributes {stable_mosaic.version = 11 : i64} {
  func.func @_att_ffn_kernel(%arg0: i32, %arg1: memref<1xi32, #tpu.memory_space<smem>>, %arg2: memref<2x4x128xf32, #tpu.memory_space<vmem>>, %arg3: memref<2x8x32xf32, #tpu.memory_space<vmem>>, %arg4: memref<128x32xbf16, #tpu.memory_space<vmem>>, %arg5: memref<1x32xf32, #tpu.memory_space<vmem>>, %arg6: memref<32x64xbf16, #tpu.memory_space<vmem>>, %arg7: memref<1x64xf32, #tpu.memory_space<vmem>>, %arg8: memref<32x32xbf16, #tpu.memory_space<vmem>>, %arg9: memref<1x32xf32, #tpu.memory_space<vmem>>, %arg10: memref<1x32xf32, #tpu.memory_space<vmem>>, %arg11: memref<1x32xf32, #tpu.memory_space<vmem>>, %arg12: memref<32x64xbf16, #tpu.memory_space<vmem>>, %arg13: memref<1x64xf32, #tpu.memory_space<vmem>>, %arg14: memref<64x32xbf16, #tpu.memory_space<vmem>>, %arg15: memref<1x32xf32, #tpu.memory_space<vmem>>, %arg16: memref<1x32xf32, #tpu.memory_space<vmem>>, %arg17: memref<1x32xf32, #tpu.memory_space<vmem>>, %arg18: memref<8x32xf32, #tpu.memory_space<vmem>>) attributes {dimension_semantics = [#tpu.dimension_semantics<parallel>], iteration_bounds = array<i64: 1>, scalar_prefetch = 1 : i64, scratch_operands = 0 : i64, tpu.core_type = #tpu.core_type<tc>, window_params = [{transform_indices = @transform_0, window_bounds = array<i64: 2, 4, 128>}, {transform_indices = @transform_1, window_bounds = array<i64: 2, 8, 32>}, {pipeline_mode = #tpu.pipeline_mode<synchronous>, transform_indices = @transform_2, window_bounds = array<i64: 128, 32>}, {pipeline_mode = #tpu.pipeline_mode<synchronous>, transform_indices = @transform_3, window_bounds = array<i64: 1, 32>}, {pipeline_mode = #tpu.pipeline_mode<synchronous>, transform_indices = @transform_4, window_bounds = array<i64: 32, 64>}, {pipeline_mode = #tpu.pipeline_mode<synchronous>, transform_indices = @transform_5, window_bounds = array<i64: 1, 64>}, {pipeline_mode = #tpu.pipeline_mode<synchronous>, transform_indices = @transform_6, window_bounds = array<i64: 32, 32>}, {pipeline_mode = #tpu.pipeline_mode<synchronous>, transform_indices = @transform_7, window_bounds = array<i64: 1, 32>}, {pipeline_mode = #tpu.pipeline_mode<synchronous>, transform_indices = @transform_8, window_bounds = array<i64: 1, 32>}, {pipeline_mode = #tpu.pipeline_mode<synchronous>, transform_indices = @transform_9, window_bounds = array<i64: 1, 32>}, {pipeline_mode = #tpu.pipeline_mode<synchronous>, transform_indices = @transform_10, window_bounds = array<i64: 32, 64>}, {pipeline_mode = #tpu.pipeline_mode<synchronous>, transform_indices = @transform_11, window_bounds = array<i64: 1, 64>}, {pipeline_mode = #tpu.pipeline_mode<synchronous>, transform_indices = @transform_12, window_bounds = array<i64: 64, 32>}, {pipeline_mode = #tpu.pipeline_mode<synchronous>, transform_indices = @transform_13, window_bounds = array<i64: 1, 32>}, {pipeline_mode = #tpu.pipeline_mode<synchronous>, transform_indices = @transform_14, window_bounds = array<i64: 1, 32>}, {pipeline_mode = #tpu.pipeline_mode<synchronous>, transform_indices = @transform_15, window_bounds = array<i64: 1, 32>}, {transform_indices = @transform_16, window_bounds = array<i64: 8, 32>}]} {
    %c0 = arith.constant 0 : index
    %c0_0 = arith.constant 0 : index
    %c0_1 = arith.constant 0 : index
    %0 = vector.load %arg2[%c0, %c0_0, %c0_1] : memref<2x4x128xf32, #tpu.memory_space<vmem>>, vector<2x4x128xf32>
    %1 = vector.shape_cast %0 : vector<2x4x128xf32> to vector<8x128xf32>
    %2 = arith.truncf %1 : vector<8x128xf32> to vector<8x128xbf16>
    %c0_2 = arith.constant 0 : index
    %c0_3 = arith.constant 0 : index
    %3 = vector.load %arg4[%c0_2, %c0_3] : memref<128x32xbf16, #tpu.memory_space<vmem>>, vector<128x32xbf16>
    %cst = arith.constant dense<0.000000e+00> : vector<8x32xf32>
    %4 = tpu.matmul %2, %3, %cst {dimension_numbers = #tpu.dot_dimension_numbers<[1], [0], [0], [1], [0, 0, 1, 1], [], []>} : vector<8x128xbf16>, vector<128x32xbf16>, vector<8x32xf32> -> vector<8x32xf32>
    %c0_4 = arith.constant 0 : index
    %c0_5 = arith.constant 0 : index
    %5 = vector.load %arg5[%c0_4, %c0_5] : memref<1x32xf32, #tpu.memory_space<vmem>>, vector<1x32xf32>
    %6 = vector.broadcast %5 : vector<1x32xf32> to vector<8x32xf32>
    %7 = arith.addf %4, %6 : vector<8x32xf32>
    %c0_6 = arith.constant 0 : index
    %c0_7 = arith.constant 0 : index
    %c0_8 = arith.constant 0 : index
    %8 = vector.load %arg3[%c0_6, %c0_7, %c0_8] : memref<2x8x32xf32, #tpu.memory_space<vmem>>, vector<2x8x32xf32>
    %9 = vector.shape_cast %8 : vector<2x8x32xf32> to vector<16x32xf32>
    %10 = arith.truncf %9 : vector<16x32xf32> to vector<16x32xbf16>
    %c0_9 = arith.constant 0 : index
    %c0_10 = arith.constant 0 : index
    %11 = vector.load %arg6[%c0_9, %c0_10] : memref<32x64xbf16, #tpu.memory_space<vmem>>, vector<32x64xbf16>
    %cst_11 = arith.constant dense<0.000000e+00> : vector<16x64xf32>
    %12 = tpu.matmul %10, %11, %cst_11 {dimension_numbers = #tpu.dot_dimension_numbers<[1], [0], [0], [1], [0, 0, 1, 1], [], []>} : vector<16x32xbf16>, vector<32x64xbf16>, vector<16x64xf32> -> vector<16x64xf32>
    %c0_12 = arith.constant 0 : index
    %c0_13 = arith.constant 0 : index
    %13 = vector.load %arg7[%c0_12, %c0_13] : memref<1x64xf32, #tpu.memory_space<vmem>>, vector<1x64xf32>
    %14 = vector.broadcast %13 : vector<1x64xf32> to vector<16x64xf32>
    %15 = arith.addf %12, %14 : vector<16x64xf32>
    %16 = vector.shape_cast %7 : vector<8x32xf32> to vector<2x4x32xf32>
    %17 = vector.shape_cast %15 : vector<16x64xf32> to vector<2x8x64xf32>
    %18 = vector.extract_strided_slice %17 {offsets = [0, 0, 0], sizes = [2, 8, 32], strides = [1, 1, 1]} : vector<2x8x64xf32> to vector<2x8x32xf32>
    %19 = vector.extract_strided_slice %17 {offsets = [0, 0, 32], sizes = [2, 8, 32], strides = [1, 1, 1]} : vector<2x8x64xf32> to vector<2x8x32xf32>
    %c0_14 = arith.constant 0 : index
    %20 = memref.load %arg1[%c0_14] : memref<1xi32, #tpu.memory_space<smem>>
    %21 = vector.extract_strided_slice %16 {offsets = [0, 0, 0], sizes = [2, 4, 8], strides = [1, 1, 1]} : vector<2x4x32xf32> to vector<2x4x8xf32>
    %22 = arith.truncf %21 : vector<2x4x8xf32> to vector<2x4x8xbf16>
    %23 = vector.extract_strided_slice %18 {offsets = [0, 0, 0], sizes = [2, 8, 8], strides = [1, 1, 1]} : vector<2x8x32xf32> to vector<2x8x8xf32>
    %24 = arith.truncf %23 : vector<2x8x8xf32> to vector<2x8x8xbf16>
    %25 = vector.extract_strided_slice %19 {offsets = [0, 0, 0], sizes = [2, 8, 8], strides = [1, 1, 1]} : vector<2x8x32xf32> to vector<2x8x8xf32>
    %26 = arith.truncf %25 : vector<2x8x8xf32> to vector<2x8x8xbf16>
    %cst_15 = arith.constant dense<0.000000e+00> : vector<2x4x8xf32>
    %27 = tpu.matmul %22, %24, %cst_15 {dimension_numbers = #tpu.dot_dimension_numbers<[2], [2], [1], [1], [0, 0, 0, 1, 1, 1], [0], [0]>} : vector<2x4x8xbf16>, vector<2x8x8xbf16>, vector<2x4x8xf32> -> vector<2x4x8xf32>
    %cst_16 = arith.constant 0.353553385 : f32
    %28 = vector.broadcast %cst_16 : f32 to vector<2x4x8xf32>
    %29 = arith.mulf %27, %28 : vector<2x4x8xf32>
    %30 = tpu.iota {dimensions = array<i32: 2>} : vector<2x4x8xi32>
    %31 = vector.broadcast %20 : i32 to vector<2x4x8xi32>
    %32 = arith.cmpi slt, %30, %31 : vector<2x4x8xi32>
    %cst_17 = arith.constant -1.000000e+30 : f32
    %33 = vector.broadcast %cst_17 : f32 to vector<2x4x8xf32>
    %34 = arith.select %32, %29, %33 : vector<2x4x8xi1>, vector<2x4x8xf32>
    %cst_18 = arith.constant dense<0xFF800000> : vector<2x4xf32>
    %35 = vector.multi_reduction <maximumf>, %34, %cst_18 [2] : vector<2x4x8xf32> to vector<2x4xf32>
    %36 = vector.shape_cast %35 : vector<2x4xf32> to vector<2x4x1xf32>
    %37 = vector.broadcast %36 : vector<2x4x1xf32> to vector<2x4x8xf32>
    %38 = arith.subf %34, %37 : vector<2x4x8xf32>
    %39 = math.exp %38 : vector<2x4x8xf32>
    %cst_19 = arith.constant dense<0.000000e+00> : vector<2x4xf32>
    %40 = vector.multi_reduction <add>, %39, %cst_19 [2] : vector<2x4x8xf32> to vector<2x4xf32>
    %41 = vector.shape_cast %40 : vector<2x4xf32> to vector<2x4x1xf32>
    %42 = tpu.reciprocal %41 {approx = true} : vector<2x4x1xf32> -> vector<2x4x1xf32>
    %43 = vector.broadcast %42 : vector<2x4x1xf32> to vector<2x4x8xf32>
    %44 = arith.mulf %39, %43 : vector<2x4x8xf32>
    %45 = arith.truncf %44 : vector<2x4x8xf32> to vector<2x4x8xbf16>
    %cst_20 = arith.constant dense<0.000000e+00> : vector<2x4x8xf32>
    %46 = tpu.matmul %45, %26, %cst_20 {dimension_numbers = #tpu.dot_dimension_numbers<[2], [1], [1], [2], [0, 0, 0, 1, 1, 2], [0], [0]>} : vector<2x4x8xbf16>, vector<2x8x8xbf16>, vector<2x4x8xf32> -> vector<2x4x8xf32>
    %47 = vector.extract_strided_slice %16 {offsets = [0, 0, 8], sizes = [2, 4, 8], strides = [1, 1, 1]} : vector<2x4x32xf32> to vector<2x4x8xf32>
    %48 = arith.truncf %47 : vector<2x4x8xf32> to vector<2x4x8xbf16>
    %49 = vector.extract_strided_slice %18 {offsets = [0, 0, 8], sizes = [2, 8, 8], strides = [1, 1, 1]} : vector<2x8x32xf32> to vector<2x8x8xf32>
    %50 = arith.truncf %49 : vector<2x8x8xf32> to vector<2x8x8xbf16>
    %51 = vector.extract_strided_slice %19 {offsets = [0, 0, 8], sizes = [2, 8, 8], strides = [1, 1, 1]} : vector<2x8x32xf32> to vector<2x8x8xf32>
    %52 = arith.truncf %51 : vector<2x8x8xf32> to vector<2x8x8xbf16>
    %cst_21 = arith.constant dense<0.000000e+00> : vector<2x4x8xf32>
    %53 = tpu.matmul %48, %50, %cst_21 {dimension_numbers = #tpu.dot_dimension_numbers<[2], [2], [1], [1], [0, 0, 0, 1, 1, 1], [0], [0]>} : vector<2x4x8xbf16>, vector<2x8x8xbf16>, vector<2x4x8xf32> -> vector<2x4x8xf32>
    %cst_22 = arith.constant 0.353553385 : f32
    %54 = vector.broadcast %cst_22 : f32 to vector<2x4x8xf32>
    %55 = arith.mulf %53, %54 : vector<2x4x8xf32>
    %56 = tpu.iota {dimensions = array<i32: 2>} : vector<2x4x8xi32>
    %57 = vector.broadcast %20 : i32 to vector<2x4x8xi32>
    %58 = arith.cmpi slt, %56, %57 : vector<2x4x8xi32>
    %cst_23 = arith.constant -1.000000e+30 : f32
    %59 = vector.broadcast %cst_23 : f32 to vector<2x4x8xf32>
    %60 = arith.select %58, %55, %59 : vector<2x4x8xi1>, vector<2x4x8xf32>
    %cst_24 = arith.constant dense<0xFF800000> : vector<2x4xf32>
    %61 = vector.multi_reduction <maximumf>, %60, %cst_24 [2] : vector<2x4x8xf32> to vector<2x4xf32>
    %62 = vector.shape_cast %61 : vector<2x4xf32> to vector<2x4x1xf32>
    %63 = vector.broadcast %62 : vector<2x4x1xf32> to vector<2x4x8xf32>
    %64 = arith.subf %60, %63 : vector<2x4x8xf32>
    %65 = math.exp %64 : vector<2x4x8xf32>
    %cst_25 = arith.constant dense<0.000000e+00> : vector<2x4xf32>
    %66 = vector.multi_reduction <add>, %65, %cst_25 [2] : vector<2x4x8xf32> to vector<2x4xf32>
    %67 = vector.shape_cast %66 : vector<2x4xf32> to vector<2x4x1xf32>
    %68 = tpu.reciprocal %67 {approx = true} : vector<2x4x1xf32> -> vector<2x4x1xf32>
    %69 = vector.broadcast %68 : vector<2x4x1xf32> to vector<2x4x8xf32>
    %70 = arith.mulf %65, %69 : vector<2x4x8xf32>
    %71 = arith.truncf %70 : vector<2x4x8xf32> to vector<2x4x8xbf16>
    %cst_26 = arith.constant dense<0.000000e+00> : vector<2x4x8xf32>
    %72 = tpu.matmul %71, %52, %cst_26 {dimension_numbers = #tpu.dot_dimension_numbers<[2], [1], [1], [2], [0, 0, 0, 1, 1, 2], [0], [0]>} : vector<2x4x8xbf16>, vector<2x8x8xbf16>, vector<2x4x8xf32> -> vector<2x4x8xf32>
    %73 = vector.extract_strided_slice %16 {offsets = [0, 0, 16], sizes = [2, 4, 8], strides = [1, 1, 1]} : vector<2x4x32xf32> to vector<2x4x8xf32>
    %74 = arith.truncf %73 : vector<2x4x8xf32> to vector<2x4x8xbf16>
    %75 = vector.extract_strided_slice %18 {offsets = [0, 0, 16], sizes = [2, 8, 8], strides = [1, 1, 1]} : vector<2x8x32xf32> to vector<2x8x8xf32>
    %76 = arith.truncf %75 : vector<2x8x8xf32> to vector<2x8x8xbf16>
    %77 = vector.extract_strided_slice %19 {offsets = [0, 0, 16], sizes = [2, 8, 8], strides = [1, 1, 1]} : vector<2x8x32xf32> to vector<2x8x8xf32>
    %78 = arith.truncf %77 : vector<2x8x8xf32> to vector<2x8x8xbf16>
    %cst_27 = arith.constant dense<0.000000e+00> : vector<2x4x8xf32>
    %79 = tpu.matmul %74, %76, %cst_27 {dimension_numbers = #tpu.dot_dimension_numbers<[2], [2], [1], [1], [0, 0, 0, 1, 1, 1], [0], [0]>} : vector<2x4x8xbf16>, vector<2x8x8xbf16>, vector<2x4x8xf32> -> vector<2x4x8xf32>
    %cst_28 = arith.constant 0.353553385 : f32
    %80 = vector.broadcast %cst_28 : f32 to vector<2x4x8xf32>
    %81 = arith.mulf %79, %80 : vector<2x4x8xf32>
    %82 = tpu.iota {dimensions = array<i32: 2>} : vector<2x4x8xi32>
    %83 = vector.broadcast %20 : i32 to vector<2x4x8xi32>
    %84 = arith.cmpi slt, %82, %83 : vector<2x4x8xi32>
    %cst_29 = arith.constant -1.000000e+30 : f32
    %85 = vector.broadcast %cst_29 : f32 to vector<2x4x8xf32>
    %86 = arith.select %84, %81, %85 : vector<2x4x8xi1>, vector<2x4x8xf32>
    %cst_30 = arith.constant dense<0xFF800000> : vector<2x4xf32>
    %87 = vector.multi_reduction <maximumf>, %86, %cst_30 [2] : vector<2x4x8xf32> to vector<2x4xf32>
    %88 = vector.shape_cast %87 : vector<2x4xf32> to vector<2x4x1xf32>
    %89 = vector.broadcast %88 : vector<2x4x1xf32> to vector<2x4x8xf32>
    %90 = arith.subf %86, %89 : vector<2x4x8xf32>
    %91 = math.exp %90 : vector<2x4x8xf32>
    %cst_31 = arith.constant dense<0.000000e+00> : vector<2x4xf32>
    %92 = vector.multi_reduction <add>, %91, %cst_31 [2] : vector<2x4x8xf32> to vector<2x4xf32>
    %93 = vector.shape_cast %92 : vector<2x4xf32> to vector<2x4x1xf32>
    %94 = tpu.reciprocal %93 {approx = true} : vector<2x4x1xf32> -> vector<2x4x1xf32>
    %95 = vector.broadcast %94 : vector<2x4x1xf32> to vector<2x4x8xf32>
    %96 = arith.mulf %91, %95 : vector<2x4x8xf32>
    %97 = arith.truncf %96 : vector<2x4x8xf32> to vector<2x4x8xbf16>
    %cst_32 = arith.constant dense<0.000000e+00> : vector<2x4x8xf32>
    %98 = tpu.matmul %97, %78, %cst_32 {dimension_numbers = #tpu.dot_dimension_numbers<[2], [1], [1], [2], [0, 0, 0, 1, 1, 2], [0], [0]>} : vector<2x4x8xbf16>, vector<2x8x8xbf16>, vector<2x4x8xf32> -> vector<2x4x8xf32>
    %99 = vector.extract_strided_slice %16 {offsets = [0, 0, 24], sizes = [2, 4, 8], strides = [1, 1, 1]} : vector<2x4x32xf32> to vector<2x4x8xf32>
    %100 = arith.truncf %99 : vector<2x4x8xf32> to vector<2x4x8xbf16>
    %101 = vector.extract_strided_slice %18 {offsets = [0, 0, 24], sizes = [2, 8, 8], strides = [1, 1, 1]} : vector<2x8x32xf32> to vector<2x8x8xf32>
    %102 = arith.truncf %101 : vector<2x8x8xf32> to vector<2x8x8xbf16>
    %103 = vector.extract_strided_slice %19 {offsets = [0, 0, 24], sizes = [2, 8, 8], strides = [1, 1, 1]} : vector<2x8x32xf32> to vector<2x8x8xf32>
    %104 = arith.truncf %103 : vector<2x8x8xf32> to vector<2x8x8xbf16>
    %cst_33 = arith.constant dense<0.000000e+00> : vector<2x4x8xf32>
    %105 = tpu.matmul %100, %102, %cst_33 {dimension_numbers = #tpu.dot_dimension_numbers<[2], [2], [1], [1], [0, 0, 0, 1, 1, 1], [0], [0]>} : vector<2x4x8xbf16>, vector<2x8x8xbf16>, vector<2x4x8xf32> -> vector<2x4x8xf32>
    %cst_34 = arith.constant 0.353553385 : f32
    %106 = vector.broadcast %cst_34 : f32 to vector<2x4x8xf32>
    %107 = arith.mulf %105, %106 : vector<2x4x8xf32>
    %108 = tpu.iota {dimensions = array<i32: 2>} : vector<2x4x8xi32>
    %109 = vector.broadcast %20 : i32 to vector<2x4x8xi32>
    %110 = arith.cmpi slt, %108, %109 : vector<2x4x8xi32>
    %cst_35 = arith.constant -1.000000e+30 : f32
    %111 = vector.broadcast %cst_35 : f32 to vector<2x4x8xf32>
    %112 = arith.select %110, %107, %111 : vector<2x4x8xi1>, vector<2x4x8xf32>
    %cst_36 = arith.constant dense<0xFF800000> : vector<2x4xf32>
    %113 = vector.multi_reduction <maximumf>, %112, %cst_36 [2] : vector<2x4x8xf32> to vector<2x4xf32>
    %114 = vector.shape_cast %113 : vector<2x4xf32> to vector<2x4x1xf32>
    %115 = vector.broadcast %114 : vector<2x4x1xf32> to vector<2x4x8xf32>
    %116 = arith.subf %112, %115 : vector<2x4x8xf32>
    %117 = math.exp %116 : vector<2x4x8xf32>
    %cst_37 = arith.constant dense<0.000000e+00> : vector<2x4xf32>
    %118 = vector.multi_reduction <add>, %117, %cst_37 [2] : vector<2x4x8xf32> to vector<2x4xf32>
    %119 = vector.shape_cast %118 : vector<2x4xf32> to vector<2x4x1xf32>
    %120 = tpu.reciprocal %119 {approx = true} : vector<2x4x1xf32> -> vector<2x4x1xf32>
    %121 = vector.broadcast %120 : vector<2x4x1xf32> to vector<2x4x8xf32>
    %122 = arith.mulf %117, %121 : vector<2x4x8xf32>
    %123 = arith.truncf %122 : vector<2x4x8xf32> to vector<2x4x8xbf16>
    %cst_38 = arith.constant dense<0.000000e+00> : vector<2x4x8xf32>
    %124 = tpu.matmul %123, %104, %cst_38 {dimension_numbers = #tpu.dot_dimension_numbers<[2], [1], [1], [2], [0, 0, 0, 1, 1, 2], [0], [0]>} : vector<2x4x8xbf16>, vector<2x8x8xbf16>, vector<2x4x8xf32> -> vector<2x4x8xf32>
    %125 = tpu.concatenate %46, %72, %98, %124 in 2 : vector<2x4x8xf32>, vector<2x4x8xf32>, vector<2x4x8xf32>, vector<2x4x8xf32> -> vector<2x4x32xf32>
    %126 = vector.shape_cast %125 : vector<2x4x32xf32> to vector<8x32xf32>
    %127 = arith.truncf %126 : vector<8x32xf32> to vector<8x32xbf16>
    %c0_39 = arith.constant 0 : index
    %c0_40 = arith.constant 0 : index
    %128 = vector.load %arg8[%c0_39, %c0_40] : memref<32x32xbf16, #tpu.memory_space<vmem>>, vector<32x32xbf16>
    %cst_41 = arith.constant dense<0.000000e+00> : vector<8x32xf32>
    %129 = tpu.matmul %127, %128, %cst_41 {dimension_numbers = #tpu.dot_dimension_numbers<[1], [0], [0], [1], [0, 0, 1, 1], [], []>} : vector<8x32xbf16>, vector<32x32xbf16>, vector<8x32xf32> -> vector<8x32xf32>
    %c0_42 = arith.constant 0 : index
    %c0_43 = arith.constant 0 : index
    %130 = vector.load %arg9[%c0_42, %c0_43] : memref<1x32xf32, #tpu.memory_space<vmem>>, vector<1x32xf32>
    %131 = vector.broadcast %130 : vector<1x32xf32> to vector<8x32xf32>
    %132 = arith.addf %129, %131 : vector<8x32xf32>
    %133 = arith.addf %132, %7 : vector<8x32xf32>
    %c0_44 = arith.constant 0 : index
    %c0_45 = arith.constant 0 : index
    %134 = vector.load %arg10[%c0_44, %c0_45] : memref<1x32xf32, #tpu.memory_space<vmem>>, vector<1x32xf32>
    %c0_46 = arith.constant 0 : index
    %c0_47 = arith.constant 0 : index
    %135 = vector.load %arg11[%c0_46, %c0_47] : memref<1x32xf32, #tpu.memory_space<vmem>>, vector<1x32xf32>
    %cst_48 = arith.constant dense<0.000000e+00> : vector<8xf32>
    %136 = vector.multi_reduction <add>, %133, %cst_48 [1] : vector<8x32xf32> to vector<8xf32>
    %137 = vector.shape_cast %136 : vector<8xf32> to vector<8x1xf32>
    %cst_49 = arith.constant 3.200000e+01 : f32
    %138 = vector.broadcast %cst_49 : f32 to vector<8x1xf32>
    %139 = arith.divf %137, %138 : vector<8x1xf32>
    %140 = vector.broadcast %139 : vector<8x1xf32> to vector<8x32xf32>
    %141 = arith.subf %133, %140 : vector<8x32xf32>
    %142 = arith.mulf %141, %141 : vector<8x32xf32>
    %cst_50 = arith.constant dense<0.000000e+00> : vector<8xf32>
    %143 = vector.multi_reduction <add>, %142, %cst_50 [1] : vector<8x32xf32> to vector<8xf32>
    %144 = vector.shape_cast %143 : vector<8xf32> to vector<8x1xf32>
    %cst_51 = arith.constant 3.200000e+01 : f32
    %145 = vector.broadcast %cst_51 : f32 to vector<8x1xf32>
    %146 = arith.divf %144, %145 : vector<8x1xf32>
    %147 = vector.broadcast %139 : vector<8x1xf32> to vector<8x32xf32>
    %148 = arith.subf %133, %147 : vector<8x32xf32>
    %cst_52 = arith.constant 9.99999974E-6 : f32
    %149 = vector.broadcast %cst_52 : f32 to vector<8x1xf32>
    %150 = arith.addf %146, %149 : vector<8x1xf32>
    %151 = math.rsqrt %150 : vector<8x1xf32>
    %152 = vector.broadcast %151 : vector<8x1xf32> to vector<8x32xf32>
    %153 = arith.mulf %148, %152 : vector<8x32xf32>
    %154 = vector.broadcast %134 : vector<1x32xf32> to vector<8x32xf32>
    %155 = arith.mulf %153, %154 : vector<8x32xf32>
    %156 = vector.broadcast %135 : vector<1x32xf32> to vector<8x32xf32>
    %157 = arith.addf %155, %156 : vector<8x32xf32>
    %158 = arith.truncf %157 : vector<8x32xf32> to vector<8x32xbf16>
    %c0_53 = arith.constant 0 : index
    %c0_54 = arith.constant 0 : index
    %159 = vector.load %arg12[%c0_53, %c0_54] : memref<32x64xbf16, #tpu.memory_space<vmem>>, vector<32x64xbf16>
    %cst_55 = arith.constant dense<0.000000e+00> : vector<8x64xf32>
    %160 = tpu.matmul %158, %159, %cst_55 {dimension_numbers = #tpu.dot_dimension_numbers<[1], [0], [0], [1], [0, 0, 1, 1], [], []>} : vector<8x32xbf16>, vector<32x64xbf16>, vector<8x64xf32> -> vector<8x64xf32>
    %c0_56 = arith.constant 0 : index
    %c0_57 = arith.constant 0 : index
    %161 = vector.load %arg13[%c0_56, %c0_57] : memref<1x64xf32, #tpu.memory_space<vmem>>, vector<1x64xf32>
    %162 = vector.broadcast %161 : vector<1x64xf32> to vector<8x64xf32>
    %163 = arith.addf %160, %162 : vector<8x64xf32>
    %cst_58 = arith.constant 0.000000e+00 : f32
    %164 = vector.broadcast %cst_58 : f32 to vector<8x64xf32>
    %165 = arith.maximumf %163, %164 : vector<8x64xf32>
    %166 = arith.truncf %165 : vector<8x64xf32> to vector<8x64xbf16>
    %c0_59 = arith.constant 0 : index
    %c0_60 = arith.constant 0 : index
    %167 = vector.load %arg14[%c0_59, %c0_60] : memref<64x32xbf16, #tpu.memory_space<vmem>>, vector<64x32xbf16>
    %cst_61 = arith.constant dense<0.000000e+00> : vector<8x32xf32>
    %168 = tpu.matmul %166, %167, %cst_61 {dimension_numbers = #tpu.dot_dimension_numbers<[1], [0], [0], [1], [0, 0, 1, 1], [], []>} : vector<8x64xbf16>, vector<64x32xbf16>, vector<8x32xf32> -> vector<8x32xf32>
    %c0_62 = arith.constant 0 : index
    %c0_63 = arith.constant 0 : index
    %169 = vector.load %arg15[%c0_62, %c0_63] : memref<1x32xf32, #tpu.memory_space<vmem>>, vector<1x32xf32>
    %170 = vector.broadcast %169 : vector<1x32xf32> to vector<8x32xf32>
    %171 = arith.addf %168, %170 : vector<8x32xf32>
    %172 = arith.addf %171, %157 : vector<8x32xf32>
    %c0_64 = arith.constant 0 : index
    %c0_65 = arith.constant 0 : index
    %173 = vector.load %arg16[%c0_64, %c0_65] : memref<1x32xf32, #tpu.memory_space<vmem>>, vector<1x32xf32>
    %c0_66 = arith.constant 0 : index
    %c0_67 = arith.constant 0 : index
    %174 = vector.load %arg17[%c0_66, %c0_67] : memref<1x32xf32, #tpu.memory_space<vmem>>, vector<1x32xf32>
    %cst_68 = arith.constant dense<0.000000e+00> : vector<8xf32>
    %175 = vector.multi_reduction <add>, %172, %cst_68 [1] : vector<8x32xf32> to vector<8xf32>
    %176 = vector.shape_cast %175 : vector<8xf32> to vector<8x1xf32>
    %cst_69 = arith.constant 3.200000e+01 : f32
    %177 = vector.broadcast %cst_69 : f32 to vector<8x1xf32>
    %178 = arith.divf %176, %177 : vector<8x1xf32>
    %179 = vector.broadcast %178 : vector<8x1xf32> to vector<8x32xf32>
    %180 = arith.subf %172, %179 : vector<8x32xf32>
    %181 = arith.mulf %180, %180 : vector<8x32xf32>
    %cst_70 = arith.constant dense<0.000000e+00> : vector<8xf32>
    %182 = vector.multi_reduction <add>, %181, %cst_70 [1] : vector<8x32xf32> to vector<8xf32>
    %183 = vector.shape_cast %182 : vector<8xf32> to vector<8x1xf32>
    %cst_71 = arith.constant 3.200000e+01 : f32
    %184 = vector.broadcast %cst_71 : f32 to vector<8x1xf32>
    %185 = arith.divf %183, %184 : vector<8x1xf32>
    %186 = vector.broadcast %178 : vector<8x1xf32> to vector<8x32xf32>
    %187 = arith.subf %172, %186 : vector<8x32xf32>
    %cst_72 = arith.constant 9.99999974E-6 : f32
    %188 = vector.broadcast %cst_72 : f32 to vector<8x1xf32>
    %189 = arith.addf %185, %188 : vector<8x1xf32>
    %190 = math.rsqrt %189 : vector<8x1xf32>
    %191 = vector.broadcast %190 : vector<8x1xf32> to vector<8x32xf32>
    %192 = arith.mulf %187, %191 : vector<8x32xf32>
    %193 = vector.broadcast %173 : vector<1x32xf32> to vector<8x32xf32>
    %194 = arith.mulf %192, %193 : vector<8x32xf32>
    %195 = vector.broadcast %174 : vector<1x32xf32> to vector<8x32xf32>
    %196 = arith.addf %194, %195 : vector<8x32xf32>
    %c0_73 = arith.constant 0 : index
    %c0_74 = arith.constant 0 : index
    %197 = vector.load %arg18[%c0_73, %c0_74] : memref<8x32xf32, #tpu.memory_space<vmem>>, vector<8x32xf32>
    tpu.vector_store %arg18[%c0_73, %c0_74], %196 {strides = array<i32>} : memref<8x32xf32, #tpu.memory_space<vmem>>, vector<8x32xf32>,
    return
  }
  func.func @transform_0(%arg0: i32, %arg1: memref<1xi32, #tpu.memory_space<smem>>) -> (i32, i32, i32) {
    %c0_i32 = arith.constant 0 : i32
    %c0_i32_0 = arith.constant 0 : i32
    %c0_i32_1 = arith.constant 0 : i32
    return %arg0, %c0_i32, %c0_i32_0 : i32, i32, i32
  }
  func.func @transform_1(%arg0: i32, %arg1: memref<1xi32, #tpu.memory_space<smem>>) -> (i32, i32, i32) {
    %c0_i32 = arith.constant 0 : i32
    %c0_i32_0 = arith.constant 0 : i32
    %c0_i32_1 = arith.constant 0 : i32
    return %arg0, %c0_i32, %c0_i32_0 : i32, i32, i32
  }
  func.func @transform_2(%arg0: i32, %arg1: memref<1xi32, #tpu.memory_space<smem>>) -> (i32, i32) {
    %c0_i32 = arith.constant 0 : i32
    %c0_i32_0 = arith.constant 0 : i32
    %c0_i32_1 = arith.constant 0 : i32
    return %c0_i32, %c0_i32_0 : i32, i32
  }
  func.func @transform_3(%arg0: i32, %arg1: memref<1xi32, #tpu.memory_space<smem>>) -> (i32, i32) {
    %c0_i32 = arith.constant 0 : i32
    %c0_i32_0 = arith.constant 0 : i32
    %c0_i32_1 = arith.constant 0 : i32
    return %c0_i32, %c0_i32_0 : i32, i32
  }
  func.func @transform_4(%arg0: i32, %arg1: memref<1xi32, #tpu.memory_space<smem>>) -> (i32, i32) {
    %c0_i32 = arith.constant 0 : i32
    %c0_i32_0 = arith.constant 0 : i32
    %c0_i32_1 = arith.constant 0 : i32
    return %c0_i32, %c0_i32_0 : i32, i32
  }
  func.func @transform_5(%arg0: i32, %arg1: memref<1xi32, #tpu.memory_space<smem>>) -> (i32, i32) {
    %c0_i32 = arith.constant 0 : i32
    %c0_i32_0 = arith.constant 0 : i32
    %c0_i32_1 = arith.constant 0 : i32
    return %c0_i32, %c0_i32_0 : i32, i32
  }
  func.func @transform_6(%arg0: i32, %arg1: memref<1xi32, #tpu.memory_space<smem>>) -> (i32, i32) {
    %c0_i32 = arith.constant 0 : i32
    %c0_i32_0 = arith.constant 0 : i32
    %c0_i32_1 = arith.constant 0 : i32
    return %c0_i32, %c0_i32_0 : i32, i32
  }
  func.func @transform_7(%arg0: i32, %arg1: memref<1xi32, #tpu.memory_space<smem>>) -> (i32, i32) {
    %c0_i32 = arith.constant 0 : i32
    %c0_i32_0 = arith.constant 0 : i32
    %c0_i32_1 = arith.constant 0 : i32
    return %c0_i32, %c0_i32_0 : i32, i32
  }
  func.func @transform_8(%arg0: i32, %arg1: memref<1xi32, #tpu.memory_space<smem>>) -> (i32, i32) {
    %c0_i32 = arith.constant 0 : i32
    %c0_i32_0 = arith.constant 0 : i32
    %c0_i32_1 = arith.constant 0 : i32
    return %c0_i32, %c0_i32_0 : i32, i32
  }
  func.func @transform_9(%arg0: i32, %arg1: memref<1xi32, #tpu.memory_space<smem>>) -> (i32, i32) {
    %c0_i32 = arith.constant 0 : i32
    %c0_i32_0 = arith.constant 0 : i32
    %c0_i32_1 = arith.constant 0 : i32
    return %c0_i32, %c0_i32_0 : i32, i32
  }
  func.func @transform_10(%arg0: i32, %arg1: memref<1xi32, #tpu.memory_space<smem>>) -> (i32, i32) {
    %c0_i32 = arith.constant 0 : i32
    %c0_i32_0 = arith.constant 0 : i32
    %c0_i32_1 = arith.constant 0 : i32
    return %c0_i32, %c0_i32_0 : i32, i32
  }
  func.func @transform_11(%arg0: i32, %arg1: memref<1xi32, #tpu.memory_space<smem>>) -> (i32, i32) {
    %c0_i32 = arith.constant 0 : i32
    %c0_i32_0 = arith.constant 0 : i32
    %c0_i32_1 = arith.constant 0 : i32
    return %c0_i32, %c0_i32_0 : i32, i32
  }
  func.func @transform_12(%arg0: i32, %arg1: memref<1xi32, #tpu.memory_space<smem>>) -> (i32, i32) {
    %c0_i32 = arith.constant 0 : i32
    %c0_i32_0 = arith.constant 0 : i32
    %c0_i32_1 = arith.constant 0 : i32
    return %c0_i32, %c0_i32_0 : i32, i32
  }
  func.func @transform_13(%arg0: i32, %arg1: memref<1xi32, #tpu.memory_space<smem>>) -> (i32, i32) {
    %c0_i32 = arith.constant 0 : i32
    %c0_i32_0 = arith.constant 0 : i32
    %c0_i32_1 = arith.constant 0 : i32
    return %c0_i32, %c0_i32_0 : i32, i32
  }
  func.func @transform_14(%arg0: i32, %arg1: memref<1xi32, #tpu.memory_space<smem>>) -> (i32, i32) {
    %c0_i32 = arith.constant 0 : i32
    %c0_i32_0 = arith.constant 0 : i32
    %c0_i32_1 = arith.constant 0 : i32
    return %c0_i32, %c0_i32_0 : i32, i32
  }
  func.func @transform_15(%arg0: i32, %arg1: memref<1xi32, #tpu.memory_space<smem>>) -> (i32, i32) {
    %c0_i32 = arith.constant 0 : i32
    %c0_i32_0 = arith.constant 0 : i32
    %c0_i32_1 = arith.constant 0 : i32
    return %c0_i32, %c0_i32_0 : i32, i32
  }
  func.func @transform_16(%arg0: i32, %arg1: memref<1xi32, #tpu.memory_space<smem>>) -> (i32, i32) {
    %c0_i32 = arith.constant 0 : i32
    %c0_i32_0 = arith.constant 0 : i32
    return %arg0, %c0_i32 : i32, i32
  }
}

</mosaic_0001>

<bundles_post_ra>
// kernel: _layer_step.2
= control target key start
LH: loop header
LB: loop body
LE: loop exit
PB: predicated region body
PF: predicated region fallthrough
CT: control target
= control target key end

     0   :  { %s1629_s27 = smov 0   ;;  %s1631_s28 = smov 0   ;;  %s1934_s0 = inlined_call_operand.vmem [shape: f32[6,64,32], index: 0, kind: input, shape index: {}]   ;;  %s1935_s1 = inlined_call_operand.vmem [shape: bf16[32,32], index: 1, kind: input, shape index: {}]   ;;  %s1936_s2 = inlined_call_operand.vmem [shape: f32[1,32], index: 2, kind: input, shape index: {}]   ;;  %s1937_s3 = inlined_call_operand.vmem [shape: bf16[2,32,128], index: 3, kind: input, shape index: {}]   ;;  %s1938_s4 = inlined_call_operand.vmem [shape: bf16[2,32,128], index: 4, kind: input, shape index: {}]   ;;  %s1939_s5 = inlined_call_operand.vmem [shape: f32[2,1,128], index: 5, kind: input, shape index: {}]   ;;  %s1940_s6 = inlined_call_operand.vmem [shape: f32[1,32], index: 6, kind: input, shape index: {}]   ;;  %s1941_s7 = inlined_call_operand.vmem [shape: f32[1,32], index: 7, kind: input, shape index: {}]   ;;  %s1942_s8 = inlined_call_operand.vmem [shape: f32[2,32], index: 8, kind: output, shape index: {}]  }
   0x1   :  { %s1633_s29 = smov 0  }
   0x2 LB: > { %s1365_s30 = sadd.s32 4294967295, %s1576_s29   ;;  %s1646_s9 = sadd.s32 1, %s1576_s29   ;;  %s1576_s29 = sphi %s1633_s29, %s1945_s29   ;;  %s1572_s28 = sphi %s1631_s28, %s1944_s28   ;;  %s1568_s27 = sphi %s1629_s27, %s1943_s27  }
   0x3   : > { %s22_s10 = ssub.s32 %s1576_s29, %s1646_s9  ;;  %s25_s11 = sadd.s32 1, %s1572_s28 }
   0x4   : > { %p23_p0 = scmp.eq.s32.totalorder %s22_s10, 0  ;;  %p32_p1 = scmp.ne.s32.totalorder %s1572_s28, %s1568_s27 }
   0x5   : > { %p33_p2 = scmp.eq.s32.totalorder %s1576_s29, 0  ;;  %p1367_p4 = scmp.ge.s32.totalorder %s1576_s29, 2 }
   0x6   : > { %s1655_s12 = scalar_select %p23_p0, %s1572_s28, %s25_s11  }
   0x7   : > { %p34_p3 = por %p33_p2, %p32_p1  ;;  %247 = sbr.rel (%p1367_p4) target bundleno = 40 (0x28), region = 44 }
   0xc   : > { %250 = sbr.rel (!%p34_p3) target bundleno = 40 (0x28), region = 48  ;;  %s252_s13 = sand.u32 (%p34_p3), 1, %s1572_s28  }
   0xd   : > { %s1448_s14 = sshll.u32 (%p34_p3), %s1576_s29, 5  ;;  %s1465_s15 = smul.u32 (%p34_p3), 192, %s252_s13 }
   0xe   : > { %s1663_s18 = scalar_lea.vmem (%p34_p3), %s1934_s0, %s1448_s14 }
   0xf   : > { %v332_v0 = vld [vmem:[%s1663_s18] sm:$0xff] (%p34_p3)  ;;  %v334_v1 = vld [vmem:[%s1663_s18 + $0x8] sm:$0xff] (%p34_p3)  ;;  %v336_v2 = vld [vmem:[%s1663_s18 + $0x10] sm:$0xff] (%p34_p3)  ;;  %s1668_s19 = scalar_lea.vmem (%p34_p3), [#allocation3], %s1465_s15 }
  0x10   : > { %333 = vst [vmem:[%s1668_s19] sm:$0xff] (%p34_p3), %v332_v0  ;;  %v338_v3 = vld [vmem:[%s1663_s18 + $0x18] sm:$0xff] (%p34_p3)  ;;  %v340_v4 = vld [vmem:[%s1663_s18 + $0x40] sm:$0xff] (%p34_p3)  ;;  %v342_v5 = vld [vmem:[%s1663_s18 + $0x48] sm:$0xff] (%p34_p3) }
  0x11   : > { %335 = vst [vmem:[%s1668_s19 + $0x8] sm:$0xff] %v334_v1  ;;  %v344_v6 = vld [vmem:[%s1663_s18 + $0x50] sm:$0xff]  ;;  %v346_v7 = vld [vmem:[%s1663_s18 + $0x58] sm:$0xff]  ;;  %v348_v8 = vld [vmem:[%s1663_s18 + $0x80] sm:$0xff] }
  0x12   : > { %337 = vst [vmem:[%s1668_s19 + $0x10] sm:$0xff] %v336_v2  ;;  %v350_v9 = vld [vmem:[%s1663_s18 + $0x88] sm:$0xff]  ;;  %v352_v10 = vld [vmem:[%s1663_s18 + $0x90] sm:$0xff]  ;;  %v354_v11 = vld [vmem:[%s1663_s18 + $0x98] sm:$0xff] }
  0x13   : > { %339 = vst [vmem:[%s1668_s19 + $0x18] sm:$0xff] %v338_v3  ;;  %v356_v12 = vld [vmem:[%s1663_s18 + $0xc0] sm:$0xff]  ;;  %v358_v13 = vld [vmem:[%s1663_s18 + $0xc8] sm:$0xff]  ;;  %v360_v14 = vld [vmem:[%s1663_s18 + $0xd0] sm:$0xff] }
  0x14   : > { %341 = vst [vmem:[%s1668_s19 + $0x20] sm:$0xff] %v340_v4  ;;  %v362_v15 = vld [vmem:[%s1663_s18 + $0xd8] sm:$0xff]  ;;  %v364_v16 = vld [vmem:[%s1663_s18 + $0x100] sm:$0xff]  ;;  %v366_v17 = vld [vmem:[%s1663_s18 + $0x108] sm:$0xff] }
  0x15   : > { %343 = vst [vmem:[%s1668_s19 + $0x28] sm:$0xff] %v342_v5  ;;  %v368_v18 = vld [vmem:[%s1663_s18 + $0x110] sm:$0xff]  ;;  %v370_v19 = vld [vmem:[%s1663_s18 + $0x118] sm:$0xff]  ;;  %v372_v20 = vld [vmem:[%s1663_s18 + $0x140] sm:$0xff] }
  0x16   : > { %345 = vst [vmem:[%s1668_s19 + $0x30] sm:$0xff] %v344_v6  ;;  %v374_v21 = vld [vmem:[%s1663_s18 + $0x148] sm:$0xff]  ;;  %v376_v22 = vld [vmem:[%s1663_s18 + $0x150] sm:$0xff]  ;;  %v378_v23 = vld [vmem:[%s1663_s18 + $0x158] sm:$0xff] }
  0x17   : > { %347 = vst [vmem:[%s1668_s19 + $0x38] sm:$0xff] %v346_v7 }
  0x18   : > { %349 = vst [vmem:[%s1668_s19 + $0x40] sm:$0xff] %v348_v8 }
  0x19   : > { %351 = vst [vmem:[%s1668_s19 + $0x48] sm:$0xff] %v350_v9 }
  0x1a   : > { %353 = vst [vmem:[%s1668_s19 + $0x50] sm:$0xff] %v352_v10 }
  0x1b   : > { %355 = vst [vmem:[%s1668_s19 + $0x58] sm:$0xff] %v354_v11 }
  0x1c   : > { %357 = vst [vmem:[%s1668_s19 + $0x60] sm:$0xff] %v356_v12 }
  0x1d   : > { %359 = vst [vmem:[%s1668_s19 + $0x68] sm:$0xff] %v358_v13 }
  0x1e   : > { %361 = vst [vmem:[%s1668_s19 + $0x70] sm:$0xff] %v360_v14 }
  0x1f   : > { %363 = vst [vmem:[%s1668_s19 + $0x78] sm:$0xff] %v362_v15 }
  0x20   : > { %365 = vst [vmem:[%s1668_s19 + $0x80] sm:$0xff] %v364_v16 }
  0x21   : > { %367 = vst [vmem:[%s1668_s19 + $0x88] sm:$0xff] %v366_v17 }
  0x22   : > { %369 = vst [vmem:[%s1668_s19 + $0x90] sm:$0xff] %v368_v18 }
  0x23   : > { %371 = vst [vmem:[%s1668_s19 + $0x98] sm:$0xff] %v370_v19 }
  0x24   : > { %373 = vst [vmem:[%s1668_s19 + $0xa0] sm:$0xff] %v372_v20 }
  0x25   : > { %375 = vst [vmem:[%s1668_s19 + $0xa8] sm:$0xff] %v374_v21 }
  0x26   : > { %377 = vst [vmem:[%s1668_s19 + $0xb0] sm:$0xff] %v376_v22 }
  0x27   : > { %379 = vst [vmem:[%s1668_s19 + $0xb8] sm:$0xff] %v378_v23 }
  0x28 PF: > { %p1370_p5 = scmp.ge.s32.totalorder %s1576_s29, 1  ;;  %p384_p6 = scmp.lt.s32.totalorder %s1576_s29, 3 }
  0x2a   : > { %p385_p7 = pnand %p1370_p5, %p384_p6 }
  0x2b   : > { %s391_s20 = sand.u32 (!%p385_p7), 1, %s1568_s27   ;;  %p1371_p8 = scmp.ne.s32.totalorder (!%p385_p7), %s1365_s30, 0 }
  0x2c   : > { %388 = sbr.rel (%p385_p7) target bundleno = 4260 (0x10a4), region = 86 }
  0x2d   : > { %s1466_s21 = smul.u32 (!%p385_p7), 192, %s391_s20 }
  0x2f   : > { %s1718_s22 = scalar_lea.vmem (!%p385_p7), [#allocation3], %s1466_s21 }
  0x31   : > { %424 = sbr.rel (%p1371_p8) target bundleno = 56 (0x38), region = 94 }
  0x36   : > { %vm425_vm0 = vcmask 259072   ;;  %v1578_v24 = vmov 0.0  }
  0x37   : > { %426 = vst.msk [vmem:[#allocation2] sm:$0x3f] %vm425_vm0, %v1578_v24 }
  0x38 PF: > { %v1450_v25 = vld [vmem:[%s1935_s1 + $0x8] sm:$0xff]  ;;  %v1449_v26 = vld [vmem:[%s1935_s1] sm:$0xff]  ;;  %v428_v28 = vld [vmem:[%s1718_s22 + $0x8] sm:$0xff]  ;;  %vm555_vm1 = vcmask 261120   ;;  %vm770_vm2 = vcmask 1041409   ;;  %vm772_vm3 = vcmask 1042434  }
  0x39   : > { %v427_v27 = vld [vmem:[%s1718_s22] sm:$0xff]  ;;  %v433_v30 = vld [vmem:[%s1718_s22 + $0x30] sm:$0xff]  ;;  %v434_v31 = vld [vmem:[%s1718_s22 + $0x38] sm:$0xff]  ;;  %598 = vmatpush.bf16.msra.mxu0 %v1450_v25  ;;  %1459 = vmatpush.bf16.msra.mxu1 %v1450_v25  ;;  %v452_v32 = vpack.c.bf16 %v428_v28, %v428_v28  ;;  %vm774_vm4 = vcmask 1043459   ;;  %vm776_vm5 = vcmask 1044484   ;;  %vm778_vm6 = vcmask 1045509  }
  0x3a   : > { %v451_v29 = vpack.c.bf16 %v427_v27, %v427_v27  ;;  %v457_v33 = vpack.c.bf16 %v433_v30, %v433_v30  ;;  %v458_v34 = vpack.c.bf16 %v434_v31, %v434_v31  ;;  %v439_v35 = vld [vmem:[%s1718_s22 + $0x60] sm:$0xff]  ;;  %v440_v36 = vld [vmem:[%s1718_s22 + $0x68] sm:$0xff]  ;;  %v445_v37 = vld [vmem:[%s1718_s22 + $0x90] sm:$0xff]  ;;  %1460 = vmatpush.bf16.msra.mxu2 %v1450_v25  ;;  %1461 = vmatpush.bf16.msra.mxu3 %v1450_v25  ;;  %vm782_vm7 = vcmask 259072   ;;  %p1392_p9 = scmp.ne.s32.totalorder %s1365_s30, 1 }
  0x3b   : > { %v463_v39 = vpack.c.bf16 %v439_v35, %v439_v35  ;;  %v464_v40 = vpack.c.bf16 %v440_v36, %v440_v36  ;;  %v446_v41 = vld [vmem:[%s1718_s22 + $0x98] sm:$0xff]  ;;  %v469_v42 = vpack.c.bf16 %v445_v37, %v445_v37  ;;  %v508_v43 = vunpack.c.l.b16 %v452_v32  ;;  %v429_v55 = vld [vmem:[%s1718_s22 + $0x10] sm:$0xff]  ;;  %v435_v57 = vld [vmem:[%s1718_s22 + $0x40] sm:$0xff]  ;;  %s1580_s20 = smov (!%p1392_p9), 64   ;;  %s1581_s21 = smov (!%p1392_p9), 32  }
  0x3c   : > { %v507_v38 = vunpack.c.l.b16 %v451_v29  ;;  %v513_v44 = vunpack.c.l.b16 %v457_v33  ;;  %v514_v45 = vunpack.c.l.b16 %v458_v34  ;;  %v470_v46 = vpack.c.bf16 %v446_v41, %v446_v41  ;;  %v430_v56 = vld [vmem:[%s1718_s22 + $0x18] sm:$0xff]  ;;  %v436_v58 = vld [vmem:[%s1718_s22 + $0x48] sm:$0xff]  ;;  %v441_v59 = vld [vmem:[%s1718_s22 + $0x70] sm:$0xff]  ;;  %s1582_s15 = smov (!%p1392_p9), 96  }
  0x3d   : > { %v519_v47 = vunpack.c.l.b16 %v463_v39  ;;  %v520_v48 = vunpack.c.l.b16 %v464_v40  ;;  %v525_v49 = vunpack.c.l.b16 %v469_v42  ;;  %599 = vmatpush.bf16.msra.mxu0 %v1449_v26  ;;  %1462 = vmatpush.bf16.msra.mxu1 %v1449_v26  ;;  %v442_v60 = vld [vmem:[%s1718_s22 + $0x78] sm:$0xff]  ;;  %v447_v61 = vld [vmem:[%s1718_s22 + $0xa0] sm:$0xff]  ;;  %v448_v62 = vld [vmem:[%s1718_s22 + $0xa8] sm:$0xff]  ;;  %v453_v63 = vpack.c.bf16 %v429_v55, %v429_v55 }
  0x3e   : > { %v531_v50 = vpack.c.b16 %v508_v43, %v507_v38  ;;  %v534_v51 = vpack.c.b16 %v514_v45, %v513_v44  ;;  %v526_v52 = vunpack.c.l.b16 %v470_v46  ;;  %1463 = vmatpush.bf16.msra.mxu2 %v1449_v26  ;;  %1464 = vmatpush.bf16.msra.mxu3 %v1449_v26  ;;  %v454_v0 = vpack.c.bf16 %v430_v56, %v430_v56  ;;  %v431_v19 = vld [vmem:[%s1718_s22 + $0x20] sm:$0xff]  ;;  %v432_v20 = vld [vmem:[%s1718_s22 + $0x28] sm:$0xff]  ;;  %v437_v21 = vld [vmem:[%s1718_s22 + $0x50] sm:$0xff] }
  0x3f   : > { %v537_v53 = vpack.c.b16 %v520_v48, %v519_v47  ;;  %v459_v1 = vpack.c.bf16 %v435_v57, %v435_v57  ;;  %v460_v2 = vpack.c.bf16 %v436_v58, %v436_v58  ;;  %v465_v3 = vpack.c.bf16 %v441_v59, %v441_v59  ;;  %v438_v22 = vld [vmem:[%s1718_s22 + $0x58] sm:$0xff]  ;;  %v443_v23 = vld [vmem:[%s1718_s22 + $0x80] sm:$0xff]  ;;  %v444_v24 = vld [vmem:[%s1718_s22 + $0x88] sm:$0xff] }
  0x40   : > { %v540_v54 = vpack.c.b16 %v526_v52, %v525_v49  ;;  %1380 = vmatmul.msk.bf16.vlgmr.msra.gmra.mxu0 %vm555_vm1, %v531_v50  ;;  %1383 = vmatmul.msk.bf16.vlgmr.msra.gmra.mxu1 %vm555_vm1, %v534_v51  ;;  %v466_v4 = vpack.c.bf16 %v442_v60, %v442_v60  ;;  %v471_v5 = vpack.c.bf16 %v447_v61, %v447_v61  ;;  %v509_v7 = vunpack.c.l.b16 %v453_v63  ;;  %v449_v25 = vld [vmem:[%s1718_s22 + $0xb0] sm:$0xff]  ;;  %v450_v26 = vld [vmem:[%s1718_s22 + $0xb8] sm:$0xff] }
  0x41   : > { %1386 = vmatmul.msk.bf16.vlgmr.msra.gmra.mxu2 %vm555_vm1, %v537_v53  ;;  %v472_v6 = vpack.c.bf16 %v448_v62, %v448_v62  ;;  %v510_v8 = vunpack.c.l.b16 %v454_v0  ;;  %v515_v9 = vunpack.c.l.b16 %v459_v1  ;;  %v516_v10 = vunpack.c.l.b16 %v460_v2  ;;  %v1771_v57 = vld [vmem:[%s1936_s2] ss:$0 sm:$0xff] }
  0x42   : > { %1389 = vmatmul.msk.bf16.vlgmr.msra.gmra.mxu3 %vm555_vm1, %v540_v54  ;;  %v521_v11 = vunpack.c.l.b16 %v465_v3  ;;  %v522_v12 = vunpack.c.l.b16 %v466_v4  ;;  %v527_v13 = vunpack.c.l.b16 %v471_v5  ;;  %v455_v27 = vpack.c.bf16 %v431_v19, %v431_v19 }
  0x43   : > { %v528_v14 = vunpack.c.l.b16 %v472_v6  ;;  %v532_v15 = vpack.c.b16 %v510_v8, %v509_v7  ;;  %v535_v16 = vpack.c.b16 %v516_v10, %v515_v9  ;;  %v456_v28 = vpack.c.bf16 %v432_v20, %v432_v20 }
  0x44   : > { %v538_v17 = vpack.c.b16 %v522_v12, %v521_v11  ;;  %v461_v29 = vpack.c.bf16 %v437_v21, %v437_v21  ;;  %v462_v30 = vpack.c.bf16 %v438_v22, %v438_v22  ;;  %v467_v31 = vpack.c.bf16 %v443_v23, %v443_v23 }
  0x45   : > { %v541_v18 = vpack.c.b16 %v528_v14, %v527_v13  ;;  %v468_v32 = vpack.c.bf16 %v444_v24, %v444_v24  ;;  %v473_v33 = vpack.c.bf16 %v449_v25, %v449_v25  ;;  %v474_v34 = vpack.c.bf16 %v450_v26, %v450_v26 }
  0x46   : > { %v511_v35 = vunpack.c.l.b16 %v455_v27  ;;  %v512_v36 = vunpack.c.l.b16 %v456_v28  ;;  %v517_v37 = vunpack.c.l.b16 %v461_v29  ;;  %v518_v38 = vunpack.c.l.b16 %v462_v30 }
  0x47   : > { %v523_v39 = vunpack.c.l.b16 %v467_v31  ;;  %v524_v40 = vunpack.c.l.b16 %v468_v32  ;;  %v529_v41 = vunpack.c.l.b16 %v473_v33  ;;  %v530_v42 = vunpack.c.l.b16 %v474_v34 }
  0x48   : > { %v533_v43 = vpack.c.b16 %v512_v36, %v511_v35  ;;  %v536_v44 = vpack.c.b16 %v518_v38, %v517_v37 }
  0x49   : > { %v539_v45 = vpack.c.b16 %v524_v40, %v523_v39  ;;  %v542_v46 = vpack.c.b16 %v530_v42, %v529_v41 }
  0x50   : > { %1381 = vmatmul.msk.bf16.gmra.mxu0 %vm555_vm1, %v532_v15  ;;  %1384 = vmatmul.msk.bf16.gmra.mxu1 %vm555_vm1, %v535_v16 }
  0x51   : > { %1387 = vmatmul.msk.bf16.gmra.mxu2 %vm555_vm1, %v538_v17 }
  0x52   : > { %1390 = vmatmul.msk.bf16.gmra.mxu3 %vm555_vm1, %v541_v18 }
  0x60   : > { %1382 = vmatmul.msk.bf16.gmra.mxu0 %vm555_vm1, %v533_v43  ;;  %1385 = vmatmul.msk.bf16.gmra.mxu1 %vm555_vm1, %v536_v44 }
  0x61   : > { %1388 = vmatmul.msk.bf16.gmra.mxu2 %vm555_vm1, %v539_v45 }
  0x62   : > { %1391 = vmatmul.msk.bf16.gmra.mxu3 %vm555_vm1, %v542_v46 }
  0xbd   : > { %v601_v47 = vpop.f32.mrf.mxu0  ;;  %v616_v48 = vpop.f32.mrf.mxu1 }
  0xbe   : > { %v602_v59 = vadd.f32 %v1771_v57, %v601_v47  ;;  %v617_v25 = vadd.f32 %v1771_v57, %v616_v48 }
  0xc0   : > { %v661_v3 = vmax.f32 %v602_v59, 0.0  ;;  %v667_v39 = vmax.f32 %v617_v25, 0.0 }
  0xc2   : > { %v686_v10 = vsel %vm555_vm1, %v661_v3, 0.0 }
  0xc4   : > { %v631_v49 = vpop.f32.mrf.mxu2 }
  0xc5   : > { %v1764_v50 = vpop.f32.mrf.mxu3  ;;  %v603_v51 = vpop.f32.mrf.mxu0  ;;  %v632_v6 = vadd.f32 %v1771_v57, %v631_v49 }
  0xc6   : > { %v618_v52 = vpop.f32.mrf.mxu1  ;;  %v604_v58 = vadd.f32 %v1771_v57, %v603_v51  ;;  %v647_v3 = vadd.f32 %v1771_v57, %v1764_v50 }
  0xc7   : > { %v673_v21 = vmax.f32 %v632_v6, 0.0  ;;  %v619_v45 = vadd.f32 %v1771_v57, %v618_v52 }
  0xc8   : > { %v662_v1 = vmax.f32 %v604_v58, 0.0 }
  0xc9   : > { %v725_v32 = vsel %vm555_vm1, %v673_v21, 0.0 }
  0xca   : > { %v687_v7 = vsel %vm555_vm1, %v662_v1, 0.0 }
  0xcb   : > { %v688_v17 = vadd.f32 %v687_v7, %v686_v10 }
  0xcc   : > { %v633_v53 = vpop.f32.mrf.mxu2 }
  0xcd   : > { %v1766_v54 = vpop.f32.mrf.mxu3  ;;  %v606_v55 = vpop.f32.mrf.mxu0  ;;  %v634_v4 = vadd.f32 %v1771_v57, %v633_v53 }
  0xce   : > { %v621_v56 = vpop.f32.mrf.mxu1  ;;  %v607_v60 = vadd.f32 %v1771_v57, %v606_v55  ;;  %v649_v10 = vadd.f32 %v1771_v57, %v1766_v54 }
  0xcf   : > { %v674_v11 = vmax.f32 %v634_v4, 0.0  ;;  %v622_v13 = vadd.f32 %v1771_v57, %v621_v56  ;;  %v668_v4 = vmax.f32 %v619_v45, 0.0 }
  0xd0   : > { %v663_v5 = vmax.f32 %v607_v60, 0.0 }
  0xd1   : > { %v726_v27 = vsel %vm555_vm1, %v674_v11, 0.0  ;;  %v669_v28 = vmax.f32 %v622_v13, 0.0  ;;  %v704_v54 = vsel %vm555_vm1, %v668_v4, 0.0 }
  0xd2   : > { %v689_v12 = vsel %vm555_vm1, %v663_v5, 0.0  ;;  %v727_v36 = vadd.f32 %v726_v27, %v725_v32 }
  0xd3   : > { %v690_v26 = vadd.f32 %v689_v12, %v688_v17  ;;  %v712_v40 = vsel %vm555_vm1, %v669_v28, 0.0 }
  0xd4   : > { %v636_v61 = vpop.f32.mrf.mxu2 }
  0xd5   : > { %v651_v62 = vpop.f32.mrf.mxu3  ;;  %v608_v63 = vpop.f32.mrf.mxu0  ;;  %v637_v8 = vadd.f32 %v1771_v57, %v636_v61 }
  0xd6   : > { %v623_v0 = vpop.f32.mrf.mxu1  ;;  %v609_v2 = vadd.f32 %v1771_v57, %v608_v63  ;;  %v652_v37 = vadd.f32 %v1771_v57, %v651_v62 }
  0xd7   : > { %v624_v14 = vadd.f32 %v1771_v57, %v623_v0  ;;  %v675_v22 = vmax.f32 %v637_v8, 0.0 }
  0xd8   : > { %v664_v9 = vmax.f32 %v609_v2, 0.0  ;;  %v681_v59 = vmax.f32 %v652_v37, 0.0  ;;  %v702_v2 = vsel %vm555_vm1, %v667_v39, 0.0 }
  0xd9   : > { %v670_v29 = vmax.f32 %v624_v14, 0.0  ;;  %v728_v33 = vsel %vm555_vm1, %v675_v22, 0.0 }
  0xda   : > { %v691_v23 = vsel %vm555_vm1, %v664_v9, 0.0  ;;  %v729_v46 = vadd.f32 %v728_v33, %v727_v36  ;;  %v751_v14 = vsel %vm555_vm1, %v681_v59, 0.0 }
  0xdb   : > { %v692_v31 = vadd.f32 %v691_v23, %v690_v26  ;;  %v713_v41 = vsel %vm555_vm1, %v670_v29, 0.0  ;;  %v679_v23 = vmax.f32 %v647_v3, 0.0 }
  0xdc   : > { %v638_v15 = vpop.f32.mrf.mxu2  ;;  %v714_v60 = vadd.f32 %v713_v41, %v712_v40 }
  0xdd   : > { %v653_v16 = vpop.f32.mrf.mxu3  ;;  %v639_v18 = vadd.f32 %v1771_v57, %v638_v15  ;;  %v611_v19 = vpop.f32.mrf.mxu0  ;;  %v693_v47 = vrot.slane %v692_v31, 4  ;;  %v741_v39 = vsel %vm555_vm1, %v679_v23, 0.0 }
  0xde   : > { %v626_v20 = vpop.f32.mrf.mxu1  ;;  %v612_v34 = vadd.f32 %v1771_v57, %v611_v19  ;;  %v654_v38 = vadd.f32 %v1771_v57, %v653_v16 }
  0xdf   : > { %v627_v24 = vadd.f32 %v1771_v57, %v626_v20  ;;  %v676_v30 = vmax.f32 %v639_v18, 0.0  ;;  %v694_v6 = vadd.f32 %v693_v47, %v692_v31 }
  0xe0   : > { %v665_v53 = vmax.f32 %v612_v34, 0.0  ;;  %v682_v62 = vmax.f32 %v654_v38, 0.0 }
  0xe1   : > { %v671_v35 = vmax.f32 %v627_v24, 0.0  ;;  %v730_v42 = vsel %vm555_vm1, %v676_v30, 0.0  ;;  %v695_v24 = vrot.slane %v694_v6, 2  ;;  %v680_v30 = vmax.f32 %v649_v10, 0.0 }
  0xe2   : > { %v731_v61 = vadd.f32 %v730_v42, %v729_v46  ;;  %v699_v7 = vsel %vm555_vm1, %v665_v53, 0.0  ;;  %v752_v11 = vsel %vm555_vm1, %v682_v62, 0.0 }
  0xe3   : > { %v715_v55 = vsel %vm555_vm1, %v671_v35, 0.0  ;;  %v753_v25 = vadd.f32 %v752_v11, %v751_v14  ;;  %v696_v40 = vadd.f32 %v695_v24, %v694_v6  ;;  %v685_v11 = vld [vmem:[#allocation2] sm:$0x3f] }
  0xe4   : > { %v641_v43 = vpop.f32.mrf.mxu2  ;;  %v716_v5 = vadd.f32 %v715_v55, %v714_v60  ;;  %v732_v15 = vrot.slane %v731_v61, 4 }
  0xe5   : > { %v656_v44 = vpop.f32.mrf.mxu3  ;;  %v613_v49 = vpop.f32.mrf.mxu0  ;;  %v642_v63 = vadd.f32 %v1771_v57, %v641_v43 }
  0xe6   : > { %v657_v48 = vadd.f32 %v1771_v57, %v656_v44  ;;  %v628_v51 = vpop.f32.mrf.mxu1  ;;  %v614_v56 = vadd.f32 %v1771_v57, %v613_v49  ;;  %v733_v31 = vadd.f32 %v732_v15, %v731_v61  ;;  %v743_v44 = vsel %vm555_vm1, %v680_v30, 0.0 }
  0xe7   : > { %v629_v58 = vadd.f32 %v1771_v57, %v628_v51  ;;  %v677_v50 = vmax.f32 %v642_v63, 0.0  ;;  %v697_v51 = vrot.slane %v696_v40, 1 }
  0xe8   : > { %v683_v52 = vmax.f32 %v657_v48, 0.0  ;;  %v666_v0 = vmax.f32 %v614_v56, 0.0  ;;  %v734_v45 = vrot.slane %v733_v31, 2 }
  0xe9   : > { %v672_v1 = vmax.f32 %v629_v58, 0.0  ;;  %v738_v33 = vsel %vm555_vm1, %v677_v50, 0.0  ;;  %v698_v62 = vadd.f32 %v697_v51, %v696_v40 }
  0xea   : > { %v700_v8 = vsel %vm555_vm1, %v666_v0, 0.0  ;;  %v754_v16 = vsel %vm555_vm1, %v683_v52, 0.0  ;;  %v735_v58 = vadd.f32 %v734_v45, %v733_v31 }
  0xeb   : > { %v717_v9 = vsel %vm555_vm1, %v672_v1, 0.0  ;;  %v701_v12 = vadd.f32 %v700_v8, %v699_v7  ;;  %v755_v32 = vadd.f32 %v754_v16, %v753_v25 }
  0xec   : > { %v718_v13 = vadd.f32 %v717_v9, %v716_v5  ;;  %v643_v17 = vpop.f32.mrf.mxu2  ;;  %v736_v1 = vrot.slane %v735_v58, 1 }
  0xed   : > { %v658_v18 = vpop.f32.mrf.mxu3  ;;  %v703_v19 = vadd.f32 %v702_v2, %v701_v12  ;;  %v644_v21 = vadd.f32 %v1771_v57, %v643_v17 }
  0xee   : > { %v719_v20 = vrot.slane %v718_v13, 4  ;;  %v659_v22 = vadd.f32 %v1771_v57, %v658_v18  ;;  %v737_v8 = vadd.f32 %v736_v1, %v735_v58 }
  0xef   : > { %v705_v26 = vadd.f32 %v704_v54, %v703_v19  ;;  %v678_v28 = vmax.f32 %v644_v21, 0.0 }
  0xf0   : > { %v720_v27 = vadd.f32 %v719_v20, %v718_v13  ;;  %v684_v29 = vmax.f32 %v659_v22, 0.0 }
  0xf1   : > { %v706_v34 = vrot.slane %v705_v26, 4  ;;  %v739_v35 = vsel %vm555_vm1, %v678_v28, 0.0 }
  0xf2   : > { %v756_v36 = vsel %vm555_vm1, %v684_v29, 0.0  ;;  %v721_v57 = vrot.slane %v720_v27, 2  ;;  %v740_v37 = vadd.f32 %v739_v35, %v738_v33 }
  0xf3   : > { %v757_v38 = vadd.f32 %v756_v36, %v755_v32  ;;  %v707_v41 = vadd.f32 %v706_v34, %v705_v26 }
  0xf4   : > { %v742_v42 = vadd.f32 %v741_v39, %v740_v37  ;;  %v722_v47 = vadd.f32 %v721_v57, %v720_v27 }
  0xf5   : > { %v758_v43 = vrot.slane %v757_v38, 4  ;;  %v708_v46 = vrot.slane %v707_v41, 2 }
  0xf6   : > { %v744_v48 = vadd.f32 %v743_v44, %v742_v42  ;;  %v723_v60 = vrot.slane %v722_v47, 1 }
  0xf7   : > { %v759_v49 = vadd.f32 %v758_v43, %v757_v38  ;;  %v709_v53 = vadd.f32 %v708_v46, %v707_v41 }
  0xf8   : > { %v745_v55 = vrot.slane %v744_v48, 4  ;;  %v724_v3 = vadd.f32 %v723_v60, %v722_v47 }
  0xf9   : > { %v760_v56 = vrot.slane %v759_v49, 2  ;;  %v710_v59 = vrot.slane %v709_v53, 1 }
  0xfa   : > { %v746_v61 = vadd.f32 %v745_v55, %v744_v48 }
  0xfb   : > { %v711_v63 = vadd.f32 %v710_v59, %v709_v53  ;;  %v761_v52 = vadd.f32 %v760_v56, %v759_v49 }
  0xfc   : > { %v747_v0 = vrot.slane %v746_v61, 2 }
  0xfd   : > { %v771_v2 = vsel %vm770_vm2, %v711_v63, %v698_v62  ;;  %v762_v5 = vrot.slane %v761_v52, 1 }
  0xfe   : > { %v748_v4 = vadd.f32 %v747_v0, %v746_v61  ;;  %v773_v6 = vsel %vm772_vm3, %v724_v3, %v771_v2 }
  0xff   : > { %v775_v10 = vsel %vm774_vm4, %v737_v8, %v773_v6  ;;  %v763_v12 = vadd.f32 %v762_v5, %v761_v52 }
 0x100   : > { %v749_v7 = vrot.slane %v748_v4, 1 }
 0x102   : > { %v750_v9 = vadd.f32 %v749_v7, %v748_v4 }
 0x104   : > { %v777_v13 = vsel %vm776_vm5, %v750_v9, %v775_v10  ;;  %787 = sbr.rel (%p1392_p9) target bundleno = 4260 (0x10a4), region = 98 }
 0x105   : > { %v779_v14 = vsel %vm778_vm6, %v763_v12, %v777_v13 }
 0x106   : > { %v781_v15 = vadd.f32 %v779_v14, %v685_v11 }
 0x108   : > { %783 = vst.msk [vmem:[#allocation2] sm:$0x3f] %vm782_vm7, %v781_v15 }
 0x109   : > { %v1452_v50 = vld [vmem:[%s1937_s3 + $0x8] sm:$0xff]  ;;  %v1451_v18 = vld [vmem:[%s1937_s3] sm:$0xff]  ;;  %v1579_v22 = vmov 0   ;;  %vm1026_vm5 = vcmask 1041408   ;;  %vm1028_vm6 = vcmask 1043456  }
 0x10a   : > { %v1454_v16 = vld [vmem:[%s1938_s4 + $0x8] sm:$0xff]  ;;  %824 = vmatpush.bf16.msra.mxu0 %v1452_v50  ;;  %v1453_v19 = vld [vmem:[%s1938_s4] sm:$0xff] }
 0x10b   : > { %852 = vmatpush.bf16.msra.mxu1 %v1454_v16  ;;  %910 = vmatpush.bf16.msra.mxu2 %v1454_v16  ;;  %v1498_v23 = vld [vmem:[%s1939_s5] ss:$0 sm:$0xff] }
 0x10c   : > { %975 = vmatpush.bf16.msra.mxu3 %v1454_v16 }
 0x10e   : > { %825 = vmatpush.bf16.msra.mxu0 %v1451_v18 }
 0x10f   : > { %v788_v17 = vld [vmem:[#allocation2] sm:$0x3f]  ;;  %853 = vmatpush.bf16.msra.mxu1 %v1453_v19  ;;  %911 = vmatpush.bf16.msra.mxu2 %v1453_v19 }
 0x110   : > { %v1837_v20 = vmul.f32 0.015625, %v788_v17  ;;  %976 = vmatpush.bf16.msra.mxu3 %v1453_v19 }
 0x112   : > { %v799_v21 = vpack.c.bf16 %v1837_v20, %v1837_v20  ;;  %854 = vmatmul.bf16.vlgmr.msra.gmra.mxu1 %v1579_v22 }
 0x114   : > { %1401 = vmatmul.msk.bf16.vlgmr.msra.gmra.mxu0 %vm555_vm1, %v799_v21 }
 0x18f   : > { %v855_v24 = vpop.f32.mrf.mxu1 }
 0x191   : > { %v827_v54 = vpop.f32.mrf.mxu0 }
 0x192   : > { %v1846_v25 = vadd.f32 %v1498_v23, %v827_v54 }
 0x194   : > { %v859_v26 = vadd.f32 %v855_v24, %v1846_v25 }
 0x196   : > { %1502 = vtanh.f32 %v859_v26  ;;  %v1410_v30 = vmul.f32 -1.442695, %v859_v26 }
 0x197   : > { %v857_v28 = vpop.f32.mrf.mxu1 }
 0x198   : > { %1504 = vpow2.f32 %v1410_v30 }
 0x199   : > { %v829_v27 = vpop.f32.mrf.mxu0 }
 0x19c   : > { %v1503_v29 = vpop.eup %1502 }
 0x19d   : > { %882 = vrot.lane.b32.xlu0 %v1503_v29, %s1580_s20 }
 0x19e   : > { %v1505_v31 = vpop.eup %1504 }
 0x19f   : > { %v863_v32 = vadd.f32 1.0, %v1505_v31 }
 0x1a1   : > { %1506 = vrcp.f32 %v863_v32  ;;  %v875_v37 = vand.u32 2147483648, %v863_v32  ;;  %vm869_vm9 = vweird.f32 %v863_v32  ;;  %v873_v38 = vand.u32 2147483647, %v863_v32 }
 0x1a3   : > { %v876_v40 = vor.u32 1.1754944e-38, %v875_v37  ;;  %vm874_vm11 = vcmp.eq.f32.partialorder %v873_v38, 8.507059e+37 }
 0x1a7   : > { %v1507_v33 = vpop.eup %1506 }
 0x1a8   : > { %v865_v34 = vmul.f32 %v1507_v33, %v863_v32  ;;  %vm870_vm8 = vweird.f32 %v1507_v33 }
 0x1a9   : > { %vm871_vm10 = vmor %vm869_vm9, %vm870_vm8 }
 0x1aa   : > { %v866_v35 = vsub.f32 1.0, %v865_v34 }
 0x1ac   : > { %v867_v36 = vmul.f32 %v1507_v33, %v866_v35 }
 0x1ae   : > { %v868_v57 = vadd.f32 %v1507_v33, %v867_v36 }
 0x1b0   : > { %v872_v39 = vsel %vm871_vm10, %v1507_v33, %v868_v57 }
 0x1b1   : > { %v877_v42 = vsel %vm874_vm11, %v876_v40, %v872_v39 }
 0x1b2   : > { %v880_v44 = vmul.f32 0.0, %v877_v42 }
 0x20f   : > { %v883_v41 = vpop.permute.xlu0 %882 }
 0x210   : > { %v885_v43 = vmul.f32 %v883_v41, %v877_v42 }
 0x212   : > { %887 = vrot.lane.b32.xlu0 %v885_v43, %s1581_s21 }
 0x284   : > { %v888_v45 = vpop.permute.xlu0 %887 }
 0x285   : > { %v890_v46 = vadd.f32 %v888_v45, %v880_v44  ;;  %v1456_v45 = vld [vmem:[%s1937_s3 + $0x18] sm:$0xff] }
 0x286   : > { %1070 = vmatpush.bf16.msrb.mxu0 %v1456_v45 }
 0x287   : > { %1508 = vtanh.f32 %v890_v46  ;;  %v942_v11 = vrot.slane %v890_v46, 6  ;;  %v1458_v46 = vld [vmem:[%s1938_s4 + $0x18] sm:$0xff] }
 0x288   : > { %1095 = vmatpush.bf16.msrb.mxu1 %v1458_v46  ;;  %1153 = vmatpush.bf16.msrb.mxu2 %v1458_v46 }
 0x289   : > { %1218 = vmatpush.bf16.msrb.mxu3 %v1458_v46 }
 0x28d   : > { %v1509_v47 = vpop.eup %1508 }
 0x28e   : > { %893 = vrot.lane.b32.xlu1 %v1509_v47, %s1580_s20  ;;  %v1457_v47 = vld [vmem:[%s1938_s4 + $0x10] sm:$0xff] }
 0x28f   : > { %1096 = vmatpush.bf16.msrb.mxu1 %v1457_v47  ;;  %1154 = vmatpush.bf16.msrb.mxu2 %v1457_v47 }
 0x290   : > { %1219 = vmatpush.bf16.msrb.mxu3 %v1457_v47 }
 0x292   : > { %1097 = vmatmul.bf16.vlgmr.msrb.gmra.mxu1 %v1579_v22 }
 0x300   : > { %v894_v48 = vpop.permute.xlu1 %893 }
 0x301   : > { %v1852_v49 = vmul.f32 %v894_v48, %v877_v42  ;;  %v1455_v48 = vld [vmem:[%s1937_s3 + $0x10] sm:$0xff] }
 0x302   : > { %1071 = vmatpush.bf16.msrb.mxu0 %v1455_v48 }
 0x303   : > { %v897_v51 = vpack.c.bf16 %v1852_v49, %v1852_v49 }
 0x305   : > { %899 = vrot.lane.b32.xlu1 %v897_v51, %s1581_s21 }
 0x377   : > { %v900_v53 = vpop.permute.xlu1 %899 }
 0x378   : > { %1411 = vmatmul.msk.bf16.vlgmr.msra.gmra.mxu2 %vm555_vm1, %v900_v53 }
 0x3fb   : > { %v913_v55 = vpop.f32.mrf.mxu2 }
 0x3fc   : > { %v918_v56 = vrot.slane %v913_v55, 6 }
 0x3fe   : > { %v920_v58 = vadd.f32 %v918_v56, %v1846_v25 }
 0x400   : > { %1510 = vtanh.f32 %v920_v58  ;;  %v1412_v61 = vmul.f32 -1.442695, %v920_v58 }
 0x402   : > { %1512 = vpow2.f32 %v1412_v61 }
 0x403   : > { %v915_v59 = vpop.f32.mrf.mxu2 }
 0x406   : > { %v1511_v60 = vpop.eup %1510 }
 0x407   : > { %946 = vrot.lane.b32.xlu2 %v1511_v60, %s1580_s20  ;;  %v1098_v60 = vpop.f32.mrf.mxu1 }
 0x408   : > { %v1513_v62 = vpop.eup %1512 }
 0x409   : > { %v924_v63 = vadd.f32 1.0, %v1513_v62  ;;  %v1499_v62 = vld [vmem:[%s1939_s5 + $0x1] ss:$0 sm:$0xff] }
 0x40b   : > { %1514 = vrcp.f32 %v924_v63  ;;  %v936_v4 = vand.u32 2147483648, %v924_v63  ;;  %vm930_vm13 = vweird.f32 %v924_v63  ;;  %v934_v5 = vand.u32 2147483647, %v924_v63 }
 0x40d   : > { %v937_v7 = vor.u32 1.1754944e-38, %v936_v4  ;;  %vm935_vm15 = vcmp.eq.f32.partialorder %v934_v5, 8.507059e+37 }
 0x40f   : > { %v1100_v61 = vpop.f32.mrf.mxu1 }
 0x411   : > { %v1515_v52 = vpop.eup %1514 }
 0x412   : > { %v926_v0 = vmul.f32 %v1515_v52, %v924_v63  ;;  %vm931_vm12 = vweird.f32 %v1515_v52 }
 0x413   : > { %vm932_vm14 = vmor %vm930_vm13, %vm931_vm12 }
 0x414   : > { %v927_v1 = vsub.f32 1.0, %v926_v0 }
 0x416   : > { %v928_v2 = vmul.f32 %v1515_v52, %v927_v1 }
 0x418   : > { %v929_v3 = vadd.f32 %v1515_v52, %v928_v2 }
 0x41a   : > { %v933_v6 = vsel %vm932_vm14, %v1515_v52, %v929_v3 }
 0x41b   : > { %v938_v9 = vsel %vm935_vm15, %v937_v7, %v933_v6 }
 0x41c   : > { %v944_v12 = vmul.f32 %v942_v11, %v938_v9 }
 0x461   : > { %v947_v8 = vpop.permute.xlu2 %946 }
 0x462   : > { %v949_v10 = vmul.f32 %v947_v8, %v938_v9 }
 0x464   : > { %951 = vrot.lane.b32.xlu2 %v949_v10, %s1581_s21 }
 0x4be   : > { %v952_v13 = vpop.permute.xlu2 %951 }
 0x4bf   : > { %v954_v14 = vadd.f32 %v952_v13, %v944_v12 }
 0x4c1   : > { %1516 = vtanh.f32 %v954_v14  ;;  %v1007_v40 = vrot.slane %v954_v14, 6 }
 0x4c7   : > { %v1517_v15 = vpop.eup %1516 }
 0x4c8   : > { %957 = vrot.lane.b32.xlu0 %v1517_v15, %s1580_s20 }
 0x53a   : > { %v958_v50 = vpop.permute.xlu0 %957 }
 0x53b   : > { %v960_v16 = vmul.f32 %v958_v50, %v938_v9 }
 0x53d   : > { %v961_v17 = vpack.c.bf16 %v960_v16, %v960_v16  ;;  %v1027_v55 = vsel %vm1026_vm5, %v1852_v49, %v960_v16 }
 0x53f   : > { %v963_v18 = vrot.slane %v961_v17, 1 }
 0x541   : > { %964 = vrot.lane.b32.xlu1 %v963_v18, %s1581_s21 }
 0x5b3   : > { %v965_v19 = vpop.permute.xlu1 %964 }
 0x5b4   : > { %1413 = vmatmul.msk.bf16.vlgmr.msra.gmra.mxu3 %vm555_vm1, %v965_v19 }
 0x637   : > { %v978_v21 = vpop.f32.mrf.mxu3 }
 0x638   : > { %v983_v23 = vrot.slane %v978_v21, 4 }
 0x63a   : > { %v985_v54 = vadd.f32 %v983_v23, %v1846_v25 }
 0x63c   : > { %1518 = vtanh.f32 %v985_v54  ;;  %v1414_v27 = vmul.f32 -1.442695, %v985_v54 }
 0x63e   : > { %1520 = vpow2.f32 %v1414_v27 }
 0x63f   : > { %v980_v24 = vpop.f32.mrf.mxu3 }
 0x642   : > { %v1519_v26 = vpop.eup %1518 }
 0x643   : > { %1011 = vrot.lane.b32.xlu2 %v1519_v26, %s1580_s20 }
 0x644   : > { %v1521_v28 = vpop.eup %1520 }
 0x645   : > { %v989_v29 = vadd.f32 1.0, %v1521_v28 }
 0x647   : > { %1522 = vrcp.f32 %v989_v29  ;;  %v1001_v35 = vand.u32 2147483648, %v989_v29  ;;  %vm995_vm2 = vweird.f32 %v989_v29  ;;  %v999_v36 = vand.u32 2147483647, %v989_v29 }
 0x649   : > { %v1002_v57 = vor.u32 1.1754944e-38, %v1001_v35  ;;  %vm1000_vm4 = vcmp.eq.f32.partialorder %v999_v36, 8.507059e+37 }
 0x64d   : > { %v1523_v30 = vpop.eup %1522 }
 0x64e   : > { %v991_v31 = vmul.f32 %v1523_v30, %v989_v29  ;;  %vm996_vm0 = vweird.f32 %v1523_v30 }
 0x64f   : > { %vm997_vm3 = vmor %vm995_vm2, %vm996_vm0 }
 0x650   : > { %v992_v32 = vsub.f32 1.0, %v991_v31 }
 0x652   : > { %v993_v33 = vmul.f32 %v1523_v30, %v992_v32 }
 0x654   : > { %v994_v34 = vadd.f32 %v1523_v30, %v993_v33 }
 0x656   : > { %v998_v25 = vsel %vm997_vm3, %v1523_v30, %v994_v34  ;;  %vm1280_vm3 = vcmask 259076  }
 0x657   : > { %v1003_v38 = vsel %vm1000_vm4, %v1002_v57, %v998_v25 }
 0x658   : > { %v1009_v41 = vmul.f32 %v1007_v40, %v1003_v38 }
 0x69d   : > { %v1012_v37 = vpop.permute.xlu2 %1011 }
 0x69e   : > { %v1014_v39 = vmul.f32 %v1012_v37, %v1003_v38 }
 0x6a0   : > { %1016 = vrot.lane.b32.xlu0 %v1014_v39, %s1581_s21 }
 0x712   : > { %v1017_v42 = vpop.permute.xlu0 %1016 }
 0x713   : > { %v1019_v43 = vadd.f32 %v1017_v42, %v1009_v41 }
 0x715   : > { %1524 = vtanh.f32 %v1019_v43 }
 0x71b   : > { %v1525_v44 = vpop.eup %1524 }
 0x71c   : > { %1022 = vrot.lane.b32.xlu1 %v1525_v44, %s1580_s20 }
 0x78e   : > { %v1023_v51 = vpop.permute.xlu1 %1022 }
 0x78f   : > { %v1025_v53 = vmul.f32 %v1023_v51, %v1003_v38 }
 0x791   : > { %v1029_v56 = vsel %vm1028_vm6, %v1027_v55, %v1025_v53 }
 0x792   : > { %v1042_v58 = vpack.c.bf16 %v1029_v56, %v1029_v56 }
 0x794   : > { %1047 = vrot.lane.b32.xlu2 %v1042_v58, %s1581_s21 }
 0x7ee   : > { %v1048_v59 = vpop.permute.xlu2 %1047 }
 0x7ef   : > { %1432 = vmatmul.msk.bf16.vlgmr.msrb.gmra.mxu0 %vm555_vm1, %v1048_v59 }
 0x86c   : > { %v1073_v22 = vpop.f32.mrf.mxu0 }
 0x86d   : > { %v1887_v63 = vadd.f32 %v1499_v62, %v1073_v22 }
 0x86f   : > { %v1102_v52 = vadd.f32 %v1098_v60, %v1887_v63 }
 0x871   : > { %1526 = vtanh.f32 %v1102_v52  ;;  %v1441_v1 = vmul.f32 -1.442695, %v1102_v52 }
 0x873   : > { %1528 = vpow2.f32 %v1441_v1 }
 0x874   : > { %v1075_v49 = vpop.f32.mrf.mxu0 }
 0x877   : > { %v1527_v0 = vpop.eup %1526 }
 0x878   : > { %1125 = vrot.lane.b32.xlu0 %v1527_v0, %s1580_s20 }
 0x879   : > { %v1529_v2 = vpop.eup %1528 }
 0x87a   : > { %v1106_v3 = vadd.f32 1.0, %v1529_v2 }
 0x87c   : > { %1530 = vrcp.f32 %v1106_v3  ;;  %v1118_v9 = vand.u32 2147483648, %v1106_v3  ;;  %vm1112_vm8 = vweird.f32 %v1106_v3  ;;  %v1116_v10 = vand.u32 2147483647, %v1106_v3 }
 0x87e   : > { %v1119_v12 = vor.u32 1.1754944e-38, %v1118_v9  ;;  %vm1117_vm10 = vcmp.eq.f32.partialorder %v1116_v10, 8.507059e+37 }
 0x882   : > { %v1531_v4 = vpop.eup %1530 }
 0x883   : > { %v1108_v5 = vmul.f32 %v1531_v4, %v1106_v3  ;;  %vm1113_vm7 = vweird.f32 %v1531_v4 }
 0x884   : > { %vm1114_vm9 = vmor %vm1112_vm8, %vm1113_vm7 }
 0x885   : > { %v1109_v6 = vsub.f32 1.0, %v1108_v5 }
 0x887   : > { %v1110_v7 = vmul.f32 %v1531_v4, %v1109_v6 }
 0x889   : > { %v1111_v8 = vadd.f32 %v1531_v4, %v1110_v7 }
 0x88b   : > { %v1115_v11 = vsel %vm1114_vm9, %v1531_v4, %v1111_v8 }
 0x88c   : > { %v1120_v14 = vsel %vm1117_vm10, %v1119_v12, %v1115_v11 }
 0x88d   : > { %v1123_v50 = vmul.f32 0.0, %v1120_v14 }
 0x8ea   : > { %v1126_v13 = vpop.permute.xlu0 %1125 }
 0x8eb   : > { %v1128_v15 = vmul.f32 %v1126_v13, %v1120_v14 }
 0x8ed   : > { %1130 = vrot.lane.b32.xlu1 %v1128_v15, %s1581_s21 }
 0x95f   : > { %v1131_v16 = vpop.permute.xlu1 %1130 }
 0x960   : > { %v1133_v17 = vadd.f32 %v1131_v16, %v1123_v50 }
 0x962   : > { %1532 = vtanh.f32 %v1133_v17  ;;  %v1185_v43 = vrot.slane %v1133_v17, 6 }
 0x968   : > { %v1533_v18 = vpop.eup %1532 }
 0x969   : > { %1136 = vrot.lane.b32.xlu2 %v1533_v18, %s1580_s20 }
 0x9c3   : > { %v1137_v19 = vpop.permute.xlu2 %1136 }
 0x9c4   : > { %v1139_v21 = vmul.f32 %v1137_v19, %v1120_v14 }
 0x9c6   : > { %v1140_v23 = vpack.c.bf16 %v1139_v21, %v1139_v21  ;;  %v1583_v21 = vmov 32.0  }
 0x9c8   : > { %1142 = vrot.lane.b32.xlu0 %v1140_v23, %s1581_s21 }
 0xa3a   : > { %v1143_v54 = vpop.permute.xlu0 %1142 }
 0xa3b   : > { %1442 = vmatmul.msk.bf16.vlgmr.msrb.gmra.mxu2 %vm555_vm1, %v1143_v54 }
 0xabe   : > { %v1156_v24 = vpop.f32.mrf.mxu2 }
 0xabf   : > { %v1161_v26 = vrot.slane %v1156_v24, 6 }
 0xac1   : > { %v1163_v27 = vadd.f32 %v1161_v26, %v1887_v63 }
 0xac3   : > { %1534 = vtanh.f32 %v1163_v27  ;;  %v1443_v30 = vmul.f32 -1.442695, %v1163_v27 }
 0xac5   : > { %1536 = vpow2.f32 %v1443_v30 }
 0xac6   : > { %v1158_v28 = vpop.f32.mrf.mxu2 }
 0xac9   : > { %v1535_v29 = vpop.eup %1534 }
 0xaca   : > { %1189 = vrot.lane.b32.xlu1 %v1535_v29, %s1580_s20 }
 0xacb   : > { %v1537_v31 = vpop.eup %1536 }
 0xacc   : > { %v1167_v32 = vadd.f32 1.0, %v1537_v31 }
 0xace   : > { %1538 = vrcp.f32 %v1167_v32  ;;  %v1179_v57 = vand.u32 2147483648, %v1167_v32  ;;  %vm1173_vm12 = vweird.f32 %v1167_v32  ;;  %v1177_v37 = vand.u32 2147483647, %v1167_v32 }
 0xad0   : > { %v1180_v39 = vor.u32 1.1754944e-38, %v1179_v57  ;;  %vm1178_vm14 = vcmp.eq.f32.partialorder %v1177_v37, 8.507059e+37 }
 0xad4   : > { %v1539_v33 = vpop.eup %1538 }
 0xad5   : > { %v1169_v34 = vmul.f32 %v1539_v33, %v1167_v32  ;;  %vm1174_vm11 = vweird.f32 %v1539_v33 }
 0xad6   : > { %vm1175_vm13 = vmor %vm1173_vm12, %vm1174_vm11 }
 0xad7   : > { %v1170_v35 = vsub.f32 1.0, %v1169_v34  ;;  %v1501_v34 = vld [vmem:[%s1941_s7] ss:$0 sm:$0xff] }
 0xad9   : > { %v1171_v36 = vmul.f32 %v1539_v33, %v1170_v35 }
 0xadb   : > { %v1172_v25 = vadd.f32 %v1539_v33, %v1171_v36 }
 0xadd   : > { %v1176_v38 = vsel %vm1175_vm13, %v1539_v33, %v1172_v25  ;;  %v1500_v33 = vld [vmem:[%s1940_s6] ss:$0 sm:$0xff] }
 0xade   : > { %v1181_v41 = vsel %vm1178_vm14, %v1180_v39, %v1176_v38 }
 0xadf   : > { %v1187_v44 = vmul.f32 %v1185_v43, %v1181_v41 }
 0xb3c   : > { %v1190_v40 = vpop.permute.xlu1 %1189 }
 0xb3d   : > { %v1192_v42 = vmul.f32 %v1190_v40, %v1181_v41 }
 0xb3f   : > { %1194 = vrot.lane.b32.xlu2 %v1192_v42, %s1581_s21 }
 0xb99   : > { %v1195_v45 = vpop.permute.xlu2 %1194 }
 0xb9a   : > { %v1197_v46 = vadd.f32 %v1195_v45, %v1187_v44 }
 0xb9c   : > { %1540 = vtanh.f32 %v1197_v46  ;;  %v1250_v11 = vrot.slane %v1197_v46, 6 }
 0xba2   : > { %v1541_v47 = vpop.eup %1540 }
 0xba3   : > { %1200 = vrot.lane.b32.xlu0 %v1541_v47, %s1580_s20 }
 0xc15   : > { %v1201_v48 = vpop.permute.xlu0 %1200 }
 0xc16   : > { %v1203_v51 = vmul.f32 %v1201_v48, %v1181_v41 }
 0xc18   : > { %v1204_v53 = vpack.c.bf16 %v1203_v51, %v1203_v51 }
 0xc1a   : > { %v1206_v55 = vrot.slane %v1204_v53, 1 }
 0xc1c   : > { %1207 = vrot.lane.b32.xlu1 %v1206_v55, %s1581_s21 }
 0xc8e   : > { %v1208_v56 = vpop.permute.xlu1 %1207 }
 0xc8f   : > { %1444 = vmatmul.msk.bf16.vlgmr.msrb.gmra.mxu3 %vm555_vm1, %v1208_v56 }
 0xd12   : > { %v1221_v58 = vpop.f32.mrf.mxu3 }
 0xd13   : > { %v1226_v59 = vrot.slane %v1221_v58, 4 }
 0xd15   : > { %v1228_v60 = vadd.f32 %v1226_v59, %v1887_v63 }
 0xd17   : > { %1542 = vtanh.f32 %v1228_v60  ;;  %v1445_v22 = vmul.f32 -1.442695, %v1228_v60 }
 0xd19   : > { %1544 = vpow2.f32 %v1445_v22 }
 0xd1a   : > { %v1223_v61 = vpop.f32.mrf.mxu3 }
 0xd1d   : > { %v1543_v62 = vpop.eup %1542 }
 0xd1e   : > { %1254 = vrot.lane.b32.xlu2 %v1543_v62, %s1580_s20 }
 0xd1f   : > { %v1545_v52 = vpop.eup %1544 }
 0xd20   : > { %v1232_v49 = vadd.f32 1.0, %v1545_v52 }
 0xd22   : > { %1546 = vrcp.f32 %v1232_v49  ;;  %v1244_v5 = vand.u32 2147483648, %v1232_v49  ;;  %vm1238_vm15 = vweird.f32 %v1232_v49  ;;  %v1242_v6 = vand.u32 2147483647, %v1232_v49 }
 0xd24   : > { %v1245_v7 = vor.u32 1.1754944e-38, %v1244_v5  ;;  %vm1243_vm2 = vcmp.eq.f32.partialorder %v1242_v6, 8.507059e+37 }
 0xd26   : > { %1270 = vrot.lane.b32.xlu2 %v1837_v20, %s1582_s15 }
 0xd28   : > { %v1547_v0 = vpop.eup %1546 }
 0xd29   : > { %v1234_v1 = vmul.f32 %v1547_v0, %v1232_v49  ;;  %vm1239_vm1 = vweird.f32 %v1547_v0 }
 0xd2a   : > { %vm1240_vm0 = vmor %vm1238_vm15, %vm1239_vm1 }
 0xd2b   : > { %v1235_v2 = vsub.f32 1.0, %v1234_v1 }
 0xd2d   : > { %v1236_v3 = vmul.f32 %v1547_v0, %v1235_v2 }
 0xd2f   : > { %v1237_v4 = vadd.f32 %v1547_v0, %v1236_v3 }
 0xd31   : > { %v1241_v63 = vsel %vm1240_vm0, %v1547_v0, %v1237_v4 }
 0xd32   : > { %v1246_v9 = vsel %vm1243_vm2, %v1245_v7, %v1241_v63 }
 0xd33   : > { %v1252_v12 = vmul.f32 %v1250_v11, %v1246_v9 }
 0xd78   : > { %v1255_v8 = vpop.permute.xlu2 %1254 }
 0xd79   : > { %v1257_v10 = vmul.f32 %v1255_v8, %v1246_v9 }
 0xd7b   : > { %1259 = vrot.lane.b32.xlu0 %v1257_v10, %s1581_s21 }
 0xd80   : > { %v1271_v16 = vpop.permute.xlu2 %1270 }
 0xded   : > { %v1260_v13 = vpop.permute.xlu0 %1259 }
 0xdee   : > { %v1262_v14 = vadd.f32 %v1260_v13, %v1252_v12 }
 0xdf0   : > { %1548 = vtanh.f32 %v1262_v14 }
 0xdf1   : > { %1550 = vrcp.f32 %v1583_v21 }
 0xdf6   : > { %v1549_v15 = vpop.eup %1548 }
 0xdf7   : > { %1265 = vrot.lane.b32.xlu1 %v1549_v15, %s1580_s20  ;;  %v1551_v23 = vpop.eup %1550 }
 0xdf8   : > { %v1285_v54 = vmul.f32 32.0, %v1551_v23  ;;  %vm1289_vm4 = vweird.f32 %v1551_v23 }
 0xdfa   : > { %v1286_v24 = vsub.f32 1.0, %v1285_v54 }
 0xdfc   : > { %v1287_v26 = vmul.f32 %v1551_v23, %v1286_v24 }
 0xdfe   : > { %v1288_v27 = vadd.f32 %v1551_v23, %v1287_v26 }
 0xe00   : > { %v1290_v28 = vsel %vm1289_vm4, %v1551_v23, %v1288_v27 }
 0xe69   : > { %v1266_v50 = vpop.permute.xlu1 %1265 }
 0xe6a   : > { %v1268_v17 = vmul.f32 %v1266_v50, %v1246_v9 }
 0xe6c   : > { %v1273_v18 = vadd.f32 %v1271_v16, %v1268_v17 }
 0xe6e   : > { %1277 = vrot.lane.b32.xlu0 %v1273_v18, %s1581_s21 }
 0xee0   : > { %v1278_v19 = vpop.permute.xlu0 %1277 }
 0xee1   : > { %v1281_v20 = vsel %vm1280_vm3, %v1278_v19, 0.0 }
 0xee2   : > { %1282 = vadd.xlane.f32.xlu1 %v1281_v20 }
 0xf55   : > { %v1283_v29 = vpop.xlane.xlu1 %1282 }
 0xf56   : > { %v1291_v30 = vmul.f32 %v1290_v28, %v1283_v29 }
 0xf58   : > { %v1292_v31 = vsub.f32 %v1273_v18, %v1291_v30 }
 0xf5a   : > { %v1293_v32 = vmul.f32 %v1292_v31, %v1292_v31 }
 0xf5c   : > { %1295 = vrot.lane.b32.xlu2 %v1293_v32, %s1581_s21 }
 0xf64   : > { %1316 = vrot.lane.b32.xlu2 %v1500_v33, %s1582_s15 }
 0xf6c   : > { %1322 = vrot.lane.b32.xlu2 %v1501_v34, %s1582_s15 }
 0xfb6   : > { %v1296_v35 = vpop.permute.xlu2 %1295 }
 0xfb7   : > { %v1298_v36 = vsel %vm1280_vm3, %v1296_v35, 0.0 }
 0xfb8   : > { %1299 = vadd.xlane.f32.xlu0 %v1298_v36 }
 0xfbe   : > { %v1317_v41 = vpop.permute.xlu2 %1316 }
 0xfc6   : > { %v1323_v47 = vpop.permute.xlu2 %1322 }
0x102b   : > { %v1300_v25 = vpop.xlane.xlu0 %1299 }
0x102c   : > { %v1301_v57 = vmul.f32 %v1300_v25, %v1290_v28 }
0x102e   : > { %v1302_v37 = vadd.f32 1e-05, %v1301_v57 }
0x1030   : > { %1552 = vrsqrt.f32 %v1302_v37  ;;  %vm1309_vm6 = vweird.f32 %v1302_v37 }
0x1036   : > { %v1553_v38 = vpop.eup %1552 }
0x1037   : > { %v1304_v39 = vmul.f32 %v1553_v38, %v1302_v37  ;;  %vm1310_vm5 = vweird.f32 %v1553_v38 }
0x1038   : > { %vm1311_vm7 = vmor %vm1309_vm6, %vm1310_vm5 }
0x1039   : > { %v1305_v40 = vmul.f32 %v1553_v38, %v1304_v39 }
0x103b   : > { %v1306_v42 = vmul.f32 0.5, %v1305_v40 }
0x103d   : > { %v1307_v43 = vsub.f32 1.5, %v1306_v42 }
0x103f   : > { %v1308_v44 = vmul.f32 %v1553_v38, %v1307_v43 }
0x1041   : > { %v1312_v45 = vsel %vm1311_vm7, %v1553_v38, %v1308_v44 }
0x1042   : > { %v1313_v46 = vmul.f32 %v1312_v45, %v1292_v31 }
0x1044   : > { %v1319_v48 = vmul.f32 %v1317_v41, %v1313_v46 }
0x1046   : > { %v1325_v51 = vadd.f32 %v1323_v47, %v1319_v48 }
0x1048   : > { %1327 = vrot.lane.b32.xlu2 %v1325_v51, %s1581_s21 }
0x10a2   : > { %v1328_v53 = vpop.permute.xlu2 %1327 }
0x10a3   : > { %1330 = vst.msk [vmem:[%s1942_s8 - $0x4] sm:$0x30] %vm1280_vm3, %v1328_v53 }
0x10a4 PF: > { %p15_p10 = scmp.ge.s32.totalorder %s1646_s9, 4   ;;  %s1943_s27 = smov %s1572_s28 }
0x10a5   : > { %s1944_s28 = smov %s1655_s12  ;;  %s1945_s29 = smov %s1646_s9 }
0x10a6   :  { %17 = sbr.rel (!%p15_p10) target bundleno = 2 (0x2), region = 132 }

// kernel: _layer_step.3
= control target key start
LH: loop header
LB: loop body
LE: loop exit
PB: predicated region body
PF: predicated region fallthrough
CT: control target
= control target key end

     0   :  { %s1467_s0 = inlined_call_operand.<no memory space> [shape: s32[1], index: 0, kind: input, shape index: {}]   ;;  %s1468_s1 = inlined_call_operand.vmem [shape: f32[2,4,128], index: 1, kind: input, shape index: {}]   ;;  %s1469_s2 = inlined_call_operand.vmem [shape: f32[2,8,32], index: 2, kind: input, shape index: {}]   ;;  %s1470_s3 = inlined_call_operand.vmem [shape: bf16[128,32], index: 3, kind: input, shape index: {}]   ;;  %s1471_s4 = inlined_call_operand.vmem [shape: f32[1,32], index: 4, kind: input, shape index: {}]   ;;  %s1472_s5 = inlined_call_operand.vmem [shape: bf16[32,64], index: 5, kind: input, shape index: {}]   ;;  %s1473_s6 = inlined_call_operand.vmem [shape: f32[1,64], index: 6, kind: input, shape index: {}]   ;;  %s1474_s7 = inlined_call_operand.vmem [shape: bf16[32,32], index: 7, kind: input, shape index: {}]   ;;  %s1475_s8 = inlined_call_operand.vmem [shape: f32[1,32], index: 8, kind: input, shape index: {}]   ;;  %s1476_s9 = inlined_call_operand.vmem [shape: f32[1,32], index: 9, kind: input, shape index: {}]   ;;  %s1477_s10 = inlined_call_operand.vmem [shape: f32[1,32], index: 10, kind: input, shape index: {}]   ;;  %s1478_s11 = inlined_call_operand.vmem [shape: bf16[32,64], index: 11, kind: input, shape index: {}]   ;;  %s1479_s12 = inlined_call_operand.vmem [shape: f32[1,64], index: 12, kind: input, shape index: {}]   ;;  %s1480_s13 = inlined_call_operand.vmem [shape: bf16[64,32], index: 13, kind: input, shape index: {}]   ;;  %s1481_s14 = inlined_call_operand.vmem [shape: f32[1,32], index: 14, kind: input, shape index: {}]   ;;  %s1482_s15 = inlined_call_operand.vmem [shape: f32[1,32], index: 15, kind: input, shape index: {}]   ;;  %s1483_s16 = inlined_call_operand.vmem [shape: f32[1,32], index: 16, kind: input, shape index: {}]   ;;  %s1484_s17 = inlined_call_operand.hbm [shape: f32[8,32], index: 17, kind: output, shape index: {}]  }
   0x1   :  { %1486 = sst [smem:[#allocation7_spill]] %s1467_s0 }
   0x2   :  { %1487 = sst [smem:[#allocation8_spill]] %s1468_s1 }
   0x3   :  { %v1029_v0 = vld [vmem:[%s1470_s3 + $0x38] sm:$0xff]  ;;  %v1031_v1 = vld [vmem:[%s1472_s5 + $0x8] sm:$0xff]  ;;  %v1028_v2 = vld [vmem:[%s1470_s3 + $0x30] sm:$0xff]  ;;  %s1488_s23 = sld [smem:[#allocation8_spill]]  ;;  %vm171_vm0 = vcmask 261120  }
   0x4   :  { %135 = vmatpush.bf16.msra.mxu0 %v1029_v0  ;;  %181 = vmatpush.bf16.msra.mxu1 %v1031_v1  ;;  %v1030_v3 = vld [vmem:[%s1472_s5] sm:$0xff]  ;;  %v149_v5 = vld [vmem:[%s1469_s2 + $0x8] sm:$0xff] }
   0x5   :  { %v148_v4 = vld [vmem:[%s1469_s2] sm:$0xff]  ;;  %v1027_v9 = vld [vmem:[%s1470_s3 + $0x28] sm:$0xff] }
   0x6   :  { %v150_v8 = vpack.c.bf16 %v149_v5, %v148_v4 }
   0x8   :  { %136 = vmatpush.bf16.msra.mxu0 %v1028_v2  ;;  %182 = vmatpush.bf16.msra.mxu1 %v1030_v3 }
   0x9   :  { %v57_v6 = vld [vmem:[%s1488_s23] sm:$0xf]  ;;  %v58_v7 = vld [vmem:[%s1488_s23 + $0x4] sm:$0xf] }
   0xa   :  { %61 = vst [vmem:[#allocation1] ss:$2 sm:$0xff] %v57_v6 }
   0xb   :  { %63 = vst [vmem:[#allocation1 + $0x1] ss:$2 sm:$0xff] %v58_v7 }
   0xc   :  { %23 = vsyncpa [#allocation5], 0  ;;  %970 = vmatmul.msk.bf16.vlgmr.msra.gmra.mxu1 %vm171_vm0, %v150_v8  ;;  %137 = vmatpush.bf16.msra.mxu0 %v1027_v9  ;;  %v1026_v10 = vld [vmem:[%s1470_s3 + $0x20] sm:$0xff]  ;;  %v1025_v11 = vld [vmem:[%s1470_s3 + $0x18] sm:$0xff]  ;;  %vm197_vm1 = vcmask 64512   ;;  %s1127_s25 = smov 112   ;;  %v238_v51 = vlaneseq }
   0xd   :  { %v1024_v12 = vld [vmem:[%s1470_s3 + $0x10] sm:$0xff]  ;;  %v1023_v13 = vld [vmem:[%s1470_s3 + $0x8] sm:$0xff]  ;;  %v1022_v14 = vld [vmem:[%s1470_s3] sm:$0xff]  ;;  %s1125_s3 = smov 96   ;;  %s1129_s26 = smov 88   ;;  %vm277_vm2 = vcmask 1043456  }
   0xe   :  { %v1052_v17 = vld [vmem:[%s1473_s6] ss:$0 sm:$0xff]  ;;  %s1126_s6 = smov 120   ;;  %v239_v54 = vand.u32 127, %v238_v51  ;;  %s1489_s27 = sld [smem:[#allocation7_spill]]  ;;  %vm244_vm4 = vcmask 60416  }
   0xf   :  { %v1053_v30 = vld [vmem:[%s1471_s4] ss:$0 sm:$0xff]  ;;  %s1128_s4 = smov 104   ;;  %s1130_s28 = smov 80   ;;  %vm698_vm5 = vcmask 130048   ;;  %vm701_vm6 = vcmask 195584  }
  0x10   :  { %138 = vmatpush.bf16.msra.mxu0 %v1026_v10  ;;  %s1131_s29 = smov 72   ;;  %s1132_s0 = smov 8   ;;  %vm863_vm11 = vcmask 523264  }
  0x11   :  { %s1133_s30 = smov 16   ;;  %s1134_s18 = smov 24  }
  0x12   :  { %v64_v15 = vld.sshfl [vmem:[#allocation1] sm:$0xff pattern:$0x75316420]  ;;  %s1136_s20 = smov [#allocation4]  }
  0x13   :  { %v66_v16 = vpack.c.bf16 %v64_v15, %v64_v15  ;;  %s919_s21 = sshll.u32 %s1136_s20, 4  ;;  %s920_s21 = int_to_ptr.vmem [resolvable:$true] %s919_s21 }
  0x14   :  { %139 = vmatpush.bf16.msra.mxu0 %v1025_v11  ;;  %v240_v55 = vstv %s1489_s27 }
  0x15   :  { %vm1319_vm3 = vcmp.lt.s32.totalorder %v239_v54, %v240_v55 }
  0x18   :  { %140 = vmatpush.bf16.msra.mxu0 %v1024_v12 }
  0x1c   :  { %141 = vmatpush.bf16.msra.mxu0 %v1023_v13 }
  0x20   :  { %142 = vmatpush.bf16.msra.mxu0 %v1022_v14 }
  0x23   :  { %143 = vmatmul.bf16.vlgmr.msra.gmra.mxu0 %v66_v16 }
  0x89   :  { %v184_v18 = vpop.f32.mrf.mxu1 }
  0x8a   :  { %v185_v19 = vadd.f32 %v1052_v17, %v184_v18 }
  0x8c   :  { %v195_v20 = vpack.c.bf16 %v185_v19, %v185_v19 }
  0x8e   :  { %v270_v21 = vunpack.c.l.b16 %v195_v20  ;;  %v202_v22 = vsel %vm197_vm1, %v195_v20, 0 }
  0x8f   :  { %211 = vmatpush.bf16.xpose.msra.mxu2 %v202_v22 }
  0x90   :  { %v1274_v23 = vpack.c.b16 %v270_v21, %v270_v21 }
  0x91   :  { %v186_v24 = vpop.f32.mrf.mxu1 }
  0x92   :  { %272 = vrot.lane.b32.xlu1 %v1274_v23, %s1125_s3  ;;  %v187_v25 = vadd.f32 %v1052_v17, %v186_v24 }
  0x94   :  { %v196_v26 = vpack.c.bf16 %v187_v25, %v187_v25 }
  0x96   :  { %v295_v27 = vunpack.c.l.b16 %v196_v26  ;;  %v221_v28 = vsel %vm197_vm1, %v196_v26, 0 }
  0x97   :  { %230 = vmatpush.bf16.xpose.msra.mxu3 %v221_v28 }
  0x98   :  { %v1279_v29 = vpack.c.b16 %v295_v27, %v295_v27 }
  0x9a   :  { %323 = vrot.lane.b32.xlu1 %v1274_v23, %s1126_s6  ;;  %349 = vrot.lane.b32.xlu2 %v1279_v29, %s1126_s6 }
  0xa0   :  { %v144_v31 = vpop.f32.mrf.mxu0 }
  0xa1   :  { %v1288_v32 = vadd.f32 %v1053_v30, %v144_v31 }
  0xa2   :  { %442 = vrot.lane.b32.xlu1 %v1274_v23, %s1127_s25 }
  0xa3   :  { %v193_v33 = vpack.c.bf16 %v1288_v32, %v1288_v32  ;;  %v190_v34 = vrot.slane %v1288_v32, 4 }
  0xa5   :  { %971 = vmatmul.msk.bf16.vlgmr.msra.gmra.mxu2 %vm197_vm1, %v193_v33  ;;  %v194_v35 = vpack.c.bf16 %v190_v34, %v190_v34  ;;  %v319_v36 = vunpack.c.l.b16 %v193_v33 }
  0xa7   :  { %972 = vmatmul.msk.bf16.vlgmr.msra.gmra.mxu3 %vm197_vm1, %v194_v35  ;;  %v1296_v37 = vpack.c.b16 %v319_v36, %v319_v36  ;;  %v345_v39 = vunpack.c.l.b16 %v194_v35 }
  0xa8   :  { %v146_v38 = vpop.f32.mrf.mxu0 }
  0xa9   :  { %321 = vrot.lane.b32.xlu2 %v1296_v37, %s1126_s6  ;;  %v346_v40 = vpack.c.b16 %v345_v39, %v345_v39 }
  0xaa   :  { %440 = vrot.lane.b32.xlu1 %v1296_v37, %s1127_s25 }
  0xb1   :  { %465 = vrot.lane.b32.xlu2 %v1279_v29, %s1127_s25 }
  0xb2   :  { %558 = vrot.lane.b32.xlu1 %v1274_v23, %s1128_s4 }
  0xb9   :  { %463 = vrot.lane.b32.xlu2 %v346_v40, %s1127_s25 }
  0xba   :  { %579 = vrot.lane.b32.xlu1 %v346_v40, %s1128_s4 }
  0xc1   :  { %581 = vrot.lane.b32.xlu2 %v1279_v29, %s1128_s4 }
  0xc2   :  { %398 = vrot.lane.b32.xlu1 %v1274_v23, %s1129_s26 }
  0xf4   :  { %v350_v41 = vpop.permute.xlu2 %349 }
  0xf5   :  { %v355_v44 = vsel %vm197_vm1, %v350_v41, 0 }
 0x103   :  { %v322_v47 = vpop.permute.xlu2 %321 }
 0x104   :  { %v273_v42 = vpop.permute.xlu1 %272 }
 0x105   :  { %v279_v43 = vsel %vm277_vm2, %v273_v42, 0 }
 0x106   :  { %288 = vmatpush.bf16.msrb.mxu1 %v279_v43 }
 0x10a   :  { %364 = vmatpush.bf16.xpose.msra.mxu1 %v355_v44 }
 0x10b   :  { %v466_v15 = vpop.permute.xlu2 %465 }
 0x10c   :  { %v324_v45 = vpop.permute.xlu1 %323  ;;  %v471_v33 = vsel %vm197_vm1, %v466_v15, 0 }
 0x10d   :  { %v329_v46 = vsel %vm197_vm1, %v324_v45, 0 }
 0x10e   :  { %338 = vmatpush.bf16.xpose.msrb.mxu3 %v329_v46 }
 0x113   :  { %v464_v16 = vpop.permute.xlu2 %463 }
 0x114   :  { %v443_v48 = vpop.permute.xlu1 %442 }
 0x115   :  { %975 = vmatmul.msk.bf16.vlgmr.msrb.gmra.mxu3 %vm197_vm1, %v322_v47  ;;  %v448_v49 = vsel %vm197_vm1, %v443_v48, 0 }
 0x116   :  { %457 = vmatpush.bf16.xpose.msrb.mxu0 %v448_v49 }
 0x11b   :  { %v582_v17 = vpop.permute.xlu2 %581 }
 0x11c   :  { %v441_v50 = vpop.permute.xlu1 %440  ;;  %v587_v36 = vsel %vm197_vm1, %v582_v17, 0 }
 0x11d   :  { %979 = vmatmul.msk.bf16.vlgmr.msrb.gmra.mxu0 %vm197_vm1, %v441_v50 }
 0x124   :  { %v559_v52 = vpop.permute.xlu1 %558 }
 0x125   :  { %v564_v53 = vsel %vm197_vm1, %v559_v52, 0 }
 0x126   :  { %573 = vmatpush.bf16.xpose.msra.mxu0 %v564_v53 }
 0x128   :  { %v213_v56 = vpop.f32.mrf.mxu2 }
 0x129   :  { %v236_v58 = vmul.f32 0.35355338, %v213_v56 }
 0x12a   :  { %v232_v59 = vpop.f32.mrf.mxu3 }
 0x12b   :  { %v237_v60 = vmul.f32 0.35355338, %v232_v59  ;;  %v242_v61 = vsel %vm1319_vm3, %v236_v58, -1e+30 }
 0x12c   :  { %v245_v62 = vsel %vm244_vm4, %v242_v61, -inf }
 0x12d   :  { %246 = vmax.xlane.f32.xlu0 %v245_v62  ;;  %v243_v63 = vsel %vm1319_vm3, %v237_v60, -1e+30 }
 0x12e   :  { %v248_v0 = vsel %vm244_vm4, %v243_v63, -inf }
 0x12f   :  { %249 = vmax.xlane.f32.xlu2 %v248_v0 }
 0x130   :  { %v215_v1 = vpop.f32.mrf.mxu2 }
 0x132   :  { %v234_v2 = vpop.f32.mrf.mxu3 }
 0x198   :  { %v340_v3 = vpop.f32.mrf.mxu3 }
 0x199   :  { %v370_v20 = vmul.f32 0.35355338, %v340_v3 }
 0x19a   :  { %v459_v4 = vpop.f32.mrf.mxu0 }
 0x19b   :  { %v486_v5 = vmul.f32 0.35355338, %v459_v4  ;;  %v372_v22 = vsel %vm1319_vm3, %v370_v20, -1e+30 }
 0x19c   :  { %v374_v24 = vsel %vm244_vm4, %v372_v22, -inf }
 0x19d   :  { %v1331_v6 = vsel %vm1319_vm3, %v486_v5, -1e+30 }
 0x19e   :  { %v490_v7 = vsel %vm244_vm4, %v1331_v6, -inf }
 0x19f   :  { %491 = vmax.xlane.f32.xlu2 %v490_v7 }
 0x1a0   :  { %v342_v8 = vpop.f32.mrf.mxu3  ;;  %v247_v9 = vpop.xlane.xlu0 %246 }
 0x1a1   :  { %v251_v10 = vsub.f32 %v242_v61, %v247_v9 }
 0x1a2   :  { %v461_v11 = vpop.f32.mrf.mxu0  ;;  %v250_v18 = vpop.xlane.xlu2 %249 }
 0x1a3   :  { %v253_v12 = vmul.f32 1.442695, %v251_v10  ;;  %v252_v19 = vsub.f32 %v243_v63, %v250_v18 }
 0x1a5   :  { %1061 = vpow2.f32 %v253_v12  ;;  %v255_v21 = vmul.f32 1.442695, %v252_v19 }
 0x1a7   :  { %1063 = vpow2.f32 %v255_v21 }
 0x1ab   :  { %v1062_v13 = vpop.eup %1061 }
 0x1ac   :  { %v257_v14 = vsel %vm244_vm4, %v1062_v13, 0.0 }
 0x1ad   :  { %258 = vadd.xlane.f32.xlu0 %v257_v14  ;;  %v1342_v25 = vpop.eup %1063 }
 0x1ae   :  { %v260_v26 = vsel %vm244_vm4, %v1342_v25, 0.0 }
 0x1c1   :  { %347 = vrot.lane.b32.xlu0 %v346_v40, %s1126_s6 }
 0x1c9   :  { %556 = vrot.lane.b32.xlu0 %v1296_v37, %s1128_s4  ;;  %v580_v37 = vpop.permute.xlu1 %579 }
 0x1d1   :  { %v399_v8 = vpop.permute.xlu1 %398 }
 0x1d2   :  { %v404_v19 = vsel %vm277_vm2, %v399_v8, 0 }
 0x1f3   :  { %375 = vmax.xlane.f32.xlu0 %v374_v24 }
 0x1fb   :  { %261 = vadd.xlane.f32.xlu0 %v260_v26 }
 0x212   :  { %v492_v63 = vpop.xlane.xlu2 %491 }
 0x213   :  { %v496_v0 = vsub.f32 %v1331_v6, %v492_v63 }
 0x215   :  { %v498_v1 = vmul.f32 1.442695, %v496_v0 }
 0x220   :  { %v259_v27 = vpop.xlane.xlu0 %258 }
 0x221   :  { %1065 = vrcp.f32 %v259_v27 }
 0x227   :  { %v1066_v28 = vpop.eup %1065 }
 0x228   :  { %v265_v30 = vmul.f32 %v1066_v28, %v1062_v13 }
 0x22a   :  { %v267_v31 = vpack.c.bf16 %v265_v30, %v265_v30 }
 0x22c   :  { %973 = vmatmul.msk.bf16.vlgmr.msrb.gmra.mxu1 %vm197_vm1, %v267_v31 }
 0x22d   :  { %480 = vmatpush.bf16.xpose.msrb.mxu1 %v471_v33 }
 0x233   :  { %v348_v34 = vpop.permute.xlu0 %347 }
 0x23b   :  { %v557_v35 = vpop.permute.xlu0 %556 }
 0x23c   :  { %976 = vmatmul.msk.bf16.vlgmr.msra.gmra.mxu1 %vm197_vm1, %v348_v34  ;;  %983 = vmatmul.msk.bf16.vlgmr.msra.gmra.mxu0 %vm197_vm1, %v557_v35 }
 0x23d   :  { %596 = vmatpush.bf16.xpose.msra.mxu1 %v587_v36 }
 0x24c   :  { %980 = vmatmul.msk.bf16.vlgmr.msrb.gmra.mxu1 %vm197_vm1, %v464_v16 }
 0x25c   :  { %984 = vmatmul.msk.bf16.vlgmr.msra.gmra.mxu1 %vm197_vm1, %v580_v37 }
 0x266   :  { %v376_v38 = vpop.xlane.xlu0 %375 }
 0x267   :  { %v380_v39 = vsub.f32 %v372_v22, %v376_v38 }
 0x269   :  { %v382_v40 = vmul.f32 1.442695, %v380_v39 }
 0x26b   :  { %1067 = vpow2.f32 %v382_v40 }
 0x26c   :  { %1069 = vpow2.f32 %v498_v1 }
 0x26e   :  { %v262_v10 = vpop.xlane.xlu0 %261 }
 0x26f   :  { %1071 = vrcp.f32 %v262_v10 }
 0x271   :  { %v1353_v41 = vpop.eup %1067 }
 0x272   :  { %v386_v42 = vsel %vm244_vm4, %v1353_v41, 0.0  ;;  %v1070_v3 = vpop.eup %1069 }
 0x273   :  { %387 = vadd.xlane.f32.xlu1 %v386_v42  ;;  %v502_v5 = vsel %vm244_vm4, %v1070_v3, 0.0 }
 0x275   :  { %v1072_v15 = vpop.eup %1071 }
 0x276   :  { %v266_v16 = vmul.f32 %v1072_v15, %v1342_v25 }
 0x278   :  { %v268_v20 = vpack.c.bf16 %v266_v16, %v266_v16 }
 0x2a9   :  { %v1357_v43 = vpop.f32.mrf.mxu1 }
 0x2b1   :  { %v292_v44 = vpop.f32.mrf.mxu1 }
 0x2b9   :  { %v366_v45 = vpop.f32.mrf.mxu1  ;;  %v575_v46 = vpop.f32.mrf.mxu0 }
 0x2ba   :  { %v371_v47 = vmul.f32 0.35355338, %v366_v45  ;;  %v602_v48 = vmul.f32 0.35355338, %v575_v46 }
 0x2bc   :  { %v604_v49 = vsel %vm1319_vm3, %v602_v48, -1e+30  ;;  %v373_v50 = vsel %vm1319_vm3, %v371_v47, -1e+30 }
 0x2bd   :  { %v606_v51 = vsel %vm244_vm4, %v604_v49, -inf  ;;  %v377_v52 = vsel %vm244_vm4, %v373_v50, -inf }
 0x2be   :  { %607 = vmax.xlane.f32.xlu2 %v606_v51  ;;  %378 = vmax.xlane.f32.xlu1 %v377_v52 }
 0x2c1   :  { %v368_v53 = vpop.f32.mrf.mxu1  ;;  %v577_v54 = vpop.f32.mrf.mxu0 }
 0x2c9   :  { %v482_v55 = vpop.f32.mrf.mxu1 }
 0x2ca   :  { %v487_v56 = vmul.f32 0.35355338, %v482_v55 }
 0x2cc   :  { %v489_v58 = vsel %vm1319_vm3, %v487_v56, -1e+30 }
 0x2cd   :  { %v493_v59 = vsel %vm244_vm4, %v489_v58, -inf }
 0x2ce   :  { %494 = vmax.xlane.f32.xlu0 %v493_v59 }
 0x2d1   :  { %v484_v60 = vpop.f32.mrf.mxu1 }
 0x2d6   :  { %297 = vrot.lane.b32.xlu2 %v1279_v29, %s1125_s3 }
 0x2d7   :  { %514 = vrot.lane.b32.xlu1 %v1274_v23, %s1130_s28 }
 0x2d9   :  { %v598_v61 = vpop.f32.mrf.mxu1 }
 0x2da   :  { %v603_v2 = vmul.f32 0.35355338, %v598_v61 }
 0x2dc   :  { %v605_v4 = vsel %vm1319_vm3, %v603_v2, -1e+30 }
 0x2dd   :  { %v609_v7 = vsel %vm244_vm4, %v605_v4, -inf }
 0x2e1   :  { %v600_v62 = vpop.f32.mrf.mxu1 }
 0x2e2   :  { %419 = vrot.lane.b32.xlu0 %v1279_v29, %s1129_s26 }
 0x2e6   :  { %v388_v9 = vpop.xlane.xlu1 %387 }
 0x2ff   :  { %503 = vadd.xlane.f32.xlu2 %v502_v5 }
 0x301   :  { %610 = vmax.xlane.f32.xlu1 %v609_v7 }
 0x31a   :  { %535 = vrot.lane.b32.xlu1 %v1279_v29, %s1130_s28 }
 0x331   :  { %v608_v6 = vpop.xlane.xlu2 %607  ;;  %v379_v11 = vpop.xlane.xlu1 %378 }
 0x332   :  { %v612_v12 = vsub.f32 %v604_v49, %v608_v6  ;;  %v381_v13 = vsub.f32 %v373_v50, %v379_v11 }
 0x334   :  { %v384_v14 = vmul.f32 1.442695, %v381_v13  ;;  %v614_v57 = vmul.f32 1.442695, %v612_v12 }
 0x336   :  { %1073 = vpow2.f32 %v384_v14 }
 0x337   :  { %1075 = vpow2.f32 %v614_v57 }
 0x338   :  { %1077 = vrcp.f32 %v388_v9 }
 0x339   :  { %v298_v17 = vpop.permute.xlu2 %297 }
 0x33a   :  { %v303_v18 = vsel %vm277_vm2, %v298_v17, 0 }
 0x33b   :  { %312 = vmatpush.bf16.msrb.mxu2 %v303_v18 }
 0x33c   :  { %v1074_v21 = vpop.eup %1073 }
 0x33d   :  { %v389_v22 = vsel %vm244_vm4, %v1074_v21, 0.0  ;;  %v1384_v24 = vpop.eup %1075 }
 0x33e   :  { %974 = vmatmul.msk.bf16.vlgmr.msrb.gmra.mxu2 %vm197_vm1, %v268_v20  ;;  %390 = vadd.xlane.f32.xlu0 %v389_v22  ;;  %v618_v27 = vsel %vm244_vm4, %v1384_v24, 0.0  ;;  %v1078_v30 = vpop.eup %1077  ;;  %v1033_v20 = vld [vmem:[%s1474_s7 + $0x8] sm:$0xff]  ;;  %v1032_v22 = vld [vmem:[%s1474_s7] sm:$0xff] }
 0x33f   :  { %413 = vmatpush.bf16.msra.mxu2 %v404_v19  ;;  %v394_v31 = vmul.f32 %v1078_v30, %v1353_v41  ;;  %741 = vmatpush.bf16.msrb.mxu0 %v1033_v20 }
 0x341   :  { %v495_v26 = vpop.xlane.xlu0 %494  ;;  %v396_v36 = vpack.c.bf16 %v394_v31, %v394_v31 }
 0x342   :  { %v497_v25 = vsub.f32 %v489_v58, %v495_v26 }
 0x343   :  { %742 = vmatpush.bf16.msrb.mxu0 %v1032_v22 }
 0x344   :  { %v500_v28 = vmul.f32 1.442695, %v497_v25  ;;  %619 = vadd.xlane.f32.xlu1 %v618_v27 }
 0x346   :  { %1079 = vpow2.f32 %v500_v28 }
 0x349   :  { %v515_v33 = vpop.permute.xlu1 %514 }
 0x34a   :  { %v520_v34 = vsel %vm277_vm2, %v515_v33, 0 }
 0x34b   :  { %529 = vmatpush.bf16.msrb.mxu2 %v520_v34 }
 0x34c   :  { %v1080_v35 = vpop.eup %1079 }
 0x34d   :  { %v505_v37 = vsel %vm244_vm4, %v1080_v35, 0.0 }
 0x34e   :  { %977 = vmatmul.msk.bf16.vlgmr.msra.gmra.mxu2 %vm197_vm1, %v396_v36  ;;  %506 = vadd.xlane.f32.xlu0 %v505_v37 }
 0x354   :  { %v420_v38 = vpop.permute.xlu0 %419 }
 0x355   :  { %v425_v39 = vsel %vm277_vm2, %v420_v38, 0 }
 0x356   :  { %434 = vmatpush.bf16.msra.mxu3 %v425_v39 }
 0x362   :  { %651 = vrot.lane.b32.xlu0 %v1279_v29, %s1131_s29 }
 0x372   :  { %v504_v40 = vpop.xlane.xlu2 %503 }
 0x373   :  { %1081 = vrcp.f32 %v504_v40 }
 0x374   :  { %v611_v41 = vpop.xlane.xlu1 %610 }
 0x375   :  { %v613_v42 = vsub.f32 %v605_v4, %v611_v41 }
 0x377   :  { %v616_v44 = vmul.f32 1.442695, %v613_v42 }
 0x379   :  { %v1082_v45 = vpop.eup %1081  ;;  %1083 = vpow2.f32 %v616_v44 }
 0x37a   :  { %v510_v46 = vmul.f32 %v1082_v45, %v1070_v3  ;;  %v1135_v45 = vmov 32.0  }
 0x37c   :  { %v512_v47 = vpack.c.bf16 %v510_v46, %v510_v46 }
 0x37e   :  { %981 = vmatmul.msk.bf16.vlgmr.msrb.gmra.mxu2 %vm197_vm1, %v512_v47 }
 0x37f   :  { %v1084_v48 = vpop.eup %1083 }
 0x380   :  { %v621_v49 = vsel %vm244_vm4, %v1084_v48, 0.0 }
 0x381   :  { %622 = vadd.xlane.f32.xlu2 %v621_v49 }
 0x38c   :  { %v536_v50 = vpop.permute.xlu1 %535 }
 0x38d   :  { %v541_v51 = vsel %vm277_vm2, %v536_v50, 0 }
 0x38e   :  { %550 = vmatpush.bf16.msrb.mxu3 %v541_v51 }
 0x399   :  { %630 = vrot.lane.b32.xlu2 %v1274_v23, %s1131_s29 }
 0x3b1   :  { %v391_v29 = vpop.xlane.xlu0 %390 }
 0x3b2   :  { %1085 = vrcp.f32 %v391_v29 }
 0x3b7   :  { %v620_v1 = vpop.xlane.xlu1 %619 }
 0x3b8   :  { %v1086_v52 = vpop.eup %1085 }
 0x3b9   :  { %v395_v53 = vmul.f32 %v1086_v52, %v1074_v21 }
 0x3bb   :  { %v397_v54 = vpack.c.bf16 %v395_v53, %v395_v53 }
 0x3bd   :  { %978 = vmatmul.msk.bf16.vlgmr.msra.gmra.mxu3 %vm197_vm1, %v397_v54 }
 0x3c1   :  { %v1399_v55 = vpop.f32.mrf.mxu2  ;;  %v507_v56 = vpop.xlane.xlu0 %506 }
 0x3c2   :  { %1087 = vrcp.f32 %v507_v56  ;;  %v1034_v56 = vld [vmem:[%s1478_s11] sm:$0xff] }
 0x3c3   :  { %1089 = vrcp.f32 %v620_v1 }
 0x3c8   :  { %v1088_v58 = vpop.eup %1087 }
 0x3c9   :  { %v511_v59 = vmul.f32 %v1088_v58, %v1080_v35  ;;  %v316_v60 = vpop.f32.mrf.mxu2  ;;  %v1090_v3 = vpop.eup %1089  ;;  %v1039_v58 = vld [vmem:[%s1480_s13 + $0x18] sm:$0xff] }
 0x3ca   :  { %v626_v5 = vmul.f32 %v1090_v3, %v1384_v24 }
 0x3cb   :  { %v513_v61 = vpack.c.bf16 %v511_v59, %v511_v59 }
 0x3cc   :  { %v628_v6 = vpack.c.bf16 %v626_v5, %v626_v5  ;;  %v1055_v5 = vld [vmem:[%s1476_s9] ss:$0 sm:$0xff] }
 0x3cd   :  { %982 = vmatmul.msk.bf16.vlgmr.msrb.gmra.mxu3 %vm197_vm1, %v513_v61  ;;  %v1038_v61 = vld [vmem:[%s1480_s13 + $0x10] sm:$0xff] }
 0x3d1   :  { %v415_v62 = vpop.f32.mrf.mxu2 }
 0x3d2   :  { %674 = vrot.lane.b32.xlu1 %v415_v62, %s1132_s0 }
 0x3d4   :  { %v652_v23 = vpop.permute.xlu0 %651 }
 0x3d5   :  { %v657_v63 = vsel %vm277_vm2, %v652_v23, 0  ;;  %v1037_v23 = vld [vmem:[%s1480_s13 + $0x8] sm:$0xff] }
 0x3d6   :  { %666 = vmatpush.bf16.msra.mxu3 %v657_v63 }
 0x3d9   :  { %v417_v0 = vpop.f32.mrf.mxu2 }
 0x3f4   :  { %v623_v2 = vpop.xlane.xlu2 %622 }
 0x3f5   :  { %1091 = vrcp.f32 %v623_v2 }
 0x3f6   :  { %1093 = vrcp.f32 %v1135_v45 }
 0x3fb   :  { %v1092_v4 = vpop.eup %1091 }
 0x3fc   :  { %v627_v7 = vmul.f32 %v1092_v4, %v1084_v48  ;;  %v631_v8 = vpop.permute.xlu2 %630  ;;  %v1094_v46 = vpop.eup %1093 }
 0x3fd   :  { %v636_v9 = vsel %vm277_vm2, %v631_v8, 0  ;;  %v755_v47 = vmul.f32 32.0, %v1094_v46  ;;  %vm759_vm7 = vweird.f32 %v1094_v46  ;;  %v1056_v8 = vld [vmem:[%s1477_s10] ss:$0 sm:$0xff] }
 0x3fe   :  { %v629_v10 = vpack.c.bf16 %v627_v7, %v627_v7  ;;  %645 = vmatpush.bf16.msra.mxu2 %v636_v9 }
 0x3ff   :  { %v756_v48 = vsub.f32 1.0, %v755_v47 }
 0x400   :  { %986 = vmatmul.msk.bf16.vlgmr.msra.gmra.mxu3 %vm197_vm1, %v629_v10 }
 0x401   :  { %v531_v11 = vpop.f32.mrf.mxu2  ;;  %985 = vmatmul.msk.bf16.vlgmr.msra.gmra.mxu2 %vm197_vm1, %v628_v6  ;;  %v757_v49 = vmul.f32 %v1094_v46, %v756_v48 }
 0x402   :  { %682 = vrot.lane.b32.xlu2 %v531_v11, %s1133_s30  ;;  %871 = vmatpush.bf16.msrb.mxu2 %v1039_v58 }
 0x403   :  { %v758_v50 = vadd.f32 %v1094_v46, %v757_v49 }
 0x405   :  { %v760_v51 = vsel %vm759_vm7, %v1094_v46, %v758_v50 }
 0x406   :  { %872 = vmatpush.bf16.msrb.mxu2 %v1038_v61 }
 0x409   :  { %v533_v12 = vpop.f32.mrf.mxu2 }
 0x40a   :  { %873 = vmatpush.bf16.msrb.mxu2 %v1037_v23  ;;  %v1036_v12 = vld [vmem:[%s1480_s13] sm:$0xff] }
 0x40e   :  { %874 = vmatpush.bf16.msrb.mxu2 %v1036_v12 }
 0x440   :  { %v436_v13 = vpop.f32.mrf.mxu3 }
 0x441   :  { %676 = vrot.lane.b32.xlu0 %v436_v13, %s1132_s0  ;;  %v1057_v13 = vld [vmem:[%s1479_s12] ss:$0 sm:$0xff] }
 0x444   :  { %v675_v24 = vpop.permute.xlu1 %674 }
 0x445   :  { %v696_v26 = vsel %vm197_vm1, %v1357_v43, %v675_v24  ;;  %v1054_v43 = vld [vmem:[%s1475_s8] ss:$0 sm:$0xff]  ;;  %s921_s8 = sshll.u32 %s1484_s17, 4  ;;  %s922_s8 = int_to_ptr.hbm [resolvable:$true] %s921_s8 }
 0x448   :  { %v438_v14 = vpop.f32.mrf.mxu3 }
 0x450   :  { %v552_v15 = vpop.f32.mrf.mxu3 }
 0x451   :  { %684 = vrot.lane.b32.xlu0 %v552_v15, %s1133_s30 }
 0x458   :  { %v554_v57 = vpop.f32.mrf.mxu3 }
 0x45c   :  { %v683_v21 = vpop.permute.xlu2 %682 }
 0x45d   :  { %v699_v25 = vsel %vm698_vm5, %v696_v26, %v683_v21 }
 0x483   :  { %v668_v16 = vpop.f32.mrf.mxu3 }
 0x484   :  { %v647_v17 = vpop.f32.mrf.mxu2  ;;  %692 = vrot.lane.b32.xlu0 %v668_v16, %s1134_s18 }
 0x485   :  { %690 = vrot.lane.b32.xlu2 %v647_v17, %s1134_s18 }
 0x48b   :  { %v670_v18 = vpop.f32.mrf.mxu3 }
 0x48c   :  { %v649_v19 = vpop.f32.mrf.mxu2  ;;  %v1058_v18 = vld [vmem:[%s1481_s14] ss:$0 sm:$0xff] }
 0x4b3   :  { %v677_v30 = vpop.permute.xlu0 %676 }
 0x4b4   :  { %v697_v33 = vsel %vm197_vm1, %v1399_v55, %v677_v30 }
 0x4c3   :  { %v685_v31 = vpop.permute.xlu0 %684 }
 0x4c4   :  { %v700_v34 = vsel %vm698_vm5, %v697_v33, %v685_v31 }
 0x4df   :  { %v691_v27 = vpop.permute.xlu2 %690 }
 0x4e0   :  { %v702_v28 = vsel %vm701_vm6, %v699_v25, %v691_v27 }
 0x4e1   :  { %706 = vst [vmem:[#allocation1] ss:$2 sm:$0xff] %v702_v28 }
 0x4f6   :  { %v693_v35 = vpop.permute.xlu0 %692 }
 0x4f7   :  { %v703_v36 = vsel %vm701_vm6, %v700_v34, %v693_v35 }
 0x4f8   :  { %708 = vst [vmem:[#allocation1 + $0x1] ss:$2 sm:$0xff] %v703_v36 }
 0x4ff   :  { %v709_v37 = vld.sshfl [vmem:[#allocation1] sm:$0xff pattern:$0x75316420] }
 0x500   :  { %v711_v38 = vpack.c.bf16 %v709_v37, %v709_v37 }
 0x502   :  { %995 = vmatmul.msk.bf16.vlgmr.msrb.gmra.mxu0 %vm171_vm0, %v711_v38 }
 0x57f   :  { %v744_v39 = vpop.f32.mrf.mxu0 }
 0x580   :  { %v745_v40 = vadd.f32 %v1054_v43, %v744_v39 }
 0x582   :  { %v748_v41 = vadd.f32 %v745_v40, %v1288_v32  ;;  %v1035_v32 = vld [vmem:[%s1478_s11 + $0x8] sm:$0xff]  ;;  %v1059_v40 = vld [vmem:[%s1482_s15] ss:$0 sm:$0xff] }
 0x583   :  { %818 = vmatpush.bf16.msrb.mxu1 %v1035_v32 }
 0x584   :  { %v751_v42 = vsel %vm171_vm0, %v748_v41, 0.0 }
 0x585   :  { %752 = vadd.xlane.f32.xlu2 %v751_v42 }
 0x587   :  { %v746_v44 = vpop.f32.mrf.mxu0  ;;  %819 = vmatpush.bf16.msrb.mxu1 %v1034_v56 }
 0x588   :  { %v1060_v44 = vld [vmem:[%s1483_s16] ss:$0 sm:$0xff] }
 0x5f8   :  { %v753_v29 = vpop.xlane.xlu2 %752 }
 0x5f9   :  { %v761_v52 = vmul.f32 %v760_v51, %v753_v29 }
 0x5fb   :  { %v762_v53 = vsub.f32 %v748_v41, %v761_v52 }
 0x5fd   :  { %v763_v54 = vmul.f32 %v762_v53, %v762_v53 }
 0x5ff   :  { %v764_v55 = vsel %vm171_vm0, %v763_v54, 0.0 }
 0x600   :  { %765 = vadd.xlane.f32.xlu1 %v764_v55 }
 0x673   :  { %v766_v59 = vpop.xlane.xlu1 %765 }
 0x674   :  { %v767_v60 = vmul.f32 %v766_v59, %v760_v51 }
 0x676   :  { %v768_v62 = vadd.f32 1e-05, %v767_v60 }
 0x678   :  { %1095 = vrsqrt.f32 %v768_v62  ;;  %vm775_vm9 = vweird.f32 %v768_v62 }
 0x67e   :  { %v1096_v63 = vpop.eup %1095 }
 0x67f   :  { %v770_v0 = vmul.f32 %v1096_v63, %v768_v62  ;;  %vm776_vm8 = vweird.f32 %v1096_v63 }
 0x680   :  { %vm777_vm10 = vmor %vm775_vm9, %vm776_vm8 }
 0x681   :  { %v771_v1 = vmul.f32 %v1096_v63, %v770_v0 }
 0x683   :  { %v772_v2 = vmul.f32 0.5, %v771_v1 }
 0x685   :  { %v773_v3 = vsub.f32 1.5, %v772_v2 }
 0x687   :  { %v774_v4 = vmul.f32 %v1096_v63, %v773_v3 }
 0x689   :  { %v778_v7 = vsel %vm777_vm10, %v1096_v63, %v774_v4 }
 0x68a   :  { %v779_v9 = vmul.f32 %v778_v7, %v762_v53 }
 0x68c   :  { %v783_v10 = vmul.f32 %v1055_v5, %v779_v9 }
 0x68e   :  { %v787_v6 = vadd.f32 %v1056_v8, %v783_v10 }
 0x690   :  { %v788_v11 = vpack.c.bf16 %v787_v6, %v787_v6 }
 0x692   :  { %1004 = vmatmul.msk.bf16.vlgmr.msrb.gmra.mxu1 %vm171_vm0, %v788_v11 }
 0x70f   :  { %v821_v14 = vpop.f32.mrf.mxu1 }
 0x710   :  { %v822_v15 = vadd.f32 %v1057_v13, %v821_v14 }
 0x712   :  { %v825_v57 = vmax.f32 %v822_v15, 0.0 }
 0x714   :  { %v826_v16 = vpack.c.bf16 %v825_v57, %v825_v57 }
 0x716   :  { %1021 = vmatmul.msk.bf16.vlgmr.msrb.gmra.mxu2 %vm863_vm11, %v826_v16 }
 0x717   :  { %v823_v17 = vpop.f32.mrf.mxu1 }
 0x799   :  { %v876_v19 = vpop.f32.mrf.mxu2 }
 0x79a   :  { %v877_v20 = vadd.f32 %v1058_v18, %v876_v19 }
 0x79c   :  { %v880_v21 = vadd.f32 %v877_v20, %v787_v6 }
 0x79e   :  { %v883_v22 = vsel %vm171_vm0, %v880_v21, 0.0 }
 0x79f   :  { %884 = vadd.xlane.f32.xlu0 %v883_v22 }
 0x7a1   :  { %v878_v24 = vpop.f32.mrf.mxu2 }
 0x812   :  { %v885_v26 = vpop.xlane.xlu0 %884 }
 0x813   :  { %v886_v25 = vmul.f32 %v885_v26, %v760_v51 }
 0x815   :  { %v887_v27 = vsub.f32 %v880_v21, %v886_v25 }
 0x817   :  { %v888_v28 = vmul.f32 %v887_v27, %v887_v27 }
 0x819   :  { %v889_v30 = vsel %vm171_vm0, %v888_v28, 0.0 }
 0x81a   :  { %890 = vadd.xlane.f32.xlu2 %v889_v30 }
 0x88d   :  { %v891_v31 = vpop.xlane.xlu2 %890 }
 0x88e   :  { %v892_v33 = vmul.f32 %v891_v31, %v760_v51 }
 0x890   :  { %v893_v34 = vadd.f32 1e-05, %v892_v33 }
 0x892   :  { %1097 = vrsqrt.f32 %v893_v34  ;;  %vm900_vm13 = vweird.f32 %v893_v34 }
 0x898   :  { %v1098_v35 = vpop.eup %1097 }
 0x899   :  { %v895_v36 = vmul.f32 %v1098_v35, %v893_v34  ;;  %vm901_vm12 = vweird.f32 %v1098_v35 }
 0x89a   :  { %vm902_vm14 = vmor %vm900_vm13, %vm901_vm12 }
 0x89b   :  { %v896_v37 = vmul.f32 %v1098_v35, %v895_v36 }
 0x89d   :  { %v897_v38 = vmul.f32 0.5, %v896_v37 }
 0x89f   :  { %v898_v43 = vsub.f32 1.5, %v897_v38 }
 0x8a1   :  { %v899_v39 = vmul.f32 %v1098_v35, %v898_v43 }
 0x8a3   :  { %v903_v41 = vsel %vm902_vm14, %v1098_v35, %v899_v39 }
 0x8a4   :  { %v904_v42 = vmul.f32 %v903_v41, %v887_v27 }
 0x8a6   :  { %v908_v45 = vmul.f32 %v1059_v40, %v904_v42 }
 0x8a8   :  { %v912_v46 = vadd.f32 %v1060_v44, %v908_v45 }
 0x8aa   :  { %913 = vst.msk [vmem:[#allocation4] sm:$0xff] %vm171_vm0, %v912_v46 }
 0x8ab   :  { %924 = dma.vmem_to_hbm [thread:$0]  %s920_s21, 128, %s922_s8, [#allocation5]  }
 0x8ac   :  { %1123 = dma.done.wait [#allocation5], 128  }
 0x8ad   :  { %1124 = vsyncadd [#allocation5], 4294967168 }
 0x8ae   :  { %929 = vsyncpa [#allocation5], 1 }

</bundles_post_ra>
